<compile_context>
chip_gen: v7x
topology: tpu7x:2x2x1
jax: 0.10.0
libtpu: 0.0.40
codegen_flags: <defaults>
</compile_context>

<pallas_src>
import math
import functools

import jax
import jax.numpy as jnp
from jax import lax
from jax.experimental import pallas as pl
from jax.experimental.pallas import tpu as pltpu

EPS = 1e-6  # LayerNormalization eps


# --------------------------- VMEM budget / tiling ---------------------------

def _vmem_limit_bytes():
    """Explicit scoped-VMEM limit: ~3/4 of physical capacity (capped)."""
    try:
        cap = int(pltpu.get_tpu_info().vmem_capacity_bytes)
    except Exception:
        cap = 64 << 20  # conservative (v7x-sized) fallback
    return max(16 << 20, min(cap * 3 // 4, 100 << 20))


_VMEM_LIMIT = _vmem_limit_bytes()

# Flipped to False (and re-traced) if this jax version rejects
# pipeline_mode=pl.Buffered(1) on pallas_call BlockSpecs.
_BUFFER_CONST_WEIGHTS = [True]


def _const_spec(block_shape):
    """BlockSpec for a grid-invariant (weight / LN-param) input.

    The block index is constant across the grid, so single-buffering it frees
    half of the weight VMEM footprint (matters at real D/DFF sizes)."""
    idx = lambda *_: (0,) * len(block_shape)
    if _BUFFER_CONST_WEIGHTS[0]:
        return pl.BlockSpec(block_shape, idx, pipeline_mode=pl.Buffered(1))
    return pl.BlockSpec(block_shape, idx)


def _cparams(*semantics):
    return pltpu.CompilerParams(dimension_semantics=semantics,
                                vmem_limit_bytes=_VMEM_LIMIT)


def _row_tile(rows, target):
    """Largest multiple of 8 <= target that evenly divides rows (full rows for
    small problems)."""
    if rows <= target:
        return rows
    t = (min(target, rows) // 8) * 8
    while t >= 8:
        if rows % t == 0:
            return t
        t -= 8
    return rows


def _ffn_row_tile(rows, d, dff):
    """Row tile for the LN+FFN kernel, derived from the VMEM budget left after
    the single-buffered bf16 weights."""
    weight_bytes = 2 * d * dff * 2 + 4 * (4 * d + dff)      # w1+w2 bf16, biases/LN f32
    budget = max(_VMEM_LIMIT - weight_bytes - (4 << 20), 2 << 20)
    per_row = 4 * (2 * d + 2 * d + 2 * dff)                 # in(2buf)+out(2buf)+hidden
    target = budget // max(per_row, 1)
    target = max(8, min(512, (int(target) // 8) * 8))
    return _row_tile(rows, target)


def _q_tile(seq_len):
    """Query tile for the attention kernel ((tq, S) f32 scores per head)."""
    target = 256 if _VMEM_LIMIT >= (48 << 20) else 128
    return _row_tile(seq_len, target)


# ------------------------------ shared LN math ------------------------------

def _ln(x, alpha, bias):
    # Matches the PyTorch reference: alpha*(x-mean)/(x.std(-1)+eps)+bias,
    # with torch's Bessel-corrected (unbiased) std.  One narrow per-row divide
    # instead of a full-tile divide.
    d = x.shape[-1]
    mean = jnp.mean(x, axis=-1, keepdims=True)
    cent = x - mean
    var = jnp.sum(cent * cent, axis=-1, keepdims=True) * (1.0 / (d - 1))
    inv = 1.0 / (jnp.sqrt(var) + EPS)          # (rows, 1) — narrow
    return alpha * (cent * inv) + bias


# ------------------------------- Pallas kernels ------------------------------

def _attn_block_kernel(x_full_ref, x_tile_ref, m_ref,
                       a_ref, b_ref, wq_ref, wkv_ref, wo_ref,
                       o_ref, kv_scr, *, num_heads):
    # Fused sublayer 1: x = x + W_o(self_attention(LN(x)))
    # grid = (batch [parallel], query-tile [arbitrary]).
    qi = pl.program_id(1)
    d = x_tile_ref.shape[-1]
    dk = d // num_heads

    # ---- once per batch element: K|V for the whole sequence into VMEM scratch
    @pl.when(qi == 0)
    def _():
        xn_full = _ln(x_full_ref[0], a_ref[...], b_ref[...])
        kv = jnp.dot(xn_full.astype(jnp.bfloat16), wkv_ref[...],
                     preferred_element_type=jnp.float32)
        kv_scr[...] = kv.astype(jnp.bfloat16)                  # (S, 2D) bf16

    # ---- per query tile: Q projection (scale folded into W_q), attention,
    #      W_o projection and residual add (dropout = identity).
    xt = x_tile_ref[0]                                         # (tq, D) f32 residual
    q = jnp.dot(_ln(xt, a_ref[...], b_ref[...]).astype(jnp.bfloat16),
                wq_ref[...], preferred_element_type=jnp.float32
                ).astype(jnp.bfloat16)                         # (tq, D)
    m = m_ref[0]                                               # (1, S) additive mask

    acc = jnp.zeros(xt.shape, jnp.float32)
    # Static unroll over heads; each head's contribution is folded into `acc`
    # immediately (== concat(heads) @ W_o) so only one head's scores/exp/ctx
    # are live at a time and no lane-axis concatenate is needed.
    for h in range(num_heads):
        qh = q[:, h * dk:(h + 1) * dk]                         # (tq, dk)
        kh = kv_scr[:, h * dk:(h + 1) * dk]                    # (S, dk) bf16
        vh = kv_scr[:, d + h * dk: d + (h + 1) * dk]           # (S, dk) bf16
        # scores = q @ k^T without an explicit transpose: contract over dk.
        s = lax.dot_general(qh, kh, (((1,), (1,)), ((), ())),
                            preferred_element_type=jnp.float32)  # (tq, S)
        s = s + m                                              # masked_fill(mask==0,-1e9)
        smax = jnp.max(s, axis=-1, keepdims=True)
        e = jnp.exp(s - smax)
        p = e * pl.reciprocal(jnp.sum(e, axis=-1, keepdims=True), approx=True)
        ctx = jnp.dot(p.astype(jnp.bfloat16), vh,
                      preferred_element_type=jnp.float32)      # (tq, dk)
        acc = acc + jnp.dot(ctx.astype(jnp.bfloat16),
                            wo_ref[h * dk:(h + 1) * dk, :],
                            preferred_element_type=jnp.float32)
    o_ref[0] = xt + acc


def _ln_ffn_res_kernel(x_ref, a_ref, b_ref, w1_ref, b1_ref, w2_ref, b2_ref,
                       *rest, final_ln):
    # Fused sublayer 2: x = x + linear2(relu(linear1(LN(x)))),
    # optionally followed by the final encoder LayerNorm (last layer only).
    if final_ln:
        na_ref, nb_ref, o_ref = rest
    else:
        (o_ref,) = rest
    x = x_ref[...]
    xn = _ln(x, a_ref[...], b_ref[...])
    h = jnp.dot(xn.astype(jnp.bfloat16), w1_ref[...],
                preferred_element_type=jnp.float32) + b1_ref[...]
    h = jnp.maximum(h, 0.0)
    ff = jnp.dot(h.astype(jnp.bfloat16), w2_ref[...],
                 preferred_element_type=jnp.float32) + b2_ref[...]
    y = x + ff
    if final_ln:
        y = _ln(y, na_ref[...], nb_ref[...])
    o_ref[...] = y


# ------------------------------ kernel wrappers ------------------------------

def attn_sublayer(x3, mask_add, ln_a, ln_b, w_q, w_kv, w_o, num_heads, tq):
    B, S, D = x3.shape
    n_qt = S // tq
    kern = functools.partial(_attn_block_kernel, num_heads=num_heads)
    return pl.pallas_call(
        kern,
        out_shape=jax.ShapeDtypeStruct((B, S, D), jnp.float32),
        grid=(B, n_qt),
        in_specs=[
            # full sequence (resident across the query-tile axis -> K|V source)
            pl.BlockSpec((1, S, D), lambda b, qi: (b, 0, 0)),
            # current query tile (residual + Q source)
            pl.BlockSpec((1, tq, D), lambda b, qi: (b, qi, 0)),
            # additive key mask
            pl.BlockSpec((1, 1, S), lambda b, qi: (b, 0, 0)),
            _const_spec((1, D)),            # LN alpha
            _const_spec((1, D)),            # LN bias
            _const_spec((D, D)),            # W_q (1/sqrt(dk) folded in), bf16
            _const_spec((D, 2 * D)),        # W_k | W_v, bf16
            _const_spec((D, D)),            # W_o, bf16
        ],
        out_specs=pl.BlockSpec((1, tq, D), lambda b, qi: (b, qi, 0)),
        scratch_shapes=[pltpu.VMEM((S, 2 * D), jnp.bfloat16)],   # K|V cache
        compiler_params=_cparams("parallel", "arbitrary"),
    )(x3, x3, mask_add, ln_a.reshape(1, D), ln_b.reshape(1, D), w_q, w_kv, w_o)


def ln_ffn_res(x2d, ln_a, ln_b, w1, b1, w2, b2, final_norm=None):
    rows, d = x2d.shape
    dff = w1.shape[1]
    tm = _ffn_row_tile(rows, d, dff)
    final_ln = final_norm is not None

    in_specs = [
        pl.BlockSpec((tm, d), lambda i: (i, 0)),
        _const_spec((1, d)), _const_spec((1, d)),
        _const_spec((d, dff)), _const_spec((1, dff)),
        _const_spec((dff, d)), _const_spec((1, d)),
    ]
    args = [x2d, ln_a.reshape(1, d), ln_b.reshape(1, d),
            w1, b1.reshape(1, dff), w2, b2.reshape(1, d)]
    if final_ln:
        na, nb = final_norm
        in_specs += [_const_spec((1, d)), _const_spec((1, d))]
        args += [na.reshape(1, d), nb.reshape(1, d)]

    kern = functools.partial(_ln_ffn_res_kernel, final_ln=final_ln)
    return pl.pallas_call(
        kern,
        out_shape=jax.ShapeDtypeStruct((rows, d), jnp.float32),
        grid=(rows // tm,),
        in_specs=in_specs,
        out_specs=pl.BlockSpec((tm, d), lambda i: (i, 0)),
        compiler_params=_cparams("parallel"),
    )(*args)


# ------------------------------ encoder forward ------------------------------

def encoder_forward(x, mask, params, num_heads):
    B, S, D = x.shape
    rows = B * S
    # additive key mask: 0.0 for kept positions, -1e9 for masked positions
    mask_add = (mask.astype(jnp.float32) - 1.0) * 1e9          # (B, 1, S)
    tq = _q_tile(S)

    layers = params["layers"]
    n_layers = len(layers)
    if n_layers == 0:  # degenerate Encoder: just the final LayerNorm
        return _ln(x.reshape(rows, D), params["norm_a"], params["norm_b"]).reshape(B, S, D)

    x3 = x
    for li, lp in enumerate(layers):
        # ---- sublayer 1: x = x + W_o(self_attention(LN(x)))  (one fused call)
        x3 = attn_sublayer(x3, mask_add, lp["ln1_a"], lp["ln1_b"],
                           lp["w_q"], lp["w_kv"], lp["w_o"], num_heads, tq)
        # ---- sublayer 2: x = x + FFN(LN(x))  (+ final encoder LN on last layer)
        final_norm = (params["norm_a"], params["norm_b"]) if li == n_layers - 1 else None
        x2 = ln_ffn_res(x3.reshape(rows, D), lp["ln2_a"], lp["ln2_b"],
                        lp["w1"], lp["b1"], lp["w2"], lp["b2"], final_norm)
        x3 = x2.reshape(B, S, D)
    return x3


# ------------------------------ parameter setup ------------------------------

def init_params(key, num_layers, d_model, d_ff, num_heads):
    dk = d_model // num_heads
    scale = 1.0 / math.sqrt(dk)
    params = {"layers": []}
    for _ in range(num_layers):
        keys = jax.random.split(key, 7)
        key = keys[-1]
        s_attn = 1.0 / math.sqrt(d_model)
        s_ff = 1.0 / math.sqrt(d_ff)
        w_q = jax.random.normal(keys[0], (d_model, d_model), jnp.float32) * s_attn
        w_k = jax.random.normal(keys[1], (d_model, d_model), jnp.float32) * s_attn
        w_v = jax.random.normal(keys[2], (d_model, d_model), jnp.float32) * s_attn
        w_o = jax.random.normal(keys[3], (d_model, d_model), jnp.float32) * s_attn
        w1 = jax.random.normal(keys[4], (d_model, d_ff), jnp.float32) * s_attn
        w2 = jax.random.normal(keys[5], (d_ff, d_model), jnp.float32) * s_ff
        lp = {
            # attention projections (bias=False), pre-transposed to (Din, Dout);
            # 1/sqrt(dk) score scale folded into W_q; K|V concatenated; bf16 storage.
            "w_q": (w_q * scale).astype(jnp.bfloat16),
            "w_kv": jnp.concatenate([w_k, w_v], axis=1).astype(jnp.bfloat16),
            "w_o": w_o.astype(jnp.bfloat16),
            # feed-forward block
            "w1": w1.astype(jnp.bfloat16),
            "b1": jnp.zeros((d_ff,), jnp.float32),
            "w2": w2.astype(jnp.bfloat16),
            "b2": jnp.zeros((d_model,), jnp.float32),
            # residual-connection LayerNorms (alpha=ones, bias=zeros), f32
            "ln1_a": jnp.ones((d_model,), jnp.float32),
            "ln1_b": jnp.zeros((d_model,), jnp.float32),
            "ln2_a": jnp.ones((d_model,), jnp.float32),
            "ln2_b": jnp.zeros((d_model,), jnp.float32),
        }
        params["layers"].append(lp)
    params["norm_a"] = jnp.ones((d_model,), jnp.float32)
    params["norm_b"] = jnp.zeros((d_model,), jnp.float32)
    return params


# ------------------------------------ main ------------------------------------

if __name__ == "__main__":
    B, S, D, H, DFF, NUM_LAYERS = 2, 8, 32, 4, 64, 2

    root = jax.random.PRNGKey(0)
    k_x, k_p = jax.random.split(root)

    x = jax.random.normal(k_x, (B, S, D), jnp.float32)
    # src mask: batch 0 fully valid, batch 1 has last 2 key positions masked
    mask = jnp.ones((B, 1, S), jnp.float32)
    mask = mask.at[1, 0, 6:].set(0.0)

    params = init_params(k_p, NUM_LAYERS, D, DFF, H)

    def run():
        fwd = jax.jit(functools.partial(encoder_forward, num_heads=H))
        return jax.block_until_ready(fwd(x, mask, params))

    try:
        out = run()
    except Exception:
        # Fallback: if this jax/libtpu version rejects pipeline_mode=pl.Buffered
        # on pallas_call BlockSpecs, retrace with default double-buffered specs.
        _BUFFER_CONST_WEIGHTS[0] = False
        out = run()

    assert out.shape == (B, S, D)
    assert bool(jnp.all(jnp.isfinite(out)))
    print("KERNEL_OK")
</pallas_src>

<mosaic_0001>
module attributes {stable_mosaic.version = 11 : i64} {
  func.func @_ln_ffn_res_kernel(%arg0: i32, %arg1: memref<16x32xf32, #tpu.memory_space<vmem>>, %arg2: memref<1x32xf32, #tpu.memory_space<vmem>>, %arg3: memref<1x32xf32, #tpu.memory_space<vmem>>, %arg4: memref<32x64xbf16, #tpu.memory_space<vmem>>, %arg5: memref<1x64xf32, #tpu.memory_space<vmem>>, %arg6: memref<64x32xbf16, #tpu.memory_space<vmem>>, %arg7: memref<1x32xf32, #tpu.memory_space<vmem>>, %arg8: memref<16x32xf32, #tpu.memory_space<vmem>>) attributes {dimension_semantics = [#tpu.dimension_semantics<parallel>], iteration_bounds = array<i64: 1>, scalar_prefetch = 0 : i64, scratch_operands = 0 : i64, tpu.core_type = #tpu.core_type<tc>, window_params = [{transform_indices = @transform_0, window_bounds = array<i64: 16, 32>}, {pipeline_mode = #tpu.pipeline_mode<synchronous>, transform_indices = @transform_1, window_bounds = array<i64: 1, 32>}, {pipeline_mode = #tpu.pipeline_mode<synchronous>, transform_indices = @transform_2, window_bounds = array<i64: 1, 32>}, {pipeline_mode = #tpu.pipeline_mode<synchronous>, transform_indices = @transform_3, window_bounds = array<i64: 32, 64>}, {pipeline_mode = #tpu.pipeline_mode<synchronous>, transform_indices = @transform_4, window_bounds = array<i64: 1, 64>}, {pipeline_mode = #tpu.pipeline_mode<synchronous>, transform_indices = @transform_5, window_bounds = array<i64: 64, 32>}, {pipeline_mode = #tpu.pipeline_mode<synchronous>, transform_indices = @transform_6, window_bounds = array<i64: 1, 32>}, {transform_indices = @transform_7, window_bounds = array<i64: 16, 32>}]} {
    %c0 = arith.constant 0 : index
    %c0_0 = arith.constant 0 : index
    %0 = vector.load %arg1[%c0, %c0_0] : memref<16x32xf32, #tpu.memory_space<vmem>>, vector<16x32xf32>
    %c0_1 = arith.constant 0 : index
    %c0_2 = arith.constant 0 : index
    %1 = vector.load %arg2[%c0_1, %c0_2] : memref<1x32xf32, #tpu.memory_space<vmem>>, vector<1x32xf32>
    %c0_3 = arith.constant 0 : index
    %c0_4 = arith.constant 0 : index
    %2 = vector.load %arg3[%c0_3, %c0_4] : memref<1x32xf32, #tpu.memory_space<vmem>>, vector<1x32xf32>
    %cst = arith.constant dense<0.000000e+00> : vector<16xf32>
    %3 = vector.multi_reduction <add>, %0, %cst [1] : vector<16x32xf32> to vector<16xf32>
    %4 = vector.shape_cast %3 : vector<16xf32> to vector<16x1xf32>
    %cst_5 = arith.constant 3.200000e+01 : f32
    %5 = vector.broadcast %cst_5 : f32 to vector<16x1xf32>
    %6 = arith.divf %4, %5 : vector<16x1xf32>
    %7 = vector.broadcast %6 : vector<16x1xf32> to vector<16x32xf32>
    %8 = arith.subf %0, %7 : vector<16x32xf32>
    %9 = arith.mulf %8, %8 : vector<16x32xf32>
    %cst_6 = arith.constant dense<0.000000e+00> : vector<16xf32>
    %10 = vector.multi_reduction <add>, %9, %cst_6 [1] : vector<16x32xf32> to vector<16xf32>
    %11 = vector.shape_cast %10 : vector<16xf32> to vector<16x1xf32>
    %cst_7 = arith.constant 0.0322580636 : f32
    %12 = vector.broadcast %cst_7 : f32 to vector<16x1xf32>
    %13 = arith.mulf %11, %12 : vector<16x1xf32>
    %14 = math.sqrt %13 : vector<16x1xf32>
    %cst_8 = arith.constant 9.99999997E-7 : f32
    %15 = vector.broadcast %cst_8 : f32 to vector<16x1xf32>
    %16 = arith.addf %14, %15 : vector<16x1xf32>
    %cst_9 = arith.constant 1.000000e+00 : f32
    %17 = vector.broadcast %cst_9 : f32 to vector<16x1xf32>
    %18 = arith.divf %17, %16 : vector<16x1xf32>
    %19 = vector.broadcast %18 : vector<16x1xf32> to vector<16x32xf32>
    %20 = arith.mulf %8, %19 : vector<16x32xf32>
    %21 = vector.broadcast %1 : vector<1x32xf32> to vector<16x32xf32>
    %22 = arith.mulf %21, %20 : vector<16x32xf32>
    %23 = vector.broadcast %2 : vector<1x32xf32> to vector<16x32xf32>
    %24 = arith.addf %22, %23 : vector<16x32xf32>
    %25 = arith.truncf %24 : vector<16x32xf32> to vector<16x32xbf16>
    %c0_10 = arith.constant 0 : index
    %c0_11 = arith.constant 0 : index
    %26 = vector.load %arg4[%c0_10, %c0_11] : memref<32x64xbf16, #tpu.memory_space<vmem>>, vector<32x64xbf16>
    %cst_12 = arith.constant dense<0.000000e+00> : vector<16x64xf32>
    %27 = tpu.matmul %25, %26, %cst_12 {dimension_numbers = #tpu.dot_dimension_numbers<[1], [0], [0], [1], [0, 0, 1, 1], [], []>} : vector<16x32xbf16>, vector<32x64xbf16>, vector<16x64xf32> -> vector<16x64xf32>
    %c0_13 = arith.constant 0 : index
    %c0_14 = arith.constant 0 : index
    %28 = vector.load %arg5[%c0_13, %c0_14] : memref<1x64xf32, #tpu.memory_space<vmem>>, vector<1x64xf32>
    %29 = vector.broadcast %28 : vector<1x64xf32> to vector<16x64xf32>
    %30 = arith.addf %27, %29 : vector<16x64xf32>
    %cst_15 = arith.constant 0.000000e+00 : f32
    %31 = vector.broadcast %cst_15 : f32 to vector<16x64xf32>
    %32 = arith.maximumf %30, %31 : vector<16x64xf32>
    %33 = arith.truncf %32 : vector<16x64xf32> to vector<16x64xbf16>
    %c0_16 = arith.constant 0 : index
    %c0_17 = arith.constant 0 : index
    %34 = vector.load %arg6[%c0_16, %c0_17] : memref<64x32xbf16, #tpu.memory_space<vmem>>, vector<64x32xbf16>
    %cst_18 = arith.constant dense<0.000000e+00> : vector<16x32xf32>
    %35 = tpu.matmul %33, %34, %cst_18 {dimension_numbers = #tpu.dot_dimension_numbers<[1], [0], [0], [1], [0, 0, 1, 1], [], []>} : vector<16x64xbf16>, vector<64x32xbf16>, vector<16x32xf32> -> vector<16x32xf32>
    %c0_19 = arith.constant 0 : index
    %c0_20 = arith.constant 0 : index
    %36 = vector.load %arg7[%c0_19, %c0_20] : memref<1x32xf32, #tpu.memory_space<vmem>>, vector<1x32xf32>
    %37 = vector.broadcast %36 : vector<1x32xf32> to vector<16x32xf32>
    %38 = arith.addf %35, %37 : vector<16x32xf32>
    %39 = arith.addf %0, %38 : vector<16x32xf32>
    %c0_21 = arith.constant 0 : index
    %c0_22 = arith.constant 0 : index
    %40 = vector.load %arg8[%c0_21, %c0_22] : memref<16x32xf32, #tpu.memory_space<vmem>>, vector<16x32xf32>
    tpu.vector_store %arg8[%c0_21, %c0_22], %39 {strides = array<i32>} : memref<16x32xf32, #tpu.memory_space<vmem>>, vector<16x32xf32>,
    return
  }
  func.func @transform_0(%arg0: i32) -> (i32, i32) {
    %c0_i32 = arith.constant 0 : i32
    %c0_i32_0 = arith.constant 0 : i32
    return %arg0, %c0_i32 : i32, i32
  }
  func.func @transform_1(%arg0: i32) -> (i32, i32) {
    %c0_i32 = arith.constant 0 : i32
    %c0_i32_0 = arith.constant 0 : i32
    %c0_i32_1 = arith.constant 0 : i32
    return %c0_i32, %c0_i32_0 : i32, i32
  }
  func.func @transform_2(%arg0: i32) -> (i32, i32) {
    %c0_i32 = arith.constant 0 : i32
    %c0_i32_0 = arith.constant 0 : i32
    %c0_i32_1 = arith.constant 0 : i32
    return %c0_i32, %c0_i32_0 : i32, i32
  }
  func.func @transform_3(%arg0: i32) -> (i32, i32) {
    %c0_i32 = arith.constant 0 : i32
    %c0_i32_0 = arith.constant 0 : i32
    %c0_i32_1 = arith.constant 0 : i32
    return %c0_i32, %c0_i32_0 : i32, i32
  }
  func.func @transform_4(%arg0: i32) -> (i32, i32) {
    %c0_i32 = arith.constant 0 : i32
    %c0_i32_0 = arith.constant 0 : i32
    %c0_i32_1 = arith.constant 0 : i32
    return %c0_i32, %c0_i32_0 : i32, i32
  }
  func.func @transform_5(%arg0: i32) -> (i32, i32) {
    %c0_i32 = arith.constant 0 : i32
    %c0_i32_0 = arith.constant 0 : i32
    %c0_i32_1 = arith.constant 0 : i32
    return %c0_i32, %c0_i32_0 : i32, i32
  }
  func.func @transform_6(%arg0: i32) -> (i32, i32) {
    %c0_i32 = arith.constant 0 : i32
    %c0_i32_0 = arith.constant 0 : i32
    %c0_i32_1 = arith.constant 0 : i32
    return %c0_i32, %c0_i32_0 : i32, i32
  }
  func.func @transform_7(%arg0: i32) -> (i32, i32) {
    %c0_i32 = arith.constant 0 : i32
    %c0_i32_0 = arith.constant 0 : i32
    return %arg0, %c0_i32 : i32, i32
  }
}

module attributes {stable_mosaic.version = 11 : i64} {
  func.func @_attn_block_kernel(%arg0: i32, %arg1: i32, %arg2: memref<1x8x32xf32, #tpu.memory_space<vmem>>, %arg3: memref<1x8x32xf32, #tpu.memory_space<vmem>>, %arg4: memref<1x1x8xf32, #tpu.memory_space<vmem>>, %arg5: memref<1x32xf32, #tpu.memory_space<vmem>>, %arg6: memref<1x32xf32, #tpu.memory_space<vmem>>, %arg7: memref<32x32xbf16, #tpu.memory_space<vmem>>, %arg8: memref<32x64xbf16, #tpu.memory_space<vmem>>, %arg9: memref<32x32xbf16, #tpu.memory_space<vmem>>, %arg10: memref<1x8x32xf32, #tpu.memory_space<vmem>>, %arg11: memref<8x64xbf16, #tpu.memory_space<vmem>>) attributes {dimension_semantics = [#tpu.dimension_semantics<parallel>, #tpu.dimension_semantics<arbitrary>], iteration_bounds = array<i64: 2, 1>, scalar_prefetch = 0 : i64, scratch_operands = 1 : i64, tpu.core_type = #tpu.core_type<tc>, window_params = [{transform_indices = @transform_0, window_bounds = array<i64: 1, 8, 32>}, {transform_indices = @transform_1, window_bounds = array<i64: 1, 8, 32>}, {transform_indices = @transform_2, window_bounds = array<i64: 1, 1, 8>}, {pipeline_mode = #tpu.pipeline_mode<synchronous>, transform_indices = @transform_3, window_bounds = array<i64: 1, 32>}, {pipeline_mode = #tpu.pipeline_mode<synchronous>, transform_indices = @transform_4, window_bounds = array<i64: 1, 32>}, {pipeline_mode = #tpu.pipeline_mode<synchronous>, transform_indices = @transform_5, window_bounds = array<i64: 32, 32>}, {pipeline_mode = #tpu.pipeline_mode<synchronous>, transform_indices = @transform_6, window_bounds = array<i64: 32, 64>}, {pipeline_mode = #tpu.pipeline_mode<synchronous>, transform_indices = @transform_7, window_bounds = array<i64: 32, 32>}, {transform_indices = @transform_8, window_bounds = array<i64: 1, 8, 32>}]} {
    %c0_i32 = arith.constant 0 : i32
    %0 = arith.cmpi eq, %arg1, %c0_i32 : i32
    %1 = arith.extui %0 : i1 to i32
    %c0_i32_0 = arith.constant 0 : i32
    %2 = arith.cmpi ne, %1, %c0_i32_0 : i32
    scf.if %2 {
      %c0_59 = arith.constant 0 : index
      %c0_60 = arith.constant 0 : index
      %c0_61 = arith.constant 0 : index
      %128 = vector.load %arg2[%c0_59, %c0_60, %c0_61] : memref<1x8x32xf32, #tpu.memory_space<vmem>>, vector<1x8x32xf32>
      %129 = vector.shape_cast %128 : vector<1x8x32xf32> to vector<8x32xf32>
      %c0_62 = arith.constant 0 : index
      %c0_63 = arith.constant 0 : index
      %130 = vector.load %arg5[%c0_62, %c0_63] : memref<1x32xf32, #tpu.memory_space<vmem>>, vector<1x32xf32>
      %c0_64 = arith.constant 0 : index
      %c0_65 = arith.constant 0 : index
      %131 = vector.load %arg6[%c0_64, %c0_65] : memref<1x32xf32, #tpu.memory_space<vmem>>, vector<1x32xf32>
      %cst_66 = arith.constant dense<0.000000e+00> : vector<8xf32>
      %132 = vector.multi_reduction <add>, %129, %cst_66 [1] : vector<8x32xf32> to vector<8xf32>
      %133 = vector.shape_cast %132 : vector<8xf32> to vector<8x1xf32>
      %cst_67 = arith.constant 3.200000e+01 : f32
      %134 = vector.broadcast %cst_67 : f32 to vector<8x1xf32>
      %135 = arith.divf %133, %134 : vector<8x1xf32>
      %136 = vector.broadcast %135 : vector<8x1xf32> to vector<8x32xf32>
      %137 = arith.subf %129, %136 : vector<8x32xf32>
      %138 = arith.mulf %137, %137 : vector<8x32xf32>
      %cst_68 = arith.constant dense<0.000000e+00> : vector<8xf32>
      %139 = vector.multi_reduction <add>, %138, %cst_68 [1] : vector<8x32xf32> to vector<8xf32>
      %140 = vector.shape_cast %139 : vector<8xf32> to vector<8x1xf32>
      %cst_69 = arith.constant 0.0322580636 : f32
      %141 = vector.broadcast %cst_69 : f32 to vector<8x1xf32>
      %142 = arith.mulf %140, %141 : vector<8x1xf32>
      %143 = math.sqrt %142 : vector<8x1xf32>
      %cst_70 = arith.constant 9.99999997E-7 : f32
      %144 = vector.broadcast %cst_70 : f32 to vector<8x1xf32>
      %145 = arith.addf %143, %144 : vector<8x1xf32>
      %cst_71 = arith.constant 1.000000e+00 : f32
      %146 = vector.broadcast %cst_71 : f32 to vector<8x1xf32>
      %147 = arith.divf %146, %145 : vector<8x1xf32>
      %148 = vector.broadcast %147 : vector<8x1xf32> to vector<8x32xf32>
      %149 = arith.mulf %137, %148 : vector<8x32xf32>
      %150 = vector.broadcast %130 : vector<1x32xf32> to vector<8x32xf32>
      %151 = arith.mulf %150, %149 : vector<8x32xf32>
      %152 = vector.broadcast %131 : vector<1x32xf32> to vector<8x32xf32>
      %153 = arith.addf %151, %152 : vector<8x32xf32>
      %154 = arith.truncf %153 : vector<8x32xf32> to vector<8x32xbf16>
      %c0_72 = arith.constant 0 : index
      %c0_73 = arith.constant 0 : index
      %155 = vector.load %arg8[%c0_72, %c0_73] : memref<32x64xbf16, #tpu.memory_space<vmem>>, vector<32x64xbf16>
      %cst_74 = arith.constant dense<0.000000e+00> : vector<8x64xf32>
      %156 = tpu.matmul %154, %155, %cst_74 {dimension_numbers = #tpu.dot_dimension_numbers<[1], [0], [0], [1], [0, 0, 1, 1], [], []>} : vector<8x32xbf16>, vector<32x64xbf16>, vector<8x64xf32> -> vector<8x64xf32>
      %157 = arith.truncf %156 : vector<8x64xf32> to vector<8x64xbf16>
      %c0_75 = arith.constant 0 : index
      %c0_76 = arith.constant 0 : index
      %158 = vector.load %arg11[%c0_75, %c0_76] : memref<8x64xbf16, #tpu.memory_space<vmem>>, vector<8x64xbf16>
      tpu.vector_store %arg11[%c0_75, %c0_76], %157 {strides = array<i32>} : memref<8x64xbf16, #tpu.memory_space<vmem>>, vector<8x64xbf16>,
    } else {
    }
    %c0 = arith.constant 0 : index
    %c0_1 = arith.constant 0 : index
    %c0_2 = arith.constant 0 : index
    %3 = vector.load %arg3[%c0, %c0_1, %c0_2] : memref<1x8x32xf32, #tpu.memory_space<vmem>>, vector<1x8x32xf32>
    %4 = vector.shape_cast %3 : vector<1x8x32xf32> to vector<8x32xf32>
    %c0_3 = arith.constant 0 : index
    %c0_4 = arith.constant 0 : index
    %5 = vector.load %arg5[%c0_3, %c0_4] : memref<1x32xf32, #tpu.memory_space<vmem>>, vector<1x32xf32>
    %c0_5 = arith.constant 0 : index
    %c0_6 = arith.constant 0 : index
    %6 = vector.load %arg6[%c0_5, %c0_6] : memref<1x32xf32, #tpu.memory_space<vmem>>, vector<1x32xf32>
    %cst = arith.constant dense<0.000000e+00> : vector<8xf32>
    %7 = vector.multi_reduction <add>, %4, %cst [1] : vector<8x32xf32> to vector<8xf32>
    %8 = vector.shape_cast %7 : vector<8xf32> to vector<8x1xf32>
    %cst_7 = arith.constant 3.200000e+01 : f32
    %9 = vector.broadcast %cst_7 : f32 to vector<8x1xf32>
    %10 = arith.divf %8, %9 : vector<8x1xf32>
    %11 = vector.broadcast %10 : vector<8x1xf32> to vector<8x32xf32>
    %12 = arith.subf %4, %11 : vector<8x32xf32>
    %13 = arith.mulf %12, %12 : vector<8x32xf32>
    %cst_8 = arith.constant dense<0.000000e+00> : vector<8xf32>
    %14 = vector.multi_reduction <add>, %13, %cst_8 [1] : vector<8x32xf32> to vector<8xf32>
    %15 = vector.shape_cast %14 : vector<8xf32> to vector<8x1xf32>
    %cst_9 = arith.constant 0.0322580636 : f32
    %16 = vector.broadcast %cst_9 : f32 to vector<8x1xf32>
    %17 = arith.mulf %15, %16 : vector<8x1xf32>
    %18 = math.sqrt %17 : vector<8x1xf32>
    %cst_10 = arith.constant 9.99999997E-7 : f32
    %19 = vector.broadcast %cst_10 : f32 to vector<8x1xf32>
    %20 = arith.addf %18, %19 : vector<8x1xf32>
    %cst_11 = arith.constant 1.000000e+00 : f32
    %21 = vector.broadcast %cst_11 : f32 to vector<8x1xf32>
    %22 = arith.divf %21, %20 : vector<8x1xf32>
    %23 = vector.broadcast %22 : vector<8x1xf32> to vector<8x32xf32>
    %24 = arith.mulf %12, %23 : vector<8x32xf32>
    %25 = vector.broadcast %5 : vector<1x32xf32> to vector<8x32xf32>
    %26 = arith.mulf %25, %24 : vector<8x32xf32>
    %27 = vector.broadcast %6 : vector<1x32xf32> to vector<8x32xf32>
    %28 = arith.addf %26, %27 : vector<8x32xf32>
    %29 = arith.truncf %28 : vector<8x32xf32> to vector<8x32xbf16>
    %c0_12 = arith.constant 0 : index
    %c0_13 = arith.constant 0 : index
    %30 = vector.load %arg7[%c0_12, %c0_13] : memref<32x32xbf16, #tpu.memory_space<vmem>>, vector<32x32xbf16>
    %cst_14 = arith.constant dense<0.000000e+00> : vector<8x32xf32>
    %31 = tpu.matmul %29, %30, %cst_14 {dimension_numbers = #tpu.dot_dimension_numbers<[1], [0], [0], [1], [0, 0, 1, 1], [], []>} : vector<8x32xbf16>, vector<32x32xbf16>, vector<8x32xf32> -> vector<8x32xf32>
    %32 = arith.truncf %31 : vector<8x32xf32> to vector<8x32xbf16>
    %c0_15 = arith.constant 0 : index
    %c0_16 = arith.constant 0 : index
    %c0_17 = arith.constant 0 : index
    %33 = vector.load %arg4[%c0_15, %c0_16, %c0_17] : memref<1x1x8xf32, #tpu.memory_space<vmem>>, vector<1x1x8xf32>
    %34 = vector.shape_cast %33 : vector<1x1x8xf32> to vector<1x8xf32>
    %cst_18 = arith.constant 0.000000e+00 : f32
    %35 = vector.broadcast %cst_18 : f32 to vector<8x32xf32>
    %36 = vector.extract_strided_slice %32 {offsets = [0, 0], sizes = [8, 8], strides = [1, 1]} : vector<8x32xbf16> to vector<8x8xbf16>
    %c0_19 = arith.constant 0 : index
    %c0_20 = arith.constant 0 : index
    %37 = vector.load %arg11[%c0_19, %c0_20] : memref<8x64xbf16, #tpu.memory_space<vmem>>, vector<8x8xbf16>
    %c0_21 = arith.constant 0 : index
    %c32 = arith.constant 32 : index
    %38 = vector.load %arg11[%c0_21, %c32] : memref<8x64xbf16, #tpu.memory_space<vmem>>, vector<8x8xbf16>
    %cst_22 = arith.constant dense<0.000000e+00> : vector<8x8xf32>
    %39 = tpu.matmul %36, %37, %cst_22 {dimension_numbers = #tpu.dot_dimension_numbers<[1], [1], [0], [0], [0, 0, 1, 0], [], []>} : vector<8x8xbf16>, vector<8x8xbf16>, vector<8x8xf32> -> vector<8x8xf32>
    %40 = vector.broadcast %34 : vector<1x8xf32> to vector<8x8xf32>
    %41 = arith.addf %39, %40 : vector<8x8xf32>
    %cst_23 = arith.constant dense<0xFF800000> : vector<8xf32>
    %42 = vector.multi_reduction <maximumf>, %41, %cst_23 [1] : vector<8x8xf32> to vector<8xf32>
    %43 = vector.shape_cast %42 : vector<8xf32> to vector<8x1xf32>
    %44 = vector.broadcast %43 : vector<8x1xf32> to vector<8x8xf32>
    %45 = arith.subf %41, %44 : vector<8x8xf32>
    %46 = math.exp %45 : vector<8x8xf32>
    %cst_24 = arith.constant dense<0.000000e+00> : vector<8xf32>
    %47 = vector.multi_reduction <add>, %46, %cst_24 [1] : vector<8x8xf32> to vector<8xf32>
    %48 = vector.shape_cast %47 : vector<8xf32> to vector<8x1xf32>
    %49 = tpu.reciprocal %48 {approx = true} : vector<8x1xf32> -> vector<8x1xf32>
    %50 = vector.broadcast %49 : vector<8x1xf32> to vector<8x8xf32>
    %51 = arith.mulf %46, %50 : vector<8x8xf32>
    %52 = arith.truncf %51 : vector<8x8xf32> to vector<8x8xbf16>
    %cst_25 = arith.constant dense<0.000000e+00> : vector<8x8xf32>
    %53 = tpu.matmul %52, %38, %cst_25 {dimension_numbers = #tpu.dot_dimension_numbers<[1], [0], [0], [1], [0, 0, 1, 1], [], []>} : vector<8x8xbf16>, vector<8x8xbf16>, vector<8x8xf32> -> vector<8x8xf32>
    %54 = arith.truncf %53 : vector<8x8xf32> to vector<8x8xbf16>
    %c0_26 = arith.constant 0 : index
    %c0_27 = arith.constant 0 : index
    %55 = vector.load %arg9[%c0_26, %c0_27] : memref<32x32xbf16, #tpu.memory_space<vmem>>, vector<8x32xbf16>
    %cst_28 = arith.constant dense<0.000000e+00> : vector<8x32xf32>
    %56 = tpu.matmul %54, %55, %cst_28 {dimension_numbers = #tpu.dot_dimension_numbers<[1], [0], [0], [1], [0, 0, 1, 1], [], []>} : vector<8x8xbf16>, vector<8x32xbf16>, vector<8x32xf32> -> vector<8x32xf32>
    %57 = arith.addf %35, %56 : vector<8x32xf32>
    %58 = vector.extract_strided_slice %32 {offsets = [0, 8], sizes = [8, 8], strides = [1, 1]} : vector<8x32xbf16> to vector<8x8xbf16>
    %c0_29 = arith.constant 0 : index
    %c8 = arith.constant 8 : index
    %59 = vector.load %arg11[%c0_29, %c8] : memref<8x64xbf16, #tpu.memory_space<vmem>>, vector<8x8xbf16>
    %c0_30 = arith.constant 0 : index
    %c40 = arith.constant 40 : index
    %60 = vector.load %arg11[%c0_30, %c40] : memref<8x64xbf16, #tpu.memory_space<vmem>>, vector<8x8xbf16>
    %cst_31 = arith.constant dense<0.000000e+00> : vector<8x8xf32>
    %61 = tpu.matmul %58, %59, %cst_31 {dimension_numbers = #tpu.dot_dimension_numbers<[1], [1], [0], [0], [0, 0, 1, 0], [], []>} : vector<8x8xbf16>, vector<8x8xbf16>, vector<8x8xf32> -> vector<8x8xf32>
    %62 = vector.broadcast %34 : vector<1x8xf32> to vector<8x8xf32>
    %63 = arith.addf %61, %62 : vector<8x8xf32>
    %cst_32 = arith.constant dense<0xFF800000> : vector<8xf32>
    %64 = vector.multi_reduction <maximumf>, %63, %cst_32 [1] : vector<8x8xf32> to vector<8xf32>
    %65 = vector.shape_cast %64 : vector<8xf32> to vector<8x1xf32>
    %66 = vector.broadcast %65 : vector<8x1xf32> to vector<8x8xf32>
    %67 = arith.subf %63, %66 : vector<8x8xf32>
    %68 = math.exp %67 : vector<8x8xf32>
    %cst_33 = arith.constant dense<0.000000e+00> : vector<8xf32>
    %69 = vector.multi_reduction <add>, %68, %cst_33 [1] : vector<8x8xf32> to vector<8xf32>
    %70 = vector.shape_cast %69 : vector<8xf32> to vector<8x1xf32>
    %71 = tpu.reciprocal %70 {approx = true} : vector<8x1xf32> -> vector<8x1xf32>
    %72 = vector.broadcast %71 : vector<8x1xf32> to vector<8x8xf32>
    %73 = arith.mulf %68, %72 : vector<8x8xf32>
    %74 = arith.truncf %73 : vector<8x8xf32> to vector<8x8xbf16>
    %cst_34 = arith.constant dense<0.000000e+00> : vector<8x8xf32>
    %75 = tpu.matmul %74, %60, %cst_34 {dimension_numbers = #tpu.dot_dimension_numbers<[1], [0], [0], [1], [0, 0, 1, 1], [], []>} : vector<8x8xbf16>, vector<8x8xbf16>, vector<8x8xf32> -> vector<8x8xf32>
    %76 = arith.truncf %75 : vector<8x8xf32> to vector<8x8xbf16>
    %c8_35 = arith.constant 8 : index
    %c0_36 = arith.constant 0 : index
    %77 = vector.load %arg9[%c8_35, %c0_36] : memref<32x32xbf16, #tpu.memory_space<vmem>>, vector<8x32xbf16>
    %cst_37 = arith.constant dense<0.000000e+00> : vector<8x32xf32>
    %78 = tpu.matmul %76, %77, %cst_37 {dimension_numbers = #tpu.dot_dimension_numbers<[1], [0], [0], [1], [0, 0, 1, 1], [], []>} : vector<8x8xbf16>, vector<8x32xbf16>, vector<8x32xf32> -> vector<8x32xf32>
    %79 = arith.addf %57, %78 : vector<8x32xf32>
    %80 = vector.extract_strided_slice %32 {offsets = [0, 16], sizes = [8, 8], strides = [1, 1]} : vector<8x32xbf16> to vector<8x8xbf16>
    %c0_38 = arith.constant 0 : index
    %c16 = arith.constant 16 : index
    %81 = vector.load %arg11[%c0_38, %c16] : memref<8x64xbf16, #tpu.memory_space<vmem>>, vector<8x8xbf16>
    %c0_39 = arith.constant 0 : index
    %c48 = arith.constant 48 : index
    %82 = vector.load %arg11[%c0_39, %c48] : memref<8x64xbf16, #tpu.memory_space<vmem>>, vector<8x8xbf16>
    %cst_40 = arith.constant dense<0.000000e+00> : vector<8x8xf32>
    %83 = tpu.matmul %80, %81, %cst_40 {dimension_numbers = #tpu.dot_dimension_numbers<[1], [1], [0], [0], [0, 0, 1, 0], [], []>} : vector<8x8xbf16>, vector<8x8xbf16>, vector<8x8xf32> -> vector<8x8xf32>
    %84 = vector.broadcast %34 : vector<1x8xf32> to vector<8x8xf32>
    %85 = arith.addf %83, %84 : vector<8x8xf32>
    %cst_41 = arith.constant dense<0xFF800000> : vector<8xf32>
    %86 = vector.multi_reduction <maximumf>, %85, %cst_41 [1] : vector<8x8xf32> to vector<8xf32>
    %87 = vector.shape_cast %86 : vector<8xf32> to vector<8x1xf32>
    %88 = vector.broadcast %87 : vector<8x1xf32> to vector<8x8xf32>
    %89 = arith.subf %85, %88 : vector<8x8xf32>
    %90 = math.exp %89 : vector<8x8xf32>
    %cst_42 = arith.constant dense<0.000000e+00> : vector<8xf32>
    %91 = vector.multi_reduction <add>, %90, %cst_42 [1] : vector<8x8xf32> to vector<8xf32>
    %92 = vector.shape_cast %91 : vector<8xf32> to vector<8x1xf32>
    %93 = tpu.reciprocal %92 {approx = true} : vector<8x1xf32> -> vector<8x1xf32>
    %94 = vector.broadcast %93 : vector<8x1xf32> to vector<8x8xf32>
    %95 = arith.mulf %90, %94 : vector<8x8xf32>
    %96 = arith.truncf %95 : vector<8x8xf32> to vector<8x8xbf16>
    %cst_43 = arith.constant dense<0.000000e+00> : vector<8x8xf32>
    %97 = tpu.matmul %96, %82, %cst_43 {dimension_numbers = #tpu.dot_dimension_numbers<[1], [0], [0], [1], [0, 0, 1, 1], [], []>} : vector<8x8xbf16>, vector<8x8xbf16>, vector<8x8xf32> -> vector<8x8xf32>
    %98 = arith.truncf %97 : vector<8x8xf32> to vector<8x8xbf16>
    %c16_44 = arith.constant 16 : index
    %c0_45 = arith.constant 0 : index
    %99 = vector.load %arg9[%c16_44, %c0_45] : memref<32x32xbf16, #tpu.memory_space<vmem>>, vector<8x32xbf16>
    %cst_46 = arith.constant dense<0.000000e+00> : vector<8x32xf32>
    %100 = tpu.matmul %98, %99, %cst_46 {dimension_numbers = #tpu.dot_dimension_numbers<[1], [0], [0], [1], [0, 0, 1, 1], [], []>} : vector<8x8xbf16>, vector<8x32xbf16>, vector<8x32xf32> -> vector<8x32xf32>
    %101 = arith.addf %79, %100 : vector<8x32xf32>
    %102 = vector.extract_strided_slice %32 {offsets = [0, 24], sizes = [8, 8], strides = [1, 1]} : vector<8x32xbf16> to vector<8x8xbf16>
    %c0_47 = arith.constant 0 : index
    %c24 = arith.constant 24 : index
    %103 = vector.load %arg11[%c0_47, %c24] : memref<8x64xbf16, #tpu.memory_space<vmem>>, vector<8x8xbf16>
    %c0_48 = arith.constant 0 : index
    %c56 = arith.constant 56 : index
    %104 = vector.load %arg11[%c0_48, %c56] : memref<8x64xbf16, #tpu.memory_space<vmem>>, vector<8x8xbf16>
    %cst_49 = arith.constant dense<0.000000e+00> : vector<8x8xf32>
    %105 = tpu.matmul %102, %103, %cst_49 {dimension_numbers = #tpu.dot_dimension_numbers<[1], [1], [0], [0], [0, 0, 1, 0], [], []>} : vector<8x8xbf16>, vector<8x8xbf16>, vector<8x8xf32> -> vector<8x8xf32>
    %106 = vector.broadcast %34 : vector<1x8xf32> to vector<8x8xf32>
    %107 = arith.addf %105, %106 : vector<8x8xf32>
    %cst_50 = arith.constant dense<0xFF800000> : vector<8xf32>
    %108 = vector.multi_reduction <maximumf>, %107, %cst_50 [1] : vector<8x8xf32> to vector<8xf32>
    %109 = vector.shape_cast %108 : vector<8xf32> to vector<8x1xf32>
    %110 = vector.broadcast %109 : vector<8x1xf32> to vector<8x8xf32>
    %111 = arith.subf %107, %110 : vector<8x8xf32>
    %112 = math.exp %111 : vector<8x8xf32>
    %cst_51 = arith.constant dense<0.000000e+00> : vector<8xf32>
    %113 = vector.multi_reduction <add>, %112, %cst_51 [1] : vector<8x8xf32> to vector<8xf32>
    %114 = vector.shape_cast %113 : vector<8xf32> to vector<8x1xf32>
    %115 = tpu.reciprocal %114 {approx = true} : vector<8x1xf32> -> vector<8x1xf32>
    %116 = vector.broadcast %115 : vector<8x1xf32> to vector<8x8xf32>
    %117 = arith.mulf %112, %116 : vector<8x8xf32>
    %118 = arith.truncf %117 : vector<8x8xf32> to vector<8x8xbf16>
    %cst_52 = arith.constant dense<0.000000e+00> : vector<8x8xf32>
    %119 = tpu.matmul %118, %104, %cst_52 {dimension_numbers = #tpu.dot_dimension_numbers<[1], [0], [0], [1], [0, 0, 1, 1], [], []>} : vector<8x8xbf16>, vector<8x8xbf16>, vector<8x8xf32> -> vector<8x8xf32>
    %120 = arith.truncf %119 : vector<8x8xf32> to vector<8x8xbf16>
    %c24_53 = arith.constant 24 : index
    %c0_54 = arith.constant 0 : index
    %121 = vector.load %arg9[%c24_53, %c0_54] : memref<32x32xbf16, #tpu.memory_space<vmem>>, vector<8x32xbf16>
    %cst_55 = arith.constant dense<0.000000e+00> : vector<8x32xf32>
    %122 = tpu.matmul %120, %121, %cst_55 {dimension_numbers = #tpu.dot_dimension_numbers<[1], [0], [0], [1], [0, 0, 1, 1], [], []>} : vector<8x8xbf16>, vector<8x32xbf16>, vector<8x32xf32> -> vector<8x32xf32>
    %123 = arith.addf %101, %122 : vector<8x32xf32>
    %124 = arith.addf %4, %123 : vector<8x32xf32>
    %c0_56 = arith.constant 0 : index
    %c0_57 = arith.constant 0 : index
    %c0_58 = arith.constant 0 : index
    %125 = vector.load %arg10[%c0_56, %c0_57, %c0_58] : memref<1x8x32xf32, #tpu.memory_space<vmem>>, vector<1x8x32xf32>
    %126 = vector.shape_cast %125 : vector<1x8x32xf32> to vector<8x32xf32>
    %127 = vector.shape_cast %124 : vector<8x32xf32> to vector<1x8x32xf32>
    tpu.vector_store %arg10[%c0_56, %c0_57, %c0_58], %127 {strides = array<i32>} : memref<1x8x32xf32, #tpu.memory_space<vmem>>, vector<1x8x32xf32>,
    return
  }
  func.func @transform_0(%arg0: i32, %arg1: i32) -> (i32, i32, i32) {
    %c0_i32 = arith.constant 0 : i32
    %c0_i32_0 = arith.constant 0 : i32
    %c0_i32_1 = arith.constant 0 : i32
    return %arg0, %c0_i32, %c0_i32_0 : i32, i32, i32
  }
  func.func @transform_1(%arg0: i32, %arg1: i32) -> (i32, i32, i32) {
    %c0_i32 = arith.constant 0 : i32
    %c0_i32_0 = arith.constant 0 : i32
    return %arg0, %arg1, %c0_i32 : i32, i32, i32
  }
  func.func @transform_2(%arg0: i32, %arg1: i32) -> (i32, i32, i32) {
    %c0_i32 = arith.constant 0 : i32
    %c0_i32_0 = arith.constant 0 : i32
    %c0_i32_1 = arith.constant 0 : i32
    return %arg0, %c0_i32, %c0_i32_0 : i32, i32, i32
  }
  func.func @transform_3(%arg0: i32, %arg1: i32) -> (i32, i32) {
    %c0_i32 = arith.constant 0 : i32
    %c0_i32_0 = arith.constant 0 : i32
    %c0_i32_1 = arith.constant 0 : i32
    return %c0_i32, %c0_i32_0 : i32, i32
  }
  func.func @transform_4(%arg0: i32, %arg1: i32) -> (i32, i32) {
    %c0_i32 = arith.constant 0 : i32
    %c0_i32_0 = arith.constant 0 : i32
    %c0_i32_1 = arith.constant 0 : i32
    return %c0_i32, %c0_i32_0 : i32, i32
  }
  func.func @transform_5(%arg0: i32, %arg1: i32) -> (i32, i32) {
    %c0_i32 = arith.constant 0 : i32
    %c0_i32_0 = arith.constant 0 : i32
    %c0_i32_1 = arith.constant 0 : i32
    return %c0_i32, %c0_i32_0 : i32, i32
  }
  func.func @transform_6(%arg0: i32, %arg1: i32) -> (i32, i32) {
    %c0_i32 = arith.constant 0 : i32
    %c0_i32_0 = arith.constant 0 : i32
    %c0_i32_1 = arith.constant 0 : i32
    return %c0_i32, %c0_i32_0 : i32, i32
  }
  func.func @transform_7(%arg0: i32, %arg1: i32) -> (i32, i32) {
    %c0_i32 = arith.constant 0 : i32
    %c0_i32_0 = arith.constant 0 : i32
    %c0_i32_1 = arith.constant 0 : i32
    return %c0_i32, %c0_i32_0 : i32, i32
  }
  func.func @transform_8(%arg0: i32, %arg1: i32) -> (i32, i32, i32) {
    %c0_i32 = arith.constant 0 : i32
    %c0_i32_0 = arith.constant 0 : i32
    return %arg0, %arg1, %c0_i32 : i32, i32, i32
  }
}

module attributes {stable_mosaic.version = 11 : i64} {
  func.func @_ln_ffn_res_kernel(%arg0: i32, %arg1: memref<16x32xf32, #tpu.memory_space<vmem>>, %arg2: memref<1x32xf32, #tpu.memory_space<vmem>>, %arg3: memref<1x32xf32, #tpu.memory_space<vmem>>, %arg4: memref<32x64xbf16, #tpu.memory_space<vmem>>, %arg5: memref<1x64xf32, #tpu.memory_space<vmem>>, %arg6: memref<64x32xbf16, #tpu.memory_space<vmem>>, %arg7: memref<1x32xf32, #tpu.memory_space<vmem>>, %arg8: memref<1x32xf32, #tpu.memory_space<vmem>>, %arg9: memref<1x32xf32, #tpu.memory_space<vmem>>, %arg10: memref<16x32xf32, #tpu.memory_space<vmem>>) attributes {dimension_semantics = [#tpu.dimension_semantics<parallel>], iteration_bounds = array<i64: 1>, scalar_prefetch = 0 : i64, scratch_operands = 0 : i64, tpu.core_type = #tpu.core_type<tc>, window_params = [{transform_indices = @transform_0, window_bounds = array<i64: 16, 32>}, {pipeline_mode = #tpu.pipeline_mode<synchronous>, transform_indices = @transform_1, window_bounds = array<i64: 1, 32>}, {pipeline_mode = #tpu.pipeline_mode<synchronous>, transform_indices = @transform_2, window_bounds = array<i64: 1, 32>}, {pipeline_mode = #tpu.pipeline_mode<synchronous>, transform_indices = @transform_3, window_bounds = array<i64: 32, 64>}, {pipeline_mode = #tpu.pipeline_mode<synchronous>, transform_indices = @transform_4, window_bounds = array<i64: 1, 64>}, {pipeline_mode = #tpu.pipeline_mode<synchronous>, transform_indices = @transform_5, window_bounds = array<i64: 64, 32>}, {pipeline_mode = #tpu.pipeline_mode<synchronous>, transform_indices = @transform_6, window_bounds = array<i64: 1, 32>}, {pipeline_mode = #tpu.pipeline_mode<synchronous>, transform_indices = @transform_7, window_bounds = array<i64: 1, 32>}, {pipeline_mode = #tpu.pipeline_mode<synchronous>, transform_indices = @transform_8, window_bounds = array<i64: 1, 32>}, {transform_indices = @transform_9, window_bounds = array<i64: 16, 32>}]} {
    %c0 = arith.constant 0 : index
    %c0_0 = arith.constant 0 : index
    %0 = vector.load %arg1[%c0, %c0_0] : memref<16x32xf32, #tpu.memory_space<vmem>>, vector<16x32xf32>
    %c0_1 = arith.constant 0 : index
    %c0_2 = arith.constant 0 : index
    %1 = vector.load %arg2[%c0_1, %c0_2] : memref<1x32xf32, #tpu.memory_space<vmem>>, vector<1x32xf32>
    %c0_3 = arith.constant 0 : index
    %c0_4 = arith.constant 0 : index
    %2 = vector.load %arg3[%c0_3, %c0_4] : memref<1x32xf32, #tpu.memory_space<vmem>>, vector<1x32xf32>
    %cst = arith.constant dense<0.000000e+00> : vector<16xf32>
    %3 = vector.multi_reduction <add>, %0, %cst [1] : vector<16x32xf32> to vector<16xf32>
    %4 = vector.shape_cast %3 : vector<16xf32> to vector<16x1xf32>
    %cst_5 = arith.constant 3.200000e+01 : f32
    %5 = vector.broadcast %cst_5 : f32 to vector<16x1xf32>
    %6 = arith.divf %4, %5 : vector<16x1xf32>
    %7 = vector.broadcast %6 : vector<16x1xf32> to vector<16x32xf32>
    %8 = arith.subf %0, %7 : vector<16x32xf32>
    %9 = arith.mulf %8, %8 : vector<16x32xf32>
    %cst_6 = arith.constant dense<0.000000e+00> : vector<16xf32>
    %10 = vector.multi_reduction <add>, %9, %cst_6 [1] : vector<16x32xf32> to vector<16xf32>
    %11 = vector.shape_cast %10 : vector<16xf32> to vector<16x1xf32>
    %cst_7 = arith.constant 0.0322580636 : f32
    %12 = vector.broadcast %cst_7 : f32 to vector<16x1xf32>
    %13 = arith.mulf %11, %12 : vector<16x1xf32>
    %14 = math.sqrt %13 : vector<16x1xf32>
    %cst_8 = arith.constant 9.99999997E-7 : f32
    %15 = vector.broadcast %cst_8 : f32 to vector<16x1xf32>
    %16 = arith.addf %14, %15 : vector<16x1xf32>
    %cst_9 = arith.constant 1.000000e+00 : f32
    %17 = vector.broadcast %cst_9 : f32 to vector<16x1xf32>
    %18 = arith.divf %17, %16 : vector<16x1xf32>
    %19 = vector.broadcast %18 : vector<16x1xf32> to vector<16x32xf32>
    %20 = arith.mulf %8, %19 : vector<16x32xf32>
    %21 = vector.broadcast %1 : vector<1x32xf32> to vector<16x32xf32>
    %22 = arith.mulf %21, %20 : vector<16x32xf32>
    %23 = vector.broadcast %2 : vector<1x32xf32> to vector<16x32xf32>
    %24 = arith.addf %22, %23 : vector<16x32xf32>
    %25 = arith.truncf %24 : vector<16x32xf32> to vector<16x32xbf16>
    %c0_10 = arith.constant 0 : index
    %c0_11 = arith.constant 0 : index
    %26 = vector.load %arg4[%c0_10, %c0_11] : memref<32x64xbf16, #tpu.memory_space<vmem>>, vector<32x64xbf16>
    %cst_12 = arith.constant dense<0.000000e+00> : vector<16x64xf32>
    %27 = tpu.matmul %25, %26, %cst_12 {dimension_numbers = #tpu.dot_dimension_numbers<[1], [0], [0], [1], [0, 0, 1, 1], [], []>} : vector<16x32xbf16>, vector<32x64xbf16>, vector<16x64xf32> -> vector<16x64xf32>
    %c0_13 = arith.constant 0 : index
    %c0_14 = arith.constant 0 : index
    %28 = vector.load %arg5[%c0_13, %c0_14] : memref<1x64xf32, #tpu.memory_space<vmem>>, vector<1x64xf32>
    %29 = vector.broadcast %28 : vector<1x64xf32> to vector<16x64xf32>
    %30 = arith.addf %27, %29 : vector<16x64xf32>
    %cst_15 = arith.constant 0.000000e+00 : f32
    %31 = vector.broadcast %cst_15 : f32 to vector<16x64xf32>
    %32 = arith.maximumf %30, %31 : vector<16x64xf32>
    %33 = arith.truncf %32 : vector<16x64xf32> to vector<16x64xbf16>
    %c0_16 = arith.constant 0 : index
    %c0_17 = arith.constant 0 : index
    %34 = vector.load %arg6[%c0_16, %c0_17] : memref<64x32xbf16, #tpu.memory_space<vmem>>, vector<64x32xbf16>
    %cst_18 = arith.constant dense<0.000000e+00> : vector<16x32xf32>
    %35 = tpu.matmul %33, %34, %cst_18 {dimension_numbers = #tpu.dot_dimension_numbers<[1], [0], [0], [1], [0, 0, 1, 1], [], []>} : vector<16x64xbf16>, vector<64x32xbf16>, vector<16x32xf32> -> vector<16x32xf32>
    %c0_19 = arith.constant 0 : index
    %c0_20 = arith.constant 0 : index
    %36 = vector.load %arg7[%c0_19, %c0_20] : memref<1x32xf32, #tpu.memory_space<vmem>>, vector<1x32xf32>
    %37 = vector.broadcast %36 : vector<1x32xf32> to vector<16x32xf32>
    %38 = arith.addf %35, %37 : vector<16x32xf32>
    %39 = arith.addf %0, %38 : vector<16x32xf32>
    %c0_21 = arith.constant 0 : index
    %c0_22 = arith.constant 0 : index
    %40 = vector.load %arg8[%c0_21, %c0_22] : memref<1x32xf32, #tpu.memory_space<vmem>>, vector<1x32xf32>
    %c0_23 = arith.constant 0 : index
    %c0_24 = arith.constant 0 : index
    %41 = vector.load %arg9[%c0_23, %c0_24] : memref<1x32xf32, #tpu.memory_space<vmem>>, vector<1x32xf32>
    %cst_25 = arith.constant dense<0.000000e+00> : vector<16xf32>
    %42 = vector.multi_reduction <add>, %39, %cst_25 [1] : vector<16x32xf32> to vector<16xf32>
    %43 = vector.shape_cast %42 : vector<16xf32> to vector<16x1xf32>
    %cst_26 = arith.constant 3.200000e+01 : f32
    %44 = vector.broadcast %cst_26 : f32 to vector<16x1xf32>
    %45 = arith.divf %43, %44 : vector<16x1xf32>
    %46 = vector.broadcast %45 : vector<16x1xf32> to vector<16x32xf32>
    %47 = arith.subf %39, %46 : vector<16x32xf32>
    %48 = arith.mulf %47, %47 : vector<16x32xf32>
    %cst_27 = arith.constant dense<0.000000e+00> : vector<16xf32>
    %49 = vector.multi_reduction <add>, %48, %cst_27 [1] : vector<16x32xf32> to vector<16xf32>
    %50 = vector.shape_cast %49 : vector<16xf32> to vector<16x1xf32>
    %cst_28 = arith.constant 0.0322580636 : f32
    %51 = vector.broadcast %cst_28 : f32 to vector<16x1xf32>
    %52 = arith.mulf %50, %51 : vector<16x1xf32>
    %53 = math.sqrt %52 : vector<16x1xf32>
    %cst_29 = arith.constant 9.99999997E-7 : f32
    %54 = vector.broadcast %cst_29 : f32 to vector<16x1xf32>
    %55 = arith.addf %53, %54 : vector<16x1xf32>
    %cst_30 = arith.constant 1.000000e+00 : f32
    %56 = vector.broadcast %cst_30 : f32 to vector<16x1xf32>
    %57 = arith.divf %56, %55 : vector<16x1xf32>
    %58 = vector.broadcast %57 : vector<16x1xf32> to vector<16x32xf32>
    %59 = arith.mulf %47, %58 : vector<16x32xf32>
    %60 = vector.broadcast %40 : vector<1x32xf32> to vector<16x32xf32>
    %61 = arith.mulf %60, %59 : vector<16x32xf32>
    %62 = vector.broadcast %41 : vector<1x32xf32> to vector<16x32xf32>
    %63 = arith.addf %61, %62 : vector<16x32xf32>
    %c0_31 = arith.constant 0 : index
    %c0_32 = arith.constant 0 : index
    %64 = vector.load %arg10[%c0_31, %c0_32] : memref<16x32xf32, #tpu.memory_space<vmem>>, vector<16x32xf32>
    tpu.vector_store %arg10[%c0_31, %c0_32], %63 {strides = array<i32>} : memref<16x32xf32, #tpu.memory_space<vmem>>, vector<16x32xf32>,
    return
  }
  func.func @transform_0(%arg0: i32) -> (i32, i32) {
    %c0_i32 = arith.constant 0 : i32
    %c0_i32_0 = arith.constant 0 : i32
    return %arg0, %c0_i32 : i32, i32
  }
  func.func @transform_1(%arg0: i32) -> (i32, i32) {
    %c0_i32 = arith.constant 0 : i32
    %c0_i32_0 = arith.constant 0 : i32
    %c0_i32_1 = arith.constant 0 : i32
    return %c0_i32, %c0_i32_0 : i32, i32
  }
  func.func @transform_2(%arg0: i32) -> (i32, i32) {
    %c0_i32 = arith.constant 0 : i32
    %c0_i32_0 = arith.constant 0 : i32
    %c0_i32_1 = arith.constant 0 : i32
    return %c0_i32, %c0_i32_0 : i32, i32
  }
  func.func @transform_3(%arg0: i32) -> (i32, i32) {
    %c0_i32 = arith.constant 0 : i32
    %c0_i32_0 = arith.constant 0 : i32
    %c0_i32_1 = arith.constant 0 : i32
    return %c0_i32, %c0_i32_0 : i32, i32
  }
  func.func @transform_4(%arg0: i32) -> (i32, i32) {
    %c0_i32 = arith.constant 0 : i32
    %c0_i32_0 = arith.constant 0 : i32
    %c0_i32_1 = arith.constant 0 : i32
    return %c0_i32, %c0_i32_0 : i32, i32
  }
  func.func @transform_5(%arg0: i32) -> (i32, i32) {
    %c0_i32 = arith.constant 0 : i32
    %c0_i32_0 = arith.constant 0 : i32
    %c0_i32_1 = arith.constant 0 : i32
    return %c0_i32, %c0_i32_0 : i32, i32
  }
  func.func @transform_6(%arg0: i32) -> (i32, i32) {
    %c0_i32 = arith.constant 0 : i32
    %c0_i32_0 = arith.constant 0 : i32
    %c0_i32_1 = arith.constant 0 : i32
    return %c0_i32, %c0_i32_0 : i32, i32
  }
  func.func @transform_7(%arg0: i32) -> (i32, i32) {
    %c0_i32 = arith.constant 0 : i32
    %c0_i32_0 = arith.constant 0 : i32
    %c0_i32_1 = arith.constant 0 : i32
    return %c0_i32, %c0_i32_0 : i32, i32
  }
  func.func @transform_8(%arg0: i32) -> (i32, i32) {
    %c0_i32 = arith.constant 0 : i32
    %c0_i32_0 = arith.constant 0 : i32
    %c0_i32_1 = arith.constant 0 : i32
    return %c0_i32, %c0_i32_0 : i32, i32
  }
  func.func @transform_9(%arg0: i32) -> (i32, i32) {
    %c0_i32 = arith.constant 0 : i32
    %c0_i32_0 = arith.constant 0 : i32
    return %arg0, %c0_i32 : i32, i32
  }
}

module attributes {stable_mosaic.version = 11 : i64} {
  func.func @_attn_block_kernel(%arg0: i32, %arg1: i32, %arg2: memref<1x8x32xf32, #tpu.memory_space<vmem>>, %arg3: memref<1x8x32xf32, #tpu.memory_space<vmem>>, %arg4: memref<1x1x8xf32, #tpu.memory_space<vmem>>, %arg5: memref<1x32xf32, #tpu.memory_space<vmem>>, %arg6: memref<1x32xf32, #tpu.memory_space<vmem>>, %arg7: memref<32x32xbf16, #tpu.memory_space<vmem>>, %arg8: memref<32x64xbf16, #tpu.memory_space<vmem>>, %arg9: memref<32x32xbf16, #tpu.memory_space<vmem>>, %arg10: memref<1x8x32xf32, #tpu.memory_space<vmem>>, %arg11: memref<8x64xbf16, #tpu.memory_space<vmem>>) attributes {dimension_semantics = [#tpu.dimension_semantics<parallel>, #tpu.dimension_semantics<arbitrary>], iteration_bounds = array<i64: 2, 1>, scalar_prefetch = 0 : i64, scratch_operands = 1 : i64, tpu.core_type = #tpu.core_type<tc>, window_params = [{transform_indices = @transform_0, window_bounds = array<i64: 1, 8, 32>}, {transform_indices = @transform_1, window_bounds = array<i64: 1, 8, 32>}, {transform_indices = @transform_2, window_bounds = array<i64: 1, 1, 8>}, {pipeline_mode = #tpu.pipeline_mode<synchronous>, transform_indices = @transform_3, window_bounds = array<i64: 1, 32>}, {pipeline_mode = #tpu.pipeline_mode<synchronous>, transform_indices = @transform_4, window_bounds = array<i64: 1, 32>}, {pipeline_mode = #tpu.pipeline_mode<synchronous>, transform_indices = @transform_5, window_bounds = array<i64: 32, 32>}, {pipeline_mode = #tpu.pipeline_mode<synchronous>, transform_indices = @transform_6, window_bounds = array<i64: 32, 64>}, {pipeline_mode = #tpu.pipeline_mode<synchronous>, transform_indices = @transform_7, window_bounds = array<i64: 32, 32>}, {transform_indices = @transform_8, window_bounds = array<i64: 1, 8, 32>}]} {
    %c0_i32 = arith.constant 0 : i32
    %0 = arith.cmpi eq, %arg1, %c0_i32 : i32
    %1 = arith.extui %0 : i1 to i32
    %c0_i32_0 = arith.constant 0 : i32
    %2 = arith.cmpi ne, %1, %c0_i32_0 : i32
    scf.if %2 {
      %c0_59 = arith.constant 0 : index
      %c0_60 = arith.constant 0 : index
      %c0_61 = arith.constant 0 : index
      %128 = vector.load %arg2[%c0_59, %c0_60, %c0_61] : memref<1x8x32xf32, #tpu.memory_space<vmem>>, vector<1x8x32xf32>
      %129 = vector.shape_cast %128 : vector<1x8x32xf32> to vector<8x32xf32>
      %c0_62 = arith.constant 0 : index
      %c0_63 = arith.constant 0 : index
      %130 = vector.load %arg5[%c0_62, %c0_63] : memref<1x32xf32, #tpu.memory_space<vmem>>, vector<1x32xf32>
      %c0_64 = arith.constant 0 : index
      %c0_65 = arith.constant 0 : index
      %131 = vector.load %arg6[%c0_64, %c0_65] : memref<1x32xf32, #tpu.memory_space<vmem>>, vector<1x32xf32>
      %cst_66 = arith.constant dense<0.000000e+00> : vector<8xf32>
      %132 = vector.multi_reduction <add>, %129, %cst_66 [1] : vector<8x32xf32> to vector<8xf32>
      %133 = vector.shape_cast %132 : vector<8xf32> to vector<8x1xf32>
      %cst_67 = arith.constant 3.200000e+01 : f32
      %134 = vector.broadcast %cst_67 : f32 to vector<8x1xf32>
      %135 = arith.divf %133, %134 : vector<8x1xf32>
      %136 = vector.broadcast %135 : vector<8x1xf32> to vector<8x32xf32>
      %137 = arith.subf %129, %136 : vector<8x32xf32>
      %138 = arith.mulf %137, %137 : vector<8x32xf32>
      %cst_68 = arith.constant dense<0.000000e+00> : vector<8xf32>
      %139 = vector.multi_reduction <add>, %138, %cst_68 [1] : vector<8x32xf32> to vector<8xf32>
      %140 = vector.shape_cast %139 : vector<8xf32> to vector<8x1xf32>
      %cst_69 = arith.constant 0.0322580636 : f32
      %141 = vector.broadcast %cst_69 : f32 to vector<8x1xf32>
      %142 = arith.mulf %140, %141 : vector<8x1xf32>
      %143 = math.sqrt %142 : vector<8x1xf32>
      %cst_70 = arith.constant 9.99999997E-7 : f32
      %144 = vector.broadcast %cst_70 : f32 to vector<8x1xf32>
      %145 = arith.addf %143, %144 : vector<8x1xf32>
      %cst_71 = arith.constant 1.000000e+00 : f32
      %146 = vector.broadcast %cst_71 : f32 to vector<8x1xf32>
      %147 = arith.divf %146, %145 : vector<8x1xf32>
      %148 = vector.broadcast %147 : vector<8x1xf32> to vector<8x32xf32>
      %149 = arith.mulf %137, %148 : vector<8x32xf32>
      %150 = vector.broadcast %130 : vector<1x32xf32> to vector<8x32xf32>
      %151 = arith.mulf %150, %149 : vector<8x32xf32>
      %152 = vector.broadcast %131 : vector<1x32xf32> to vector<8x32xf32>
      %153 = arith.addf %151, %152 : vector<8x32xf32>
      %154 = arith.truncf %153 : vector<8x32xf32> to vector<8x32xbf16>
      %c0_72 = arith.constant 0 : index
      %c0_73 = arith.constant 0 : index
      %155 = vector.load %arg8[%c0_72, %c0_73] : memref<32x64xbf16, #tpu.memory_space<vmem>>, vector<32x64xbf16>
      %cst_74 = arith.constant dense<0.000000e+00> : vector<8x64xf32>
      %156 = tpu.matmul %154, %155, %cst_74 {dimension_numbers = #tpu.dot_dimension_numbers<[1], [0], [0], [1], [0, 0, 1, 1], [], []>} : vector<8x32xbf16>, vector<32x64xbf16>, vector<8x64xf32> -> vector<8x64xf32>
      %157 = arith.truncf %156 : vector<8x64xf32> to vector<8x64xbf16>
      %c0_75 = arith.constant 0 : index
      %c0_76 = arith.constant 0 : index
      %158 = vector.load %arg11[%c0_75, %c0_76] : memref<8x64xbf16, #tpu.memory_space<vmem>>, vector<8x64xbf16>
      tpu.vector_store %arg11[%c0_75, %c0_76], %157 {strides = array<i32>} : memref<8x64xbf16, #tpu.memory_space<vmem>>, vector<8x64xbf16>,
    } else {
    }
    %c0 = arith.constant 0 : index
    %c0_1 = arith.constant 0 : index
    %c0_2 = arith.constant 0 : index
    %3 = vector.load %arg3[%c0, %c0_1, %c0_2] : memref<1x8x32xf32, #tpu.memory_space<vmem>>, vector<1x8x32xf32>
    %4 = vector.shape_cast %3 : vector<1x8x32xf32> to vector<8x32xf32>
    %c0_3 = arith.constant 0 : index
    %c0_4 = arith.constant 0 : index
    %5 = vector.load %arg5[%c0_3, %c0_4] : memref<1x32xf32, #tpu.memory_space<vmem>>, vector<1x32xf32>
    %c0_5 = arith.constant 0 : index
    %c0_6 = arith.constant 0 : index
    %6 = vector.load %arg6[%c0_5, %c0_6] : memref<1x32xf32, #tpu.memory_space<vmem>>, vector<1x32xf32>
    %cst = arith.constant dense<0.000000e+00> : vector<8xf32>
    %7 = vector.multi_reduction <add>, %4, %cst [1] : vector<8x32xf32> to vector<8xf32>
    %8 = vector.shape_cast %7 : vector<8xf32> to vector<8x1xf32>
    %cst_7 = arith.constant 3.200000e+01 : f32
    %9 = vector.broadcast %cst_7 : f32 to vector<8x1xf32>
    %10 = arith.divf %8, %9 : vector<8x1xf32>
    %11 = vector.broadcast %10 : vector<8x1xf32> to vector<8x32xf32>
    %12 = arith.subf %4, %11 : vector<8x32xf32>
    %13 = arith.mulf %12, %12 : vector<8x32xf32>
    %cst_8 = arith.constant dense<0.000000e+00> : vector<8xf32>
    %14 = vector.multi_reduction <add>, %13, %cst_8 [1] : vector<8x32xf32> to vector<8xf32>
    %15 = vector.shape_cast %14 : vector<8xf32> to vector<8x1xf32>
    %cst_9 = arith.constant 0.0322580636 : f32
    %16 = vector.broadcast %cst_9 : f32 to vector<8x1xf32>
    %17 = arith.mulf %15, %16 : vector<8x1xf32>
    %18 = math.sqrt %17 : vector<8x1xf32>
    %cst_10 = arith.constant 9.99999997E-7 : f32
    %19 = vector.broadcast %cst_10 : f32 to vector<8x1xf32>
    %20 = arith.addf %18, %19 : vector<8x1xf32>
    %cst_11 = arith.constant 1.000000e+00 : f32
    %21 = vector.broadcast %cst_11 : f32 to vector<8x1xf32>
    %22 = arith.divf %21, %20 : vector<8x1xf32>
    %23 = vector.broadcast %22 : vector<8x1xf32> to vector<8x32xf32>
    %24 = arith.mulf %12, %23 : vector<8x32xf32>
    %25 = vector.broadcast %5 : vector<1x32xf32> to vector<8x32xf32>
    %26 = arith.mulf %25, %24 : vector<8x32xf32>
    %27 = vector.broadcast %6 : vector<1x32xf32> to vector<8x32xf32>
    %28 = arith.addf %26, %27 : vector<8x32xf32>
    %29 = arith.truncf %28 : vector<8x32xf32> to vector<8x32xbf16>
    %c0_12 = arith.constant 0 : index
    %c0_13 = arith.constant 0 : index
    %30 = vector.load %arg7[%c0_12, %c0_13] : memref<32x32xbf16, #tpu.memory_space<vmem>>, vector<32x32xbf16>
    %cst_14 = arith.constant dense<0.000000e+00> : vector<8x32xf32>
    %31 = tpu.matmul %29, %30, %cst_14 {dimension_numbers = #tpu.dot_dimension_numbers<[1], [0], [0], [1], [0, 0, 1, 1], [], []>} : vector<8x32xbf16>, vector<32x32xbf16>, vector<8x32xf32> -> vector<8x32xf32>
    %32 = arith.truncf %31 : vector<8x32xf32> to vector<8x32xbf16>
    %c0_15 = arith.constant 0 : index
    %c0_16 = arith.constant 0 : index
    %c0_17 = arith.constant 0 : index
    %33 = vector.load %arg4[%c0_15, %c0_16, %c0_17] : memref<1x1x8xf32, #tpu.memory_space<vmem>>, vector<1x1x8xf32>
    %34 = vector.shape_cast %33 : vector<1x1x8xf32> to vector<1x8xf32>
    %cst_18 = arith.constant 0.000000e+00 : f32
    %35 = vector.broadcast %cst_18 : f32 to vector<8x32xf32>
    %36 = vector.extract_strided_slice %32 {offsets = [0, 0], sizes = [8, 8], strides = [1, 1]} : vector<8x32xbf16> to vector<8x8xbf16>
    %c0_19 = arith.constant 0 : index
    %c0_20 = arith.constant 0 : index
    %37 = vector.load %arg11[%c0_19, %c0_20] : memref<8x64xbf16, #tpu.memory_space<vmem>>, vector<8x8xbf16>
    %c0_21 = arith.constant 0 : index
    %c32 = arith.constant 32 : index
    %38 = vector.load %arg11[%c0_21, %c32] : memref<8x64xbf16, #tpu.memory_space<vmem>>, vector<8x8xbf16>
    %cst_22 = arith.constant dense<0.000000e+00> : vector<8x8xf32>
    %39 = tpu.matmul %36, %37, %cst_22 {dimension_numbers = #tpu.dot_dimension_numbers<[1], [1], [0], [0], [0, 0, 1, 0], [], []>} : vector<8x8xbf16>, vector<8x8xbf16>, vector<8x8xf32> -> vector<8x8xf32>
    %40 = vector.broadcast %34 : vector<1x8xf32> to vector<8x8xf32>
    %41 = arith.addf %39, %40 : vector<8x8xf32>
    %cst_23 = arith.constant dense<0xFF800000> : vector<8xf32>
    %42 = vector.multi_reduction <maximumf>, %41, %cst_23 [1] : vector<8x8xf32> to vector<8xf32>
    %43 = vector.shape_cast %42 : vector<8xf32> to vector<8x1xf32>
    %44 = vector.broadcast %43 : vector<8x1xf32> to vector<8x8xf32>
    %45 = arith.subf %41, %44 : vector<8x8xf32>
    %46 = math.exp %45 : vector<8x8xf32>
    %cst_24 = arith.constant dense<0.000000e+00> : vector<8xf32>
    %47 = vector.multi_reduction <add>, %46, %cst_24 [1] : vector<8x8xf32> to vector<8xf32>
    %48 = vector.shape_cast %47 : vector<8xf32> to vector<8x1xf32>
    %49 = tpu.reciprocal %48 {approx = true} : vector<8x1xf32> -> vector<8x1xf32>
    %50 = vector.broadcast %49 : vector<8x1xf32> to vector<8x8xf32>
    %51 = arith.mulf %46, %50 : vector<8x8xf32>
    %52 = arith.truncf %51 : vector<8x8xf32> to vector<8x8xbf16>
    %cst_25 = arith.constant dense<0.000000e+00> : vector<8x8xf32>
    %53 = tpu.matmul %52, %38, %cst_25 {dimension_numbers = #tpu.dot_dimension_numbers<[1], [0], [0], [1], [0, 0, 1, 1], [], []>} : vector<8x8xbf16>, vector<8x8xbf16>, vector<8x8xf32> -> vector<8x8xf32>
    %54 = arith.truncf %53 : vector<8x8xf32> to vector<8x8xbf16>
    %c0_26 = arith.constant 0 : index
    %c0_27 = arith.constant 0 : index
    %55 = vector.load %arg9[%c0_26, %c0_27] : memref<32x32xbf16, #tpu.memory_space<vmem>>, vector<8x32xbf16>
    %cst_28 = arith.constant dense<0.000000e+00> : vector<8x32xf32>
    %56 = tpu.matmul %54, %55, %cst_28 {dimension_numbers = #tpu.dot_dimension_numbers<[1], [0], [0], [1], [0, 0, 1, 1], [], []>} : vector<8x8xbf16>, vector<8x32xbf16>, vector<8x32xf32> -> vector<8x32xf32>
    %57 = arith.addf %35, %56 : vector<8x32xf32>
    %58 = vector.extract_strided_slice %32 {offsets = [0, 8], sizes = [8, 8], strides = [1, 1]} : vector<8x32xbf16> to vector<8x8xbf16>
    %c0_29 = arith.constant 0 : index
    %c8 = arith.constant 8 : index
    %59 = vector.load %arg11[%c0_29, %c8] : memref<8x64xbf16, #tpu.memory_space<vmem>>, vector<8x8xbf16>
    %c0_30 = arith.constant 0 : index
    %c40 = arith.constant 40 : index
    %60 = vector.load %arg11[%c0_30, %c40] : memref<8x64xbf16, #tpu.memory_space<vmem>>, vector<8x8xbf16>
    %cst_31 = arith.constant dense<0.000000e+00> : vector<8x8xf32>
    %61 = tpu.matmul %58, %59, %cst_31 {dimension_numbers = #tpu.dot_dimension_numbers<[1], [1], [0], [0], [0, 0, 1, 0], [], []>} : vector<8x8xbf16>, vector<8x8xbf16>, vector<8x8xf32> -> vector<8x8xf32>
    %62 = vector.broadcast %34 : vector<1x8xf32> to vector<8x8xf32>
    %63 = arith.addf %61, %62 : vector<8x8xf32>
    %cst_32 = arith.constant dense<0xFF800000> : vector<8xf32>
    %64 = vector.multi_reduction <maximumf>, %63, %cst_32 [1] : vector<8x8xf32> to vector<8xf32>
    %65 = vector.shape_cast %64 : vector<8xf32> to vector<8x1xf32>
    %66 = vector.broadcast %65 : vector<8x1xf32> to vector<8x8xf32>
    %67 = arith.subf %63, %66 : vector<8x8xf32>
    %68 = math.exp %67 : vector<8x8xf32>
    %cst_33 = arith.constant dense<0.000000e+00> : vector<8xf32>
    %69 = vector.multi_reduction <add>, %68, %cst_33 [1] : vector<8x8xf32> to vector<8xf32>
    %70 = vector.shape_cast %69 : vector<8xf32> to vector<8x1xf32>
    %71 = tpu.reciprocal %70 {approx = true} : vector<8x1xf32> -> vector<8x1xf32>
    %72 = vector.broadcast %71 : vector<8x1xf32> to vector<8x8xf32>
    %73 = arith.mulf %68, %72 : vector<8x8xf32>
    %74 = arith.truncf %73 : vector<8x8xf32> to vector<8x8xbf16>
    %cst_34 = arith.constant dense<0.000000e+00> : vector<8x8xf32>
    %75 = tpu.matmul %74, %60, %cst_34 {dimension_numbers = #tpu.dot_dimension_numbers<[1], [0], [0], [1], [0, 0, 1, 1], [], []>} : vector<8x8xbf16>, vector<8x8xbf16>, vector<8x8xf32> -> vector<8x8xf32>
    %76 = arith.truncf %75 : vector<8x8xf32> to vector<8x8xbf16>
    %c8_35 = arith.constant 8 : index
    %c0_36 = arith.constant 0 : index
    %77 = vector.load %arg9[%c8_35, %c0_36] : memref<32x32xbf16, #tpu.memory_space<vmem>>, vector<8x32xbf16>
    %cst_37 = arith.constant dense<0.000000e+00> : vector<8x32xf32>
    %78 = tpu.matmul %76, %77, %cst_37 {dimension_numbers = #tpu.dot_dimension_numbers<[1], [0], [0], [1], [0, 0, 1, 1], [], []>} : vector<8x8xbf16>, vector<8x32xbf16>, vector<8x32xf32> -> vector<8x32xf32>
    %79 = arith.addf %57, %78 : vector<8x32xf32>
    %80 = vector.extract_strided_slice %32 {offsets = [0, 16], sizes = [8, 8], strides = [1, 1]} : vector<8x32xbf16> to vector<8x8xbf16>
    %c0_38 = arith.constant 0 : index
    %c16 = arith.constant 16 : index
    %81 = vector.load %arg11[%c0_38, %c16] : memref<8x64xbf16, #tpu.memory_space<vmem>>, vector<8x8xbf16>
    %c0_39 = arith.constant 0 : index
    %c48 = arith.constant 48 : index
    %82 = vector.load %arg11[%c0_39, %c48] : memref<8x64xbf16, #tpu.memory_space<vmem>>, vector<8x8xbf16>
    %cst_40 = arith.constant dense<0.000000e+00> : vector<8x8xf32>
    %83 = tpu.matmul %80, %81, %cst_40 {dimension_numbers = #tpu.dot_dimension_numbers<[1], [1], [0], [0], [0, 0, 1, 0], [], []>} : vector<8x8xbf16>, vector<8x8xbf16>, vector<8x8xf32> -> vector<8x8xf32>
    %84 = vector.broadcast %34 : vector<1x8xf32> to vector<8x8xf32>
    %85 = arith.addf %83, %84 : vector<8x8xf32>
    %cst_41 = arith.constant dense<0xFF800000> : vector<8xf32>
    %86 = vector.multi_reduction <maximumf>, %85, %cst_41 [1] : vector<8x8xf32> to vector<8xf32>
    %87 = vector.shape_cast %86 : vector<8xf32> to vector<8x1xf32>
    %88 = vector.broadcast %87 : vector<8x1xf32> to vector<8x8xf32>
    %89 = arith.subf %85, %88 : vector<8x8xf32>
    %90 = math.exp %89 : vector<8x8xf32>
    %cst_42 = arith.constant dense<0.000000e+00> : vector<8xf32>
    %91 = vector.multi_reduction <add>, %90, %cst_42 [1] : vector<8x8xf32> to vector<8xf32>
    %92 = vector.shape_cast %91 : vector<8xf32> to vector<8x1xf32>
    %93 = tpu.reciprocal %92 {approx = true} : vector<8x1xf32> -> vector<8x1xf32>
    %94 = vector.broadcast %93 : vector<8x1xf32> to vector<8x8xf32>
    %95 = arith.mulf %90, %94 : vector<8x8xf32>
    %96 = arith.truncf %95 : vector<8x8xf32> to vector<8x8xbf16>
    %cst_43 = arith.constant dense<0.000000e+00> : vector<8x8xf32>
    %97 = tpu.matmul %96, %82, %cst_43 {dimension_numbers = #tpu.dot_dimension_numbers<[1], [0], [0], [1], [0, 0, 1, 1], [], []>} : vector<8x8xbf16>, vector<8x8xbf16>, vector<8x8xf32> -> vector<8x8xf32>
    %98 = arith.truncf %97 : vector<8x8xf32> to vector<8x8xbf16>
    %c16_44 = arith.constant 16 : index
    %c0_45 = arith.constant 0 : index
    %99 = vector.load %arg9[%c16_44, %c0_45] : memref<32x32xbf16, #tpu.memory_space<vmem>>, vector<8x32xbf16>
    %cst_46 = arith.constant dense<0.000000e+00> : vector<8x32xf32>
    %100 = tpu.matmul %98, %99, %cst_46 {dimension_numbers = #tpu.dot_dimension_numbers<[1], [0], [0], [1], [0, 0, 1, 1], [], []>} : vector<8x8xbf16>, vector<8x32xbf16>, vector<8x32xf32> -> vector<8x32xf32>
    %101 = arith.addf %79, %100 : vector<8x32xf32>
    %102 = vector.extract_strided_slice %32 {offsets = [0, 24], sizes = [8, 8], strides = [1, 1]} : vector<8x32xbf16> to vector<8x8xbf16>
    %c0_47 = arith.constant 0 : index
    %c24 = arith.constant 24 : index
    %103 = vector.load %arg11[%c0_47, %c24] : memref<8x64xbf16, #tpu.memory_space<vmem>>, vector<8x8xbf16>
    %c0_48 = arith.constant 0 : index
    %c56 = arith.constant 56 : index
    %104 = vector.load %arg11[%c0_48, %c56] : memref<8x64xbf16, #tpu.memory_space<vmem>>, vector<8x8xbf16>
    %cst_49 = arith.constant dense<0.000000e+00> : vector<8x8xf32>
    %105 = tpu.matmul %102, %103, %cst_49 {dimension_numbers = #tpu.dot_dimension_numbers<[1], [1], [0], [0], [0, 0, 1, 0], [], []>} : vector<8x8xbf16>, vector<8x8xbf16>, vector<8x8xf32> -> vector<8x8xf32>
    %106 = vector.broadcast %34 : vector<1x8xf32> to vector<8x8xf32>
    %107 = arith.addf %105, %106 : vector<8x8xf32>
    %cst_50 = arith.constant dense<0xFF800000> : vector<8xf32>
    %108 = vector.multi_reduction <maximumf>, %107, %cst_50 [1] : vector<8x8xf32> to vector<8xf32>
    %109 = vector.shape_cast %108 : vector<8xf32> to vector<8x1xf32>
    %110 = vector.broadcast %109 : vector<8x1xf32> to vector<8x8xf32>
    %111 = arith.subf %107, %110 : vector<8x8xf32>
    %112 = math.exp %111 : vector<8x8xf32>
    %cst_51 = arith.constant dense<0.000000e+00> : vector<8xf32>
    %113 = vector.multi_reduction <add>, %112, %cst_51 [1] : vector<8x8xf32> to vector<8xf32>
    %114 = vector.shape_cast %113 : vector<8xf32> to vector<8x1xf32>
    %115 = tpu.reciprocal %114 {approx = true} : vector<8x1xf32> -> vector<8x1xf32>
    %116 = vector.broadcast %115 : vector<8x1xf32> to vector<8x8xf32>
    %117 = arith.mulf %112, %116 : vector<8x8xf32>
    %118 = arith.truncf %117 : vector<8x8xf32> to vector<8x8xbf16>
    %cst_52 = arith.constant dense<0.000000e+00> : vector<8x8xf32>
    %119 = tpu.matmul %118, %104, %cst_52 {dimension_numbers = #tpu.dot_dimension_numbers<[1], [0], [0], [1], [0, 0, 1, 1], [], []>} : vector<8x8xbf16>, vector<8x8xbf16>, vector<8x8xf32> -> vector<8x8xf32>
    %120 = arith.truncf %119 : vector<8x8xf32> to vector<8x8xbf16>
    %c24_53 = arith.constant 24 : index
    %c0_54 = arith.constant 0 : index
    %121 = vector.load %arg9[%c24_53, %c0_54] : memref<32x32xbf16, #tpu.memory_space<vmem>>, vector<8x32xbf16>
    %cst_55 = arith.constant dense<0.000000e+00> : vector<8x32xf32>
    %122 = tpu.matmul %120, %121, %cst_55 {dimension_numbers = #tpu.dot_dimension_numbers<[1], [0], [0], [1], [0, 0, 1, 1], [], []>} : vector<8x8xbf16>, vector<8x32xbf16>, vector<8x32xf32> -> vector<8x32xf32>
    %123 = arith.addf %101, %122 : vector<8x32xf32>
    %124 = arith.addf %4, %123 : vector<8x32xf32>
    %c0_56 = arith.constant 0 : index
    %c0_57 = arith.constant 0 : index
    %c0_58 = arith.constant 0 : index
    %125 = vector.load %arg10[%c0_56, %c0_57, %c0_58] : memref<1x8x32xf32, #tpu.memory_space<vmem>>, vector<1x8x32xf32>
    %126 = vector.shape_cast %125 : vector<1x8x32xf32> to vector<8x32xf32>
    %127 = vector.shape_cast %124 : vector<8x32xf32> to vector<1x8x32xf32>
    tpu.vector_store %arg10[%c0_56, %c0_57, %c0_58], %127 {strides = array<i32>} : memref<1x8x32xf32, #tpu.memory_space<vmem>>, vector<1x8x32xf32>,
    return
  }
  func.func @transform_0(%arg0: i32, %arg1: i32) -> (i32, i32, i32) {
    %c0_i32 = arith.constant 0 : i32
    %c0_i32_0 = arith.constant 0 : i32
    %c0_i32_1 = arith.constant 0 : i32
    return %arg0, %c0_i32, %c0_i32_0 : i32, i32, i32
  }
  func.func @transform_1(%arg0: i32, %arg1: i32) -> (i32, i32, i32) {
    %c0_i32 = arith.constant 0 : i32
    %c0_i32_0 = arith.constant 0 : i32
    return %arg0, %arg1, %c0_i32 : i32, i32, i32
  }
  func.func @transform_2(%arg0: i32, %arg1: i32) -> (i32, i32, i32) {
    %c0_i32 = arith.constant 0 : i32
    %c0_i32_0 = arith.constant 0 : i32
    %c0_i32_1 = arith.constant 0 : i32
    return %arg0, %c0_i32, %c0_i32_0 : i32, i32, i32
  }
  func.func @transform_3(%arg0: i32, %arg1: i32) -> (i32, i32) {
    %c0_i32 = arith.constant 0 : i32
    %c0_i32_0 = arith.constant 0 : i32
    %c0_i32_1 = arith.constant 0 : i32
    return %c0_i32, %c0_i32_0 : i32, i32
  }
  func.func @transform_4(%arg0: i32, %arg1: i32) -> (i32, i32) {
    %c0_i32 = arith.constant 0 : i32
    %c0_i32_0 = arith.constant 0 : i32
    %c0_i32_1 = arith.constant 0 : i32
    return %c0_i32, %c0_i32_0 : i32, i32
  }
  func.func @transform_5(%arg0: i32, %arg1: i32) -> (i32, i32) {
    %c0_i32 = arith.constant 0 : i32
    %c0_i32_0 = arith.constant 0 : i32
    %c0_i32_1 = arith.constant 0 : i32
    return %c0_i32, %c0_i32_0 : i32, i32
  }
  func.func @transform_6(%arg0: i32, %arg1: i32) -> (i32, i32) {
    %c0_i32 = arith.constant 0 : i32
    %c0_i32_0 = arith.constant 0 : i32
    %c0_i32_1 = arith.constant 0 : i32
    return %c0_i32, %c0_i32_0 : i32, i32
  }
  func.func @transform_7(%arg0: i32, %arg1: i32) -> (i32, i32) {
    %c0_i32 = arith.constant 0 : i32
    %c0_i32_0 = arith.constant 0 : i32
    %c0_i32_1 = arith.constant 0 : i32
    return %c0_i32, %c0_i32_0 : i32, i32
  }
  func.func @transform_8(%arg0: i32, %arg1: i32) -> (i32, i32, i32) {
    %c0_i32 = arith.constant 0 : i32
    %c0_i32_0 = arith.constant 0 : i32
    return %arg0, %arg1, %c0_i32 : i32, i32, i32
  }
}

module attributes {stable_mosaic.version = 11 : i64} {
  func.func @_ln_ffn_res_kernel(%arg0: i32, %arg1: memref<16x32xf32, #tpu.memory_space<vmem>>, %arg2: memref<1x32xf32, #tpu.memory_space<vmem>>, %arg3: memref<1x32xf32, #tpu.memory_space<vmem>>, %arg4: memref<32x64xbf16, #tpu.memory_space<vmem>>, %arg5: memref<1x64xf32, #tpu.memory_space<vmem>>, %arg6: memref<64x32xbf16, #tpu.memory_space<vmem>>, %arg7: memref<1x32xf32, #tpu.memory_space<vmem>>, %arg8: memref<16x32xf32, #tpu.memory_space<vmem>>) attributes {dimension_semantics = [#tpu.dimension_semantics<parallel>], iteration_bounds = array<i64: 1>, scalar_prefetch = 0 : i64, scratch_operands = 0 : i64, tpu.core_type = #tpu.core_type<tc>, window_params = [{transform_indices = @transform_0, window_bounds = array<i64: 16, 32>}, {pipeline_mode = #tpu.pipeline_mode<synchronous>, transform_indices = @transform_1, window_bounds = array<i64: 1, 32>}, {pipeline_mode = #tpu.pipeline_mode<synchronous>, transform_indices = @transform_2, window_bounds = array<i64: 1, 32>}, {pipeline_mode = #tpu.pipeline_mode<synchronous>, transform_indices = @transform_3, window_bounds = array<i64: 32, 64>}, {pipeline_mode = #tpu.pipeline_mode<synchronous>, transform_indices = @transform_4, window_bounds = array<i64: 1, 64>}, {pipeline_mode = #tpu.pipeline_mode<synchronous>, transform_indices = @transform_5, window_bounds = array<i64: 64, 32>}, {pipeline_mode = #tpu.pipeline_mode<synchronous>, transform_indices = @transform_6, window_bounds = array<i64: 1, 32>}, {transform_indices = @transform_7, window_bounds = array<i64: 16, 32>}]} {
    %c0 = arith.constant 0 : index
    %c0_0 = arith.constant 0 : index
    %0 = vector.load %arg1[%c0, %c0_0] : memref<16x32xf32, #tpu.memory_space<vmem>>, vector<16x32xf32>
    %c0_1 = arith.constant 0 : index
    %c0_2 = arith.constant 0 : index
    %1 = vector.load %arg2[%c0_1, %c0_2] : memref<1x32xf32, #tpu.memory_space<vmem>>, vector<1x32xf32>
    %c0_3 = arith.constant 0 : index
    %c0_4 = arith.constant 0 : index
    %2 = vector.load %arg3[%c0_3, %c0_4] : memref<1x32xf32, #tpu.memory_space<vmem>>, vector<1x32xf32>
    %cst = arith.constant dense<0.000000e+00> : vector<16xf32>
    %3 = vector.multi_reduction <add>, %0, %cst [1] : vector<16x32xf32> to vector<16xf32>
    %4 = vector.shape_cast %3 : vector<16xf32> to vector<16x1xf32>
    %cst_5 = arith.constant 3.200000e+01 : f32
    %5 = vector.broadcast %cst_5 : f32 to vector<16x1xf32>
    %6 = arith.divf %4, %5 : vector<16x1xf32>
    %7 = vector.broadcast %6 : vector<16x1xf32> to vector<16x32xf32>
    %8 = arith.subf %0, %7 : vector<16x32xf32>
    %9 = arith.mulf %8, %8 : vector<16x32xf32>
    %cst_6 = arith.constant dense<0.000000e+00> : vector<16xf32>
    %10 = vector.multi_reduction <add>, %9, %cst_6 [1] : vector<16x32xf32> to vector<16xf32>
    %11 = vector.shape_cast %10 : vector<16xf32> to vector<16x1xf32>
    %cst_7 = arith.constant 0.0322580636 : f32
    %12 = vector.broadcast %cst_7 : f32 to vector<16x1xf32>
    %13 = arith.mulf %11, %12 : vector<16x1xf32>
    %14 = math.sqrt %13 : vector<16x1xf32>
    %cst_8 = arith.constant 9.99999997E-7 : f32
    %15 = vector.broadcast %cst_8 : f32 to vector<16x1xf32>
    %16 = arith.addf %14, %15 : vector<16x1xf32>
    %cst_9 = arith.constant 1.000000e+00 : f32
    %17 = vector.broadcast %cst_9 : f32 to vector<16x1xf32>
    %18 = arith.divf %17, %16 : vector<16x1xf32>
    %19 = vector.broadcast %18 : vector<16x1xf32> to vector<16x32xf32>
    %20 = arith.mulf %8, %19 : vector<16x32xf32>
    %21 = vector.broadcast %1 : vector<1x32xf32> to vector<16x32xf32>
    %22 = arith.mulf %21, %20 : vector<16x32xf32>
    %23 = vector.broadcast %2 : vector<1x32xf32> to vector<16x32xf32>
    %24 = arith.addf %22, %23 : vector<16x32xf32>
    %25 = arith.truncf %24 : vector<16x32xf32> to vector<16x32xbf16>
    %c0_10 = arith.constant 0 : index
    %c0_11 = arith.constant 0 : index
    %26 = vector.load %arg4[%c0_10, %c0_11] : memref<32x64xbf16, #tpu.memory_space<vmem>>, vector<32x64xbf16>
    %cst_12 = arith.constant dense<0.000000e+00> : vector<16x64xf32>
    %27 = tpu.matmul %25, %26, %cst_12 {dimension_numbers = #tpu.dot_dimension_numbers<[1], [0], [0], [1], [0, 0, 1, 1], [], []>} : vector<16x32xbf16>, vector<32x64xbf16>, vector<16x64xf32> -> vector<16x64xf32>
    %c0_13 = arith.constant 0 : index
    %c0_14 = arith.constant 0 : index
    %28 = vector.load %arg5[%c0_13, %c0_14] : memref<1x64xf32, #tpu.memory_space<vmem>>, vector<1x64xf32>
    %29 = vector.broadcast %28 : vector<1x64xf32> to vector<16x64xf32>
    %30 = arith.addf %27, %29 : vector<16x64xf32>
    %cst_15 = arith.constant 0.000000e+00 : f32
    %31 = vector.broadcast %cst_15 : f32 to vector<16x64xf32>
    %32 = arith.maximumf %30, %31 : vector<16x64xf32>
    %33 = arith.truncf %32 : vector<16x64xf32> to vector<16x64xbf16>
    %c0_16 = arith.constant 0 : index
    %c0_17 = arith.constant 0 : index
    %34 = vector.load %arg6[%c0_16, %c0_17] : memref<64x32xbf16, #tpu.memory_space<vmem>>, vector<64x32xbf16>
    %cst_18 = arith.constant dense<0.000000e+00> : vector<16x32xf32>
    %35 = tpu.matmul %33, %34, %cst_18 {dimension_numbers = #tpu.dot_dimension_numbers<[1], [0], [0], [1], [0, 0, 1, 1], [], []>} : vector<16x64xbf16>, vector<64x32xbf16>, vector<16x32xf32> -> vector<16x32xf32>
    %c0_19 = arith.constant 0 : index
    %c0_20 = arith.constant 0 : index
    %36 = vector.load %arg7[%c0_19, %c0_20] : memref<1x32xf32, #tpu.memory_space<vmem>>, vector<1x32xf32>
    %37 = vector.broadcast %36 : vector<1x32xf32> to vector<16x32xf32>
    %38 = arith.addf %35, %37 : vector<16x32xf32>
    %39 = arith.addf %0, %38 : vector<16x32xf32>
    %c0_21 = arith.constant 0 : index
    %c0_22 = arith.constant 0 : index
    %40 = vector.load %arg8[%c0_21, %c0_22] : memref<16x32xf32, #tpu.memory_space<vmem>>, vector<16x32xf32>
    tpu.vector_store %arg8[%c0_21, %c0_22], %39 {strides = array<i32>} : memref<16x32xf32, #tpu.memory_space<vmem>>, vector<16x32xf32>,
    return
  }
  func.func @transform_0(%arg0: i32) -> (i32, i32) {
    %c0_i32 = arith.constant 0 : i32
    %c0_i32_0 = arith.constant 0 : i32
    return %arg0, %c0_i32 : i32, i32
  }
  func.func @transform_1(%arg0: i32) -> (i32, i32) {
    %c0_i32 = arith.constant 0 : i32
    %c0_i32_0 = arith.constant 0 : i32
    %c0_i32_1 = arith.constant 0 : i32
    return %c0_i32, %c0_i32_0 : i32, i32
  }
  func.func @transform_2(%arg0: i32) -> (i32, i32) {
    %c0_i32 = arith.constant 0 : i32
    %c0_i32_0 = arith.constant 0 : i32
    %c0_i32_1 = arith.constant 0 : i32
    return %c0_i32, %c0_i32_0 : i32, i32
  }
  func.func @transform_3(%arg0: i32) -> (i32, i32) {
    %c0_i32 = arith.constant 0 : i32
    %c0_i32_0 = arith.constant 0 : i32
    %c0_i32_1 = arith.constant 0 : i32
    return %c0_i32, %c0_i32_0 : i32, i32
  }
  func.func @transform_4(%arg0: i32) -> (i32, i32) {
    %c0_i32 = arith.constant 0 : i32
    %c0_i32_0 = arith.constant 0 : i32
    %c0_i32_1 = arith.constant 0 : i32
    return %c0_i32, %c0_i32_0 : i32, i32
  }
  func.func @transform_5(%arg0: i32) -> (i32, i32) {
    %c0_i32 = arith.constant 0 : i32
    %c0_i32_0 = arith.constant 0 : i32
    %c0_i32_1 = arith.constant 0 : i32
    return %c0_i32, %c0_i32_0 : i32, i32
  }
  func.func @transform_6(%arg0: i32) -> (i32, i32) {
    %c0_i32 = arith.constant 0 : i32
    %c0_i32_0 = arith.constant 0 : i32
    %c0_i32_1 = arith.constant 0 : i32
    return %c0_i32, %c0_i32_0 : i32, i32
  }
  func.func @transform_7(%arg0: i32) -> (i32, i32) {
    %c0_i32 = arith.constant 0 : i32
    %c0_i32_0 = arith.constant 0 : i32
    return %arg0, %c0_i32 : i32, i32
  }
}

module attributes {stable_mosaic.version = 11 : i64} {
  func.func @_ln_ffn_res_kernel(%arg0: i32, %arg1: memref<16x32xf32, #tpu.memory_space<vmem>>, %arg2: memref<1x32xf32, #tpu.memory_space<vmem>>, %arg3: memref<1x32xf32, #tpu.memory_space<vmem>>, %arg4: memref<32x64xbf16, #tpu.memory_space<vmem>>, %arg5: memref<1x64xf32, #tpu.memory_space<vmem>>, %arg6: memref<64x32xbf16, #tpu.memory_space<vmem>>, %arg7: memref<1x32xf32, #tpu.memory_space<vmem>>, %arg8: memref<1x32xf32, #tpu.memory_space<vmem>>, %arg9: memref<1x32xf32, #tpu.memory_space<vmem>>, %arg10: memref<16x32xf32, #tpu.memory_space<vmem>>) attributes {dimension_semantics = [#tpu.dimension_semantics<parallel>], iteration_bounds = array<i64: 1>, scalar_prefetch = 0 : i64, scratch_operands = 0 : i64, tpu.core_type = #tpu.core_type<tc>, window_params = [{transform_indices = @transform_0, window_bounds = array<i64: 16, 32>}, {pipeline_mode = #tpu.pipeline_mode<synchronous>, transform_indices = @transform_1, window_bounds = array<i64: 1, 32>}, {pipeline_mode = #tpu.pipeline_mode<synchronous>, transform_indices = @transform_2, window_bounds = array<i64: 1, 32>}, {pipeline_mode = #tpu.pipeline_mode<synchronous>, transform_indices = @transform_3, window_bounds = array<i64: 32, 64>}, {pipeline_mode = #tpu.pipeline_mode<synchronous>, transform_indices = @transform_4, window_bounds = array<i64: 1, 64>}, {pipeline_mode = #tpu.pipeline_mode<synchronous>, transform_indices = @transform_5, window_bounds = array<i64: 64, 32>}, {pipeline_mode = #tpu.pipeline_mode<synchronous>, transform_indices = @transform_6, window_bounds = array<i64: 1, 32>}, {pipeline_mode = #tpu.pipeline_mode<synchronous>, transform_indices = @transform_7, window_bounds = array<i64: 1, 32>}, {pipeline_mode = #tpu.pipeline_mode<synchronous>, transform_indices = @transform_8, window_bounds = array<i64: 1, 32>}, {transform_indices = @transform_9, window_bounds = array<i64: 16, 32>}]} {
    %c0 = arith.constant 0 : index
    %c0_0 = arith.constant 0 : index
    %0 = vector.load %arg1[%c0, %c0_0] : memref<16x32xf32, #tpu.memory_space<vmem>>, vector<16x32xf32>
    %c0_1 = arith.constant 0 : index
    %c0_2 = arith.constant 0 : index
    %1 = vector.load %arg2[%c0_1, %c0_2] : memref<1x32xf32, #tpu.memory_space<vmem>>, vector<1x32xf32>
    %c0_3 = arith.constant 0 : index
    %c0_4 = arith.constant 0 : index
    %2 = vector.load %arg3[%c0_3, %c0_4] : memref<1x32xf32, #tpu.memory_space<vmem>>, vector<1x32xf32>
    %cst = arith.constant dense<0.000000e+00> : vector<16xf32>
    %3 = vector.multi_reduction <add>, %0, %cst [1] : vector<16x32xf32> to vector<16xf32>
    %4 = vector.shape_cast %3 : vector<16xf32> to vector<16x1xf32>
    %cst_5 = arith.constant 3.200000e+01 : f32
    %5 = vector.broadcast %cst_5 : f32 to vector<16x1xf32>
    %6 = arith.divf %4, %5 : vector<16x1xf32>
    %7 = vector.broadcast %6 : vector<16x1xf32> to vector<16x32xf32>
    %8 = arith.subf %0, %7 : vector<16x32xf32>
    %9 = arith.mulf %8, %8 : vector<16x32xf32>
    %cst_6 = arith.constant dense<0.000000e+00> : vector<16xf32>
    %10 = vector.multi_reduction <add>, %9, %cst_6 [1] : vector<16x32xf32> to vector<16xf32>
    %11 = vector.shape_cast %10 : vector<16xf32> to vector<16x1xf32>
    %cst_7 = arith.constant 0.0322580636 : f32
    %12 = vector.broadcast %cst_7 : f32 to vector<16x1xf32>
    %13 = arith.mulf %11, %12 : vector<16x1xf32>
    %14 = math.sqrt %13 : vector<16x1xf32>
    %cst_8 = arith.constant 9.99999997E-7 : f32
    %15 = vector.broadcast %cst_8 : f32 to vector<16x1xf32>
    %16 = arith.addf %14, %15 : vector<16x1xf32>
    %cst_9 = arith.constant 1.000000e+00 : f32
    %17 = vector.broadcast %cst_9 : f32 to vector<16x1xf32>
    %18 = arith.divf %17, %16 : vector<16x1xf32>
    %19 = vector.broadcast %18 : vector<16x1xf32> to vector<16x32xf32>
    %20 = arith.mulf %8, %19 : vector<16x32xf32>
    %21 = vector.broadcast %1 : vector<1x32xf32> to vector<16x32xf32>
    %22 = arith.mulf %21, %20 : vector<16x32xf32>
    %23 = vector.broadcast %2 : vector<1x32xf32> to vector<16x32xf32>
    %24 = arith.addf %22, %23 : vector<16x32xf32>
    %25 = arith.truncf %24 : vector<16x32xf32> to vector<16x32xbf16>
    %c0_10 = arith.constant 0 : index
    %c0_11 = arith.constant 0 : index
    %26 = vector.load %arg4[%c0_10, %c0_11] : memref<32x64xbf16, #tpu.memory_space<vmem>>, vector<32x64xbf16>
    %cst_12 = arith.constant dense<0.000000e+00> : vector<16x64xf32>
    %27 = tpu.matmul %25, %26, %cst_12 {dimension_numbers = #tpu.dot_dimension_numbers<[1], [0], [0], [1], [0, 0, 1, 1], [], []>} : vector<16x32xbf16>, vector<32x64xbf16>, vector<16x64xf32> -> vector<16x64xf32>
    %c0_13 = arith.constant 0 : index
    %c0_14 = arith.constant 0 : index
    %28 = vector.load %arg5[%c0_13, %c0_14] : memref<1x64xf32, #tpu.memory_space<vmem>>, vector<1x64xf32>
    %29 = vector.broadcast %28 : vector<1x64xf32> to vector<16x64xf32>
    %30 = arith.addf %27, %29 : vector<16x64xf32>
    %cst_15 = arith.constant 0.000000e+00 : f32
    %31 = vector.broadcast %cst_15 : f32 to vector<16x64xf32>
    %32 = arith.maximumf %30, %31 : vector<16x64xf32>
    %33 = arith.truncf %32 : vector<16x64xf32> to vector<16x64xbf16>
    %c0_16 = arith.constant 0 : index
    %c0_17 = arith.constant 0 : index
    %34 = vector.load %arg6[%c0_16, %c0_17] : memref<64x32xbf16, #tpu.memory_space<vmem>>, vector<64x32xbf16>
    %cst_18 = arith.constant dense<0.000000e+00> : vector<16x32xf32>
    %35 = tpu.matmul %33, %34, %cst_18 {dimension_numbers = #tpu.dot_dimension_numbers<[1], [0], [0], [1], [0, 0, 1, 1], [], []>} : vector<16x64xbf16>, vector<64x32xbf16>, vector<16x32xf32> -> vector<16x32xf32>
    %c0_19 = arith.constant 0 : index
    %c0_20 = arith.constant 0 : index
    %36 = vector.load %arg7[%c0_19, %c0_20] : memref<1x32xf32, #tpu.memory_space<vmem>>, vector<1x32xf32>
    %37 = vector.broadcast %36 : vector<1x32xf32> to vector<16x32xf32>
    %38 = arith.addf %35, %37 : vector<16x32xf32>
    %39 = arith.addf %0, %38 : vector<16x32xf32>
    %c0_21 = arith.constant 0 : index
    %c0_22 = arith.constant 0 : index
    %40 = vector.load %arg8[%c0_21, %c0_22] : memref<1x32xf32, #tpu.memory_space<vmem>>, vector<1x32xf32>
    %c0_23 = arith.constant 0 : index
    %c0_24 = arith.constant 0 : index
    %41 = vector.load %arg9[%c0_23, %c0_24] : memref<1x32xf32, #tpu.memory_space<vmem>>, vector<1x32xf32>
    %cst_25 = arith.constant dense<0.000000e+00> : vector<16xf32>
    %42 = vector.multi_reduction <add>, %39, %cst_25 [1] : vector<16x32xf32> to vector<16xf32>
    %43 = vector.shape_cast %42 : vector<16xf32> to vector<16x1xf32>
    %cst_26 = arith.constant 3.200000e+01 : f32
    %44 = vector.broadcast %cst_26 : f32 to vector<16x1xf32>
    %45 = arith.divf %43, %44 : vector<16x1xf32>
    %46 = vector.broadcast %45 : vector<16x1xf32> to vector<16x32xf32>
    %47 = arith.subf %39, %46 : vector<16x32xf32>
    %48 = arith.mulf %47, %47 : vector<16x32xf32>
    %cst_27 = arith.constant dense<0.000000e+00> : vector<16xf32>
    %49 = vector.multi_reduction <add>, %48, %cst_27 [1] : vector<16x32xf32> to vector<16xf32>
    %50 = vector.shape_cast %49 : vector<16xf32> to vector<16x1xf32>
    %cst_28 = arith.constant 0.0322580636 : f32
    %51 = vector.broadcast %cst_28 : f32 to vector<16x1xf32>
    %52 = arith.mulf %50, %51 : vector<16x1xf32>
    %53 = math.sqrt %52 : vector<16x1xf32>
    %cst_29 = arith.constant 9.99999997E-7 : f32
    %54 = vector.broadcast %cst_29 : f32 to vector<16x1xf32>
    %55 = arith.addf %53, %54 : vector<16x1xf32>
    %cst_30 = arith.constant 1.000000e+00 : f32
    %56 = vector.broadcast %cst_30 : f32 to vector<16x1xf32>
    %57 = arith.divf %56, %55 : vector<16x1xf32>
    %58 = vector.broadcast %57 : vector<16x1xf32> to vector<16x32xf32>
    %59 = arith.mulf %47, %58 : vector<16x32xf32>
    %60 = vector.broadcast %40 : vector<1x32xf32> to vector<16x32xf32>
    %61 = arith.mulf %60, %59 : vector<16x32xf32>
    %62 = vector.broadcast %41 : vector<1x32xf32> to vector<16x32xf32>
    %63 = arith.addf %61, %62 : vector<16x32xf32>
    %c0_31 = arith.constant 0 : index
    %c0_32 = arith.constant 0 : index
    %64 = vector.load %arg10[%c0_31, %c0_32] : memref<16x32xf32, #tpu.memory_space<vmem>>, vector<16x32xf32>
    tpu.vector_store %arg10[%c0_31, %c0_32], %63 {strides = array<i32>} : memref<16x32xf32, #tpu.memory_space<vmem>>, vector<16x32xf32>,
    return
  }
  func.func @transform_0(%arg0: i32) -> (i32, i32) {
    %c0_i32 = arith.constant 0 : i32
    %c0_i32_0 = arith.constant 0 : i32
    return %arg0, %c0_i32 : i32, i32
  }
  func.func @transform_1(%arg0: i32) -> (i32, i32) {
    %c0_i32 = arith.constant 0 : i32
    %c0_i32_0 = arith.constant 0 : i32
    %c0_i32_1 = arith.constant 0 : i32
    return %c0_i32, %c0_i32_0 : i32, i32
  }
  func.func @transform_2(%arg0: i32) -> (i32, i32) {
    %c0_i32 = arith.constant 0 : i32
    %c0_i32_0 = arith.constant 0 : i32
    %c0_i32_1 = arith.constant 0 : i32
    return %c0_i32, %c0_i32_0 : i32, i32
  }
  func.func @transform_3(%arg0: i32) -> (i32, i32) {
    %c0_i32 = arith.constant 0 : i32
    %c0_i32_0 = arith.constant 0 : i32
    %c0_i32_1 = arith.constant 0 : i32
    return %c0_i32, %c0_i32_0 : i32, i32
  }
  func.func @transform_4(%arg0: i32) -> (i32, i32) {
    %c0_i32 = arith.constant 0 : i32
    %c0_i32_0 = arith.constant 0 : i32
    %c0_i32_1 = arith.constant 0 : i32
    return %c0_i32, %c0_i32_0 : i32, i32
  }
  func.func @transform_5(%arg0: i32) -> (i32, i32) {
    %c0_i32 = arith.constant 0 : i32
    %c0_i32_0 = arith.constant 0 : i32
    %c0_i32_1 = arith.constant 0 : i32
    return %c0_i32, %c0_i32_0 : i32, i32
  }
  func.func @transform_6(%arg0: i32) -> (i32, i32) {
    %c0_i32 = arith.constant 0 : i32
    %c0_i32_0 = arith.constant 0 : i32
    %c0_i32_1 = arith.constant 0 : i32
    return %c0_i32, %c0_i32_0 : i32, i32
  }
  func.func @transform_7(%arg0: i32) -> (i32, i32) {
    %c0_i32 = arith.constant 0 : i32
    %c0_i32_0 = arith.constant 0 : i32
    %c0_i32_1 = arith.constant 0 : i32
    return %c0_i32, %c0_i32_0 : i32, i32
  }
  func.func @transform_8(%arg0: i32) -> (i32, i32) {
    %c0_i32 = arith.constant 0 : i32
    %c0_i32_0 = arith.constant 0 : i32
    %c0_i32_1 = arith.constant 0 : i32
    return %c0_i32, %c0_i32_0 : i32, i32
  }
  func.func @transform_9(%arg0: i32) -> (i32, i32) {
    %c0_i32 = arith.constant 0 : i32
    %c0_i32_0 = arith.constant 0 : i32
    return %arg0, %c0_i32 : i32, i32
  }
}

</mosaic_0001>

<bundles_post_ra>
// kernel: encoder_forward.5
= control target key start
LH: loop header
LB: loop body
LE: loop exit
PB: predicated region body
PF: predicated region fallthrough
CT: control target
= control target key end

     0   :  { %vm31_vm0 = vcmask 261120   ;;  %v310_v14 = vmov 0.0   ;;  %vm311_vm1 = vmmov 0   ;;  %vm201_vm6 = vcmask 523264   ;;  %s411_s0 = inlined_call_operand.vmem [shape: f32[16,32], index: 0, kind: input, shape index: {}]   ;;  %s412_s3 = inlined_call_operand.vmem [shape: bf16[32,64], index: 3, kind: input, shape index: {}]   ;;  %s413_s5 = inlined_call_operand.vmem [shape: bf16[64,32], index: 5, kind: input, shape index: {}]   ;;  %s414_s1 = inlined_call_operand.vmem [shape: f32[1,32], index: 1, kind: input, shape index: {}]   ;;  %s415_s2 = inlined_call_operand.vmem [shape: f32[1,32], index: 2, kind: input, shape index: {}]   ;;  %s416_s4 = inlined_call_operand.vmem [shape: f32[1,64], index: 4, kind: input, shape index: {}]   ;;  %s417_s6 = inlined_call_operand.vmem [shape: f32[1,32], index: 6, kind: input, shape index: {}]   ;;  %s418_s7 = inlined_call_operand.vmem [shape: f32[16,32], index: 7, kind: output, shape index: {}]  }
   0x1   :  { %v355_v0 = vld [vmem:[%s411_s0] sm:$0xff]  ;;  %v360_v1 = vld [vmem:[%s411_s0 + $0x8] sm:$0xff]  ;;  %274 = vmatprep.subr.bf16.mxu0 %v310_v14  ;;  %278 = vmatprep.mubr.msk.bf16.mxu0 %vm311_vm1, %v310_v14  ;;  %v300_v46 = vld [vmem:[%s413_s5 + $0x10] sm:$0xff]  }
   0x2   :  { %v32_v2 = vsel %vm31_vm0, %v355_v0, 0.0  ;;  %v35_v3 = vsel %vm31_vm0, %v360_v1, 0.0  ;;  %v296_v15 = vld [vmem:[%s412_s3] sm:$0xff]   ;;  %282 = vmatprep.subr.bf16.mxu1 %v310_v14  ;;  %290 = vmatprep.mubr.msk.bf16.mxu1 %vm311_vm1, %v310_v14  ;;  %v297_v16 = vld [vmem:[%s412_s3 + $0x8] sm:$0xff]   ;;  %v301_v47 = vld [vmem:[%s413_s5 + $0x18] sm:$0xff]  }
   0x3   :  { %33 = vadd.xlane.f32.xlu0 %v32_v2  ;;  %275 = vmatpush3.bf16.msra.mxu0 %v296_v15  ;;  %v298_v17 = vld [vmem:[%s413_s5] sm:$0xff]   ;;  %v299_v18 = vld [vmem:[%s413_s5 + $0x8] sm:$0xff]  }
   0x4   :  { %276 = vmatprep.subr.bf16.mxu0 %v310_v14  ;;  %283 = vmatpush3.bf16.msra.mxu1 %v298_v17  ;;  %v254_v37 = vld [vmem:[%s414_s1] ss:$0 sm:$0xff] }
   0x5   :  { %284 = vmatprep.subr.bf16.mxu1 %v310_v14  ;;  %v255_v41 = vld [vmem:[%s415_s2] ss:$0 sm:$0xff] }
   0x6   :  { %v256_v48 = vld [vmem:[%s416_s4] ss:$0 sm:$0xff] }
   0x7   :  { %36 = vadd.xlane.f32.xlu0 %v35_v3  ;;  %277 = vmatpush3.bf16.msra.mxu0 %v297_v16  ;;  %v260_v58 = vld [vmem:[%s417_s6] ss:$0 sm:$0xff] }
   0x8   :  { %285 = vmatpush3.bf16.msra.mxu1 %v299_v18 }
   0x9   :  { %286 = vmatprep.subr.bf16.mxu1 %v310_v14 }
   0xc   :  { %287 = vmatpush3.bf16.msra.mxu1 %v300_v46 }
   0xd   :  { %288 = vmatprep.subr.bf16.mxu1 %v310_v14 }
  0x10   :  { %289 = vmatpush3.bf16.msra.mxu1 %v301_v47 }
  0x90   :  { %v34_v4 = vpop.xlane.xlu0 %33 }
  0x91   :  { %v39_v5 = vmul.f32 0.03125, %v34_v4 }
  0x93   :  { %v41_v6 = vsub.f32 %v355_v0, %v39_v5 }
  0x94   :  { %v37_v7 = vpop.xlane.xlu0 %36 }
  0x95   :  { %v40_v8 = vmul.f32 0.03125, %v37_v7  ;;  %v43_v9 = vmul.f32 %v41_v6, %v41_v6 }
  0x97   :  { %v42_v10 = vsub.f32 %v360_v1, %v40_v8  ;;  %v45_v11 = vsel %vm31_vm0, %v43_v9, 0.0 }
  0x98   :  { %46 = vadd.xlane.f32.xlu1 %v45_v11 }
  0x99   :  { %v44_v12 = vmul.f32 %v42_v10, %v42_v10 }
  0x9b   :  { %v48_v13 = vsel %vm31_vm0, %v44_v12, 0.0 }
  0x9c   :  { %49 = vadd.xlane.f32.xlu1 %v48_v13 }
 0x125   :  { %v47_v19 = vpop.xlane.xlu1 %46 }
 0x126   :  { %v51_v20 = vmul.f32 0.032258064, %v47_v19 }
 0x128   :  { %302 = vrsqrt.f32 %v51_v20  ;;  %vm55_vm2 = vcmp.eq.f32.partialorder %v51_v20, inf  ;;  %v58_v25 = vand.u32 2147483648, %v51_v20  ;;  %vm57_vm3 = vcmp.eq.f32.partialorder %v51_v20, 0.0 }
 0x129   :  { %v50_v21 = vpop.xlane.xlu1 %49 }
 0x12a   :  { %v52_v22 = vmul.f32 0.032258064, %v50_v21 }
 0x12c   :  { %304 = vrsqrt.f32 %v52_v22  ;;  %vm62_vm4 = vcmp.eq.f32.partialorder %v52_v22, inf  ;;  %v65_v31 = vand.u32 2147483648, %v52_v22  ;;  %vm64_vm5 = vcmp.eq.f32.partialorder %v52_v22, 0.0 }
 0x132   :  { %v303_v23 = vpop.eup %302 }
 0x133   :  { %v54_v24 = vmul.f32 %v303_v23, %v51_v20 }
 0x135   :  { %v56_v26 = vsel %vm55_vm2, %v51_v20, %v54_v24 }
 0x136   :  { %v305_v27 = vpop.eup %304  ;;  %v59_v28 = vsel %vm57_vm3, %v58_v25, %v56_v26 }
 0x137   :  { %v67_v29 = vadd.f32 1e-06, %v59_v28  ;;  %v61_v30 = vmul.f32 %v305_v27, %v52_v22 }
 0x139   :  { %306 = vrcp.f32 %v67_v29  ;;  %v63_v32 = vsel %vm62_vm4, %v52_v22, %v61_v30 }
 0x13a   :  { %v66_v33 = vsel %vm64_vm5, %v65_v31, %v63_v32 }
 0x13b   :  { %v68_v34 = vadd.f32 1e-06, %v66_v33 }
 0x13d   :  { %308 = vrcp.f32 %v68_v34 }
 0x143   :  { %v307_v35 = vpop.eup %306 }
 0x144   :  { %v73_v36 = vmul.f32 %v307_v35, %v41_v6 }
 0x146   :  { %v81_v40 = vmul.f32 %v254_v37, %v73_v36 }
 0x147   :  { %v309_v38 = vpop.eup %308 }
 0x148   :  { %v74_v39 = vmul.f32 %v309_v38, %v42_v10  ;;  %v89_v43 = vadd.f32 %v255_v41, %v81_v40 }
 0x14a   :  { %v82_v42 = vmul.f32 %v254_v37, %v74_v39 }
 0x14c   :  { %v90_v44 = vadd.f32 %v255_v41, %v82_v42 }
 0x14e   :  { %v91_v45 = vpack.c.bf16 %v90_v44, %v89_v43 }
 0x150   :  { %279 = vmatmul.mubr.msk.bf16.vlgmr.msra.gmra.mrb[0].mxu0 %vm31_vm0, %v91_v45 }
 0x223   :  { %v152_v49 = vpop.f32.mrb[0].mxu0 }
 0x224   :  { %v153_v50 = vadd.f32 %v256_v48, %v152_v49  ;;  %v280_v51 = vpop.f32.mrb[1].mxu0 }
 0x225   :  { %v155_v52 = vpop.f32.mrb[2].mxu0 }
 0x226   :  { %v156_v53 = vadd.f32 %v256_v48, %v155_v52  ;;  %v281_v54 = vpop.f32.mrb[3].mxu0  ;;  %v159_v55 = vmax.f32 %v153_v50, 0.0 }
 0x228   :  { %v160_v56 = vmax.f32 %v156_v53, 0.0 }
 0x22a   :  { %v161_v57 = vpack.c.bf16 %v160_v56, %v159_v55 }
 0x22c   :  { %291 = vmatmul.mubr.msk.bf16.vlgmr.msra.gmra.mrb[0].mxu1 %vm201_vm6, %v161_v57 }
 0x2ff   :  { %v239_v59 = vpop.f32.mrb[0].mxu1 }
 0x300   :  { %v240_v60 = vadd.f32 %v260_v58, %v239_v59  ;;  %v292_v61 = vpop.f32.mrb[1].mxu1 }
 0x301   :  { %v242_v62 = vpop.f32.mrb[2].mxu1 }
 0x302   :  { %v246_v63 = vadd.f32 %v240_v60, %v355_v0  ;;  %v243_v2 = vadd.f32 %v260_v58, %v242_v62  ;;  %v293_v3 = vpop.f32.mrb[3].mxu1 }
 0x304   :  { %248 = vst.msk [vmem:[%s418_s7] sm:$0xff] %vm31_vm0, %v246_v63  ;;  %v247_v4 = vadd.f32 %v243_v2, %v360_v1 }
 0x306   :  { %249 = vst.msk [vmem:[%s418_s7 + $0x8] sm:$0xff] %vm31_vm0, %v247_v4 }

// kernel: encoder_forward.7
= control target key start
LH: loop header
LB: loop body
LE: loop exit
PB: predicated region body
PF: predicated region fallthrough
CT: control target
= control target key end

     0   :  { %vm38_vm0 = vcmask 261120   ;;  %s556_s0 = inlined_call_operand.vmem [shape: f32[16,32], index: 0, kind: input, shape index: {}]   ;;  %s557_s1 = inlined_call_operand.vmem [shape: f32[1,32], index: 1, kind: input, shape index: {}]   ;;  %s558_s2 = inlined_call_operand.vmem [shape: f32[1,32], index: 2, kind: input, shape index: {}]   ;;  %s559_s3 = inlined_call_operand.vmem [shape: bf16[32,64], index: 3, kind: input, shape index: {}]   ;;  %s560_s4 = inlined_call_operand.vmem [shape: f32[1,64], index: 4, kind: input, shape index: {}]   ;;  %s561_s5 = inlined_call_operand.vmem [shape: bf16[64,32], index: 5, kind: input, shape index: {}]   ;;  %s562_s6 = inlined_call_operand.vmem [shape: f32[1,32], index: 6, kind: input, shape index: {}]   ;;  %s563_s7 = inlined_call_operand.vmem [shape: f32[1,32], index: 7, kind: input, shape index: {}]   ;;  %s564_s8 = inlined_call_operand.vmem [shape: f32[1,32], index: 8, kind: input, shape index: {}]   ;;  %s565_s9 = inlined_call_operand.hbm [shape: f32[16,32], index: 9, kind: output, shape index: {}]  }
   0x1   :  { %v484_v0 = vld [vmem:[%s556_s0] sm:$0xff]  ;;  %v489_v1 = vld [vmem:[%s556_s0 + $0x8] sm:$0xff] }
   0x2   :  { %v39_v2 = vsel %vm38_vm0, %v484_v0, 0.0  ;;  %v42_v3 = vsel %vm38_vm0, %v489_v1, 0.0 }
   0x3   :  { %40 = vadd.xlane.f32.xlu0 %v39_v2 }
   0x4   :  { %14 = vsyncpa [#allocation3], 0  ;;  %v380_v14 = vld [vmem:[%s559_s3] sm:$0xff]   ;;  %v426_v15 = vmov 0.0   ;;  %vm427_vm1 = vmmov 0   ;;  %v381_v16 = vld [vmem:[%s559_s3 + $0x8] sm:$0xff]  }
   0x5   :  { %355 = vmatprep.subr.bf16.mxu0 %v426_v15  ;;  %359 = vmatprep.mubr.msk.bf16.mxu0 %vm427_vm1, %v426_v15  ;;  %v382_v17 = vld [vmem:[%s561_s5] sm:$0xff]   ;;  %v383_v18 = vld [vmem:[%s561_s5 + $0x8] sm:$0xff]   ;;  %v384_v46 = vld [vmem:[%s561_s5 + $0x10] sm:$0xff]   ;;  %vm208_vm6 = vcmask 523264   ;;  %s428_s30 = smov [#allocation2]  }
   0x6   :  { %356 = vmatpush3.bf16.msra.mxu0 %v380_v14  ;;  %363 = vmatprep.subr.bf16.mxu1 %v426_v15  ;;  %v333_v37 = vld [vmem:[%s557_s1] ss:$0 sm:$0xff]  ;;  %v385_v47 = vld [vmem:[%s561_s5 + $0x18] sm:$0xff]   ;;  %s322_s10 = sshll.u32 %s428_s30, 4  ;;  %s323_s10 = int_to_ptr.vmem [resolvable:$true] %s322_s10 }
   0x7   :  { %43 = vadd.xlane.f32.xlu0 %v42_v3  ;;  %357 = vmatprep.subr.bf16.mxu0 %v426_v15  ;;  %v334_v41 = vld [vmem:[%s558_s2] ss:$0 sm:$0xff]  ;;  %s402_s11 = scalar_lea.vmem %s323_s10, 256  ;;  %p407_p1 = scmp.lt.s32.totalorder %s323_s10, %s323_s10 }
   0x8   :  { %371 = vmatprep.mubr.msk.bf16.mxu1 %vm427_vm1, %v426_v15  ;;  %364 = vmatpush3.bf16.msra.mxu1 %v382_v17  ;;  %v335_v48 = vld [vmem:[%s560_s4] ss:$0 sm:$0xff]  ;;  %p403_p0 = scmp.ne.s32.totalorder %s323_s10, %s402_s11  ;;  %p408_p2 = scmp.lt.s32.totalorder %s402_s11, %s402_s11 }
   0x9   :  { %365 = vmatprep.subr.bf16.mxu1 %v426_v15  ;;  %v339_v58 = vld [vmem:[%s562_s6] ss:$0 sm:$0xff] }
   0xa   :  { %358 = vmatpush3.bf16.msra.mxu0 %v381_v16  ;;  %p409_p3 = por %p408_p2, %p407_p1 }
   0xc   :  { %366 = vmatpush3.bf16.msra.mxu1 %v383_v18  ;;  %p410_p4 = pnand %p409_p3, %p403_p0 }
   0xd   :  { %367 = vmatprep.subr.bf16.mxu1 %v426_v15 }
  0x10   :  { %368 = vmatpush3.bf16.msra.mxu1 %v384_v46 }
  0x11   :  { %369 = vmatprep.subr.bf16.mxu1 %v426_v15 }
  0x14   :  { %370 = vmatpush3.bf16.msra.mxu1 %v385_v47 }
  0x90   :  { %v41_v4 = vpop.xlane.xlu0 %40 }
  0x91   :  { %v46_v5 = vmul.f32 0.03125, %v41_v4 }
  0x93   :  { %v48_v6 = vsub.f32 %v484_v0, %v46_v5 }
  0x94   :  { %v44_v7 = vpop.xlane.xlu0 %43 }
  0x95   :  { %v47_v8 = vmul.f32 0.03125, %v44_v7  ;;  %v50_v9 = vmul.f32 %v48_v6, %v48_v6 }
  0x97   :  { %v49_v10 = vsub.f32 %v489_v1, %v47_v8  ;;  %v52_v11 = vsel %vm38_vm0, %v50_v9, 0.0 }
  0x98   :  { %53 = vadd.xlane.f32.xlu1 %v52_v11 }
  0x99   :  { %v51_v12 = vmul.f32 %v49_v10, %v49_v10 }
  0x9b   :  { %v55_v13 = vsel %vm38_vm0, %v51_v12, 0.0 }
  0x9c   :  { %56 = vadd.xlane.f32.xlu1 %v55_v13 }
 0x125   :  { %v54_v19 = vpop.xlane.xlu1 %53 }
 0x126   :  { %v58_v20 = vmul.f32 0.032258064, %v54_v19 }
 0x128   :  { %386 = vrsqrt.f32 %v58_v20  ;;  %vm62_vm2 = vcmp.eq.f32.partialorder %v58_v20, inf  ;;  %v65_v25 = vand.u32 2147483648, %v58_v20  ;;  %vm64_vm3 = vcmp.eq.f32.partialorder %v58_v20, 0.0 }
 0x129   :  { %v57_v21 = vpop.xlane.xlu1 %56 }
 0x12a   :  { %v59_v22 = vmul.f32 0.032258064, %v57_v21 }
 0x12c   :  { %388 = vrsqrt.f32 %v59_v22  ;;  %vm69_vm4 = vcmp.eq.f32.partialorder %v59_v22, inf  ;;  %v72_v31 = vand.u32 2147483648, %v59_v22  ;;  %vm71_vm5 = vcmp.eq.f32.partialorder %v59_v22, 0.0 }
 0x132   :  { %v387_v23 = vpop.eup %386 }
 0x133   :  { %v61_v24 = vmul.f32 %v387_v23, %v58_v20 }
 0x135   :  { %v63_v26 = vsel %vm62_vm2, %v58_v20, %v61_v24 }
 0x136   :  { %v389_v27 = vpop.eup %388  ;;  %v66_v28 = vsel %vm64_vm3, %v65_v25, %v63_v26 }
 0x137   :  { %v74_v29 = vadd.f32 1e-06, %v66_v28  ;;  %v68_v30 = vmul.f32 %v389_v27, %v59_v22 }
 0x139   :  { %390 = vrcp.f32 %v74_v29  ;;  %v70_v32 = vsel %vm69_vm4, %v59_v22, %v68_v30 }
 0x13a   :  { %v73_v33 = vsel %vm71_vm5, %v72_v31, %v70_v32  ;;  %v345_v32 = vld [vmem:[%s563_s7] ss:$0 sm:$0xff] }
 0x13b   :  { %v75_v34 = vadd.f32 1e-06, %v73_v33 }
 0x13d   :  { %392 = vrcp.f32 %v75_v34  ;;  %v346_v34 = vld [vmem:[%s564_s8] ss:$0 sm:$0xff] }
 0x143   :  { %v391_v35 = vpop.eup %390 }
 0x144   :  { %v80_v36 = vmul.f32 %v391_v35, %v48_v6 }
 0x146   :  { %v88_v40 = vmul.f32 %v333_v37, %v80_v36 }
 0x147   :  { %v393_v38 = vpop.eup %392 }
 0x148   :  { %v81_v39 = vmul.f32 %v393_v38, %v49_v10  ;;  %v96_v43 = vadd.f32 %v334_v41, %v88_v40 }
 0x14a   :  { %v89_v42 = vmul.f32 %v333_v37, %v81_v39 }
 0x14c   :  { %v97_v44 = vadd.f32 %v334_v41, %v89_v42 }
 0x14e   :  { %v98_v45 = vpack.c.bf16 %v97_v44, %v96_v43 }
 0x150   :  { %360 = vmatmul.mubr.msk.bf16.vlgmr.msra.gmra.mrb[0].mxu0 %vm38_vm0, %v98_v45 }
 0x223   :  { %v159_v49 = vpop.f32.mrb[0].mxu0 }
 0x224   :  { %v160_v50 = vadd.f32 %v335_v48, %v159_v49  ;;  %v361_v51 = vpop.f32.mrb[1].mxu0 }
 0x225   :  { %v162_v52 = vpop.f32.mrb[2].mxu0 }
 0x226   :  { %v163_v53 = vadd.f32 %v335_v48, %v162_v52  ;;  %v362_v54 = vpop.f32.mrb[3].mxu0  ;;  %v166_v55 = vmax.f32 %v160_v50, 0.0 }
 0x228   :  { %v167_v56 = vmax.f32 %v163_v53, 0.0 }
 0x22a   :  { %v168_v57 = vpack.c.bf16 %v167_v56, %v166_v55 }
 0x22c   :  { %372 = vmatmul.mubr.msk.bf16.vlgmr.msra.gmra.mrb[0].mxu1 %vm208_vm6, %v168_v57 }
 0x2ff   :  { %v246_v59 = vpop.f32.mrb[0].mxu1 }
 0x300   :  { %v247_v60 = vadd.f32 %v339_v58, %v246_v59  ;;  %v373_v61 = vpop.f32.mrb[1].mxu1 }
 0x301   :  { %v249_v62 = vpop.f32.mrb[2].mxu1 }
 0x302   :  { %v250_v63 = vadd.f32 %v339_v58, %v249_v62  ;;  %v374_v2 = vpop.f32.mrb[3].mxu1  ;;  %v253_v3 = vadd.f32 %v247_v60, %v484_v0 }
 0x304   :  { %v257_v4 = vsel %vm38_vm0, %v253_v3, 0.0  ;;  %v254_v5 = vadd.f32 %v250_v63, %v489_v1 }
 0x305   :  { %258 = vadd.xlane.f32.xlu0 %v257_v4 }
 0x306   :  { %v260_v6 = vsel %vm38_vm0, %v254_v5, 0.0 }
 0x307   :  { %261 = vadd.xlane.f32.xlu1 %v260_v6 }
 0x392   :  { %v259_v7 = vpop.xlane.xlu0 %258 }
 0x393   :  { %v263_v8 = vmul.f32 0.03125, %v259_v7 }
 0x394   :  { %v262_v9 = vpop.xlane.xlu1 %261 }
 0x395   :  { %v265_v10 = vsub.f32 %v253_v3, %v263_v8  ;;  %v264_v11 = vmul.f32 0.03125, %v262_v9 }
 0x397   :  { %v266_v12 = vsub.f32 %v254_v5, %v264_v11  ;;  %v267_v13 = vmul.f32 %v265_v10, %v265_v10 }
 0x399   :  { %v269_v14 = vsel %vm38_vm0, %v267_v13, 0.0  ;;  %v268_v15 = vmul.f32 %v266_v12, %v266_v12 }
 0x39a   :  { %270 = vadd.xlane.f32.xlu0 %v269_v14 }
 0x39b   :  { %v272_v0 = vsel %vm38_vm0, %v268_v15, 0.0 }
 0x39c   :  { %273 = vadd.xlane.f32.xlu1 %v272_v0 }
 0x427   :  { %v271_v16 = vpop.xlane.xlu0 %270 }
 0x428   :  { %v275_v1 = vmul.f32 0.032258064, %v271_v16 }
 0x429   :  { %v274_v17 = vpop.xlane.xlu1 %273 }
 0x42a   :  { %394 = vrsqrt.f32 %v275_v1  ;;  %v276_v18 = vmul.f32 0.032258064, %v274_v17  ;;  %vm279_vm7 = vcmp.eq.f32.partialorder %v275_v1, inf  ;;  %v282_v21 = vand.u32 2147483648, %v275_v1 }
 0x42b   :  { %vm281_vm8 = vcmp.eq.f32.partialorder %v275_v1, 0.0 }
 0x42c   :  { %396 = vrsqrt.f32 %v276_v18  ;;  %vm286_vm9 = vcmp.eq.f32.partialorder %v276_v18, inf  ;;  %v289_v27 = vand.u32 2147483648, %v276_v18  ;;  %vm288_vm10 = vcmp.eq.f32.partialorder %v276_v18, 0.0 }
 0x434   :  { %v395_v19 = vpop.eup %394 }
 0x435   :  { %v278_v20 = vmul.f32 %v395_v19, %v275_v1 }
 0x436   :  { %v397_v22 = vpop.eup %396 }
 0x437   :  { %v280_v23 = vsel %vm279_vm7, %v275_v1, %v278_v20  ;;  %v285_v25 = vmul.f32 %v397_v22, %v276_v18 }
 0x438   :  { %v283_v24 = vsel %vm281_vm8, %v282_v21, %v280_v23 }
 0x439   :  { %v291_v26 = vadd.f32 1e-06, %v283_v24  ;;  %v287_v28 = vsel %vm286_vm9, %v276_v18, %v285_v25 }
 0x43a   :  { %v290_v29 = vsel %vm288_vm10, %v289_v27, %v287_v28 }
 0x43b   :  { %398 = vrcp.f32 %v291_v26  ;;  %v292_v30 = vadd.f32 1e-06, %v290_v29 }
 0x43d   :  { %400 = vrcp.f32 %v292_v30 }
 0x445   :  { %v399_v31 = vpop.eup %398 }
 0x446   :  { %v297_v33 = vmul.f32 %v399_v31, %v265_v10 }
 0x447   :  { %v401_v35 = vpop.eup %400 }
 0x448   :  { %v305_v36 = vmul.f32 %v345_v32, %v297_v33  ;;  %v298_v37 = vmul.f32 %v401_v35, %v266_v12 }
 0x44a   :  { %v313_v38 = vadd.f32 %v346_v34, %v305_v36  ;;  %v306_v39 = vmul.f32 %v345_v32, %v298_v37 }
 0x44c   :  { %315 = vst.msk [vmem:[#allocation2] sm:$0xff] %vm38_vm0, %v313_v38  ;;  %v314_v40 = vadd.f32 %v346_v34, %v306_v39 }
 0x44e   :  { %316 = vst.msk [vmem:[#allocation2 + $0x8] sm:$0xff] %vm38_vm0, %v314_v40 }
 0x44f   :  { %413 = shalt.err (!%p410_p4)
}
 0x450   :  { %s414_s12 = scalar_lea.hbm %s565_s9, 256 }
 0x451   :  { %p415_p5 = scmp.ne.s32.totalorder %s565_s9, %s414_s12  ;;  %p418_p6 = scmp.lt.u32.totalorder %s414_s12, %s565_s9 }
 0x453   :  { %p420_p7 = pnand %p418_p6, %p415_p5 }
 0x455   :  { %423 = shalt.err (!%p420_p7)
}
 0x456   :  { %s429_s16 = smov 128   ;;  %s430_s17 = smov 8  }
 0x457   :  { %328 = dma.vmem_to_hbm [thread:$0]  %s323_s10, 256, %s565_s9, [#allocation3], %s429_s16, %s429_s16, %s430_s17  }
 0x458   :  { %424 = dma.done.wait [#allocation3], 256  }
 0x459   :  { %425 = vsyncadd [#allocation3], 4294967040 }
 0x45a   :  { %332 = vsyncpa [#allocation3], 1 }

// kernel: encoder_forward.4
= control target key start
LH: loop header
LB: loop body
LE: loop exit
PB: predicated region body
PF: predicated region fallthrough
CT: control target
= control target key end

     0   :  { %s1605_s27 = smov 0   ;;  %s1607_s28 = smov 0   ;;  %s1795_s0 = inlined_call_operand.vmem [shape: f32[2,8,32], index: 0, kind: input, shape index: {}, may-alias: {0,1}]   ;;  %s1796_s1 = inlined_call_operand.vmem [shape: f32[2,8,32], index: 1, kind: input, shape index: {}, may-alias: {0,1}]   ;;  %s1797_s2 = inlined_call_operand.vmem [shape: f32[2,1,8], index: 2, kind: input, shape index: {}]   ;;  %s1798_s3 = inlined_call_operand.vmem [shape: f32[1,32], index: 3, kind: input, shape index: {}]   ;;  %s1799_s4 = inlined_call_operand.vmem [shape: f32[1,32], index: 4, kind: input, shape index: {}]   ;;  %s1800_s5 = inlined_call_operand.vmem [shape: bf16[32,32], index: 5, kind: input, shape index: {}]   ;;  %s1801_s6 = inlined_call_operand.vmem [shape: bf16[32,64], index: 6, kind: input, shape index: {}]   ;;  %s1802_s7 = inlined_call_operand.vmem [shape: bf16[32,32], index: 7, kind: input, shape index: {}]   ;;  %s1803_s8 = inlined_call_operand.vmem [shape: f32[2,8,32], index: 8, kind: output, shape index: {}]  }
   0x1   :  { %s1609_s29 = smov 0  }
   0x2 LB: > { %s30_s30 = sadd.s32 1, %s1545_s28  ;;  %p1317_p0 = scmp.ge.s32.totalorder %s1549_s29, 1  ;;  %s1549_s29 = sphi %s1609_s29, %s18_s29   ;;  %s1545_s28 = sphi %s1607_s28, %s1805_s28   ;;  %s1541_s27 = sphi %s1605_s27, %s1804_s27  }
   0x3   : > { %p32_p1 = scmp.ge.s32.totalorder %s30_s30, 2  ;;  %p297_p2 = scmp.lt.s32.totalorder %s1549_s29, 3 }
   0x5   : > { %s1807_s30 = smov (%p32_p1, %s30_s30), 0  ;;  %p298_p3 = pnand %p1317_p0, %p297_p2 }
   0x6   : > { %p342_p4 = scmp.lt.s32.totalorder (!%p298_p3), %s1541_s27, 1  ;;  %vm371_vm0 = vcmask (!%p298_p3), 261120   ;;  %v1498_v14 = vld [vmem:[%s1801_s6] sm:$0xff] (!%p298_p3)   ;;  %v1551_v16 = vmov (!%p298_p3), 0.0   ;;  %v1499_v17 = vld [vmem:[%s1801_s6 + $0x8] sm:$0xff] (!%p298_p3)   ;;  %vm1552_vm1 = vmmov (!%p298_p3), 0  }
   0x7   : > { %301 = sbr.rel (%p298_p3) target bundleno = 2946 (0xb82), region = 52  ;;  %v1500_v15 = vld [vmem:[%s1800_s5] sm:$0xff] (!%p298_p3)   ;;  %1377 = vmatprep.subr.bf16.mxu0 (!%p298_p3), %v1551_v16  ;;  %1385 = vmatprep.subr.bf16.mxu1 (!%p298_p3), %v1551_v16  ;;  %v1501_v18 = vld [vmem:[%s1800_s5 + $0x8] sm:$0xff] (!%p298_p3)   ;;  %vm469_vm6 = vcmask (!%p298_p3), 519168   ;;  %s1553_s11 = smov (!%p298_p3), 120   ;;  %vm580_vm7 = vcmask (!%p298_p3), 64512  }
   0x8   : > { %1378 = vmatpush3.bf16.msra.mxu0 (!%p298_p3), %v1498_v14  ;;  %1386 = vmatpush3.bf16.msra.mxu1 (!%p298_p3), %v1500_v15  ;;  %v1321_v36 = vld [vmem:[%s1798_s3] ss:$0 sm:$0xff] (!%p298_p3)  ;;  %s1556_s16 = smov (!%p298_p3), 112   ;;  %vm647_vm8 = vcmask (!%p298_p3), 1043456   ;;  %s1557_s21 = smov (!%p298_p3), 80  }
   0x9   : > { %1379 = vmatprep.subr.bf16.mxu0 (!%p298_p3), %v1551_v16  ;;  %1381 = vmatprep.mubr.msk.bf16.mxu0 (!%p298_p3), %vm1552_vm1, %v1551_v16  ;;  %v1322_v38 = vld [vmem:[%s1799_s4] ss:$0 sm:$0xff] (!%p298_p3)  ;;  %s1558_s22 = smov (!%p298_p3), 104   ;;  %s1559_s25 = smov (!%p298_p3), 72  }
   0xa   : > { %1387 = vmatprep.subr.bf16.mxu1 (!%p298_p3), %v1551_v16  ;;  %1389 = vmatprep.mubr.msk.bf16.mxu1 (!%p298_p3), %vm1552_vm1, %v1551_v16 }
   0xc   : > { %1380 = vmatpush3.bf16.msra.mxu0 (!%p298_p3), %v1499_v17  ;;  %1388 = vmatpush3.bf16.msra.mxu1 (!%p298_p3), %v1501_v18 }
   0xd   : > { %1393 = vmatprep.subr.bf16.mxu0 (!%p298_p3), %v1551_v16  ;;  %1399 = vmatprep.subr.bf16.mxu1 (!%p298_p3), %v1551_v16 }
   0xe   : > { %s1809_s27 = smov (!%p342_p4, %s1541_s27), 1 }
   0xf   : > { %s1626_s9 = sshll.u32 %s1809_s27, 3  ;;  %s355_s14 = scalar_lea.vmem %s1797_s2, %s1809_s27 }
  0x10   : > { %s345_s12 = scalar_lea.vmem %s1795_s0, %s1626_s9  ;;  %s352_s15 = scalar_lea.vmem %s1796_s1, %s1626_s9  ;;  %v1699_v63 = vld [vmem:[%s355_s14] ss:$0 sm:$0xff] }
  0x11   : > { %v368_v0 = vld [vmem:[%s345_s12] sm:$0xff]  ;;  %s1554_s27 = smov 96   ;;  %s362_s13 = scalar_lea.vmem %s1803_s8, %s1626_s9 }
  0x12   : > { %v372_v1 = vsel %vm371_vm0, %v368_v0, 0.0  ;;  %v1637_v2 = vld [vmem:[%s352_s15] sm:$0xff]  ;;  %s1555_s15 = smov 88  }
  0x13   : > { %373 = vadd.xlane.f32.xlu0 %v372_v1  ;;  %v475_v3 = vsel %vm371_vm0, %v1637_v2, 0.0 }
  0x17   : > { %476 = vadd.xlane.f32.xlu0 %v475_v3 }
  0xa0   : > { %v374_v4 = vpop.xlane.xlu0 %373 }
  0xa1   : > { %v376_v5 = vmul.f32 0.03125, %v374_v4 }
  0xa3   : > { %v377_v6 = vsub.f32 %v368_v0, %v376_v5 }
  0xa4   : > { %v477_v7 = vpop.xlane.xlu0 %476 }
  0xa5   : > { %v479_v8 = vmul.f32 0.03125, %v477_v7  ;;  %v378_v9 = vmul.f32 %v377_v6, %v377_v6 }
  0xa7   : > { %v480_v10 = vsub.f32 %v1637_v2, %v479_v8  ;;  %v379_v11 = vsel %vm371_vm0, %v378_v9, 0.0 }
  0xa8   : > { %380 = vadd.xlane.f32.xlu1 %v379_v11 }
  0xa9   : > { %v481_v12 = vmul.f32 %v480_v10, %v480_v10 }
  0xab   : > { %v482_v13 = vsel %vm371_vm0, %v481_v12, 0.0 }
  0xac   : > { %483 = vadd.xlane.f32.xlu1 %v482_v13 }
 0x135   : > { %v381_v19 = vpop.xlane.xlu1 %380 }
 0x136   : > { %v382_v20 = vmul.f32 0.032258064, %v381_v19 }
 0x138   : > { %1503 = vrsqrt.f32 %v382_v20  ;;  %vm385_vm2 = vcmp.eq.f32.partialorder %v382_v20, inf  ;;  %v388_v25 = vand.u32 2147483648, %v382_v20  ;;  %vm387_vm3 = vcmp.eq.f32.partialorder %v382_v20, 0.0 }
 0x139   : > { %v484_v21 = vpop.xlane.xlu1 %483 }
 0x13a   : > { %v485_v22 = vmul.f32 0.032258064, %v484_v21 }
 0x13c   : > { %1505 = vrsqrt.f32 %v485_v22  ;;  %vm488_vm4 = vcmp.eq.f32.partialorder %v485_v22, inf  ;;  %v491_v29 = vand.u32 2147483648, %v485_v22  ;;  %vm490_vm5 = vcmp.eq.f32.partialorder %v485_v22, 0.0 }
 0x142   : > { %v1504_v23 = vpop.eup %1503 }
 0x143   : > { %v384_v24 = vmul.f32 %v1504_v23, %v382_v20 }
 0x145   : > { %v386_v26 = vsel %vm385_vm2, %v382_v20, %v384_v24 }
 0x146   : > { %v1506_v27 = vpop.eup %1505  ;;  %v389_v28 = vsel %vm387_vm3, %v388_v25, %v386_v26 }
 0x147   : > { %v390_v30 = vadd.f32 1e-06, %v389_v28  ;;  %v487_v31 = vmul.f32 %v1506_v27, %v485_v22 }
 0x149   : > { %1507 = vrcp.f32 %v390_v30  ;;  %v489_v32 = vsel %vm488_vm4, %v485_v22, %v487_v31  ;;  %v805_v30 = vld [vmem:[%s1802_s7 + $0x4] sm:$0xf] }
 0x14a   : > { %v492_v33 = vsel %vm490_vm5, %v491_v29, %v489_v32  ;;  %v810_v31 = vsel %vm647_vm8, %v805_v30, 0 }
 0x14b   : > { %v493_v34 = vadd.f32 1e-06, %v492_v33 }
 0x14d   : > { %1509 = vrcp.f32 %v493_v34 }
 0x153   : > { %v1508_v35 = vpop.eup %1507 }
 0x154   : > { %v393_v37 = vmul.f32 %v1508_v35, %v377_v6 }
 0x156   : > { %v400_v39 = vmul.f32 %v1321_v36, %v393_v37 }
 0x157   : > { %v1510_v40 = vpop.eup %1509 }
 0x158   : > { %v407_v41 = vadd.f32 %v1322_v38, %v400_v39  ;;  %v496_v42 = vmul.f32 %v1510_v40, %v480_v10 }
 0x15a   : > { %v408_v43 = vpack.c.bf16 %v407_v41, %v407_v41  ;;  %v503_v44 = vmul.f32 %v1321_v36, %v496_v42  ;;  %v692_v36 = vld [vmem:[%s1802_s7] sm:$0xf] }
 0x15b   : > { %v856_v39 = vsel %vm647_vm8, %v692_v36, 0 }
 0x15c   : > { %1382 = vmatmul.mubr.msk.bf16.vlgmr.msra.gmra.mrb[0].mxu0 %vm371_vm0, %v408_v43  ;;  %v510_v45 = vadd.f32 %v1322_v38, %v503_v44 }
 0x15d   : > { %1395 = vmatprep.mubr.msk.bf16.mxu0 %vm1552_vm1, %v1551_v16 }
 0x15e   : > { %v511_v46 = vpack.c.bf16 %v510_v45, %v510_v45 }
 0x160   : > { %1390 = vmatmul.mubr.msk.bf16.vlgmr.msra.gmra.mrb[0].mxu1 %vm371_vm0, %v511_v46 }
 0x161   : > { %1401 = vmatprep.mubr.msk.bf16.mxu1 %vm1552_vm1, %v1551_v16 }
 0x22f   : > { %v462_v47 = vpop.f32.mrb[0].mxu0 }
 0x230   : > { %v468_v48 = vpack.c.bf16 %v462_v47, %v462_v47  ;;  %v1383_v49 = vpop.f32.mrb[1].mxu0 }
 0x231   : > { %v465_v50 = vpop.f32.mrb[2].mxu0 }
 0x232   : > { %470 = vst.msk [vmem:[#allocation2] sm:$0xf] %vm469_vm6, %v468_v48  ;;  %v1384_v51 = vpop.f32.mrb[3].mxu0 }
 0x233   : > { %v565_v52 = vpop.f32.mrb[0].mxu1 }
 0x234   : > { %v1678_v53 = vpack.c.bf16 %v565_v52, %v565_v52  ;;  %v1391_v54 = vpop.f32.mrb[1].mxu1 }
 0x235   : > { %v568_v55 = vpop.f32.mrb[2].mxu1 }
 0x236   : > { %694 = vrot.lane.b32.xlu1 %v1678_v53, %s1553_s11  ;;  %v1392_v56 = vpop.f32.mrb[3].mxu1 }
 0x239   : > { %v573_v57 = vld [vmem:[#allocation2] sm:$0xf] }
 0x23a   : > { %v585_v58 = vsel %vm580_vm7, %v573_v57, 0  ;;  %v1682_v59 = vcombine.low %v573_v57, %v573_v57 }
 0x23b   : > { %1394 = vmatpush3.bf16.xpose.msra.mxu0 %v585_v58 }
 0x23c   : > { %696 = vrot.lane.b32.xlu0 %v1682_v59, %s1553_s11  ;;  %1405 = vmatprep.subr.bf16.mxu0 %v1551_v16 }
 0x242   : > { %1396 = vmatmul.mubr.msk.bf16.vlgmr.msra.gmra.mrb[4].mxu0 %vm580_vm7, %v1678_v53 }
 0x243   : > { %1407 = vmatprep.mubr.msk.bf16.mxu0 %vm1552_vm1, %v1551_v16 }
 0x2a8   : > { %v695_v62 = vpop.permute.xlu1 %694 }
 0x2ae   : > { %v697_v60 = vpop.permute.xlu0 %696 }
 0x2af   : > { %v702_v61 = vsel %vm580_vm7, %v697_v60, 0 }
 0x2b0   : > { %1406 = vmatpush3.bf16.xpose.msra.mxu0 %v702_v61 }
 0x2b1   : > { %1417 = vmatprep.subr.bf16.mxu0 %v1551_v16 }
 0x2b7   : > { %1408 = vmatmul.mubr.msk.bf16.vlgmr.msra.gmra.mrb[8].mxu0 %vm580_vm7, %v695_v62 }
 0x2b8   : > { %1419 = vmatprep.mubr.msk.bf16.mxu0 %vm1552_vm1, %v1551_v16  ;;  %1418 = vmatpush3.bf16.msra.mxu0 %v810_v31 }
 0x2b9   : > { %1429 = vmatprep.subr.bf16.mxu0 %v1551_v16 }
 0x315   : > { %v621_v0 = vpop.f32.mrb[4].mxu0 }
 0x316   : > { %v622_v1 = vadd.f32 %v1699_v63, %v621_v0  ;;  %v1397_v3 = vpop.f32.mrb[5].mxu0 }
 0x317   : > { %v624_v4 = vpop.f32.mrb[6].mxu0 }
 0x318   : > { %v1398_v5 = vpop.f32.mrb[7].mxu0  ;;  %v627_v6 = vsel %vm580_vm7, %v622_v1, -inf }
 0x319   : > { %628 = vmax.xlane.f32.xlu1 %v627_v6 }
 0x38a   : > { %v738_v7 = vpop.f32.mrb[8].mxu0 }
 0x38b   : > { %v739_v8 = vadd.f32 %v1699_v63, %v738_v7  ;;  %v1409_v9 = vpop.f32.mrb[9].mxu0 }
 0x38c   : > { %v741_v10 = vpop.f32.mrb[10].mxu0 }
 0x38d   : > { %v1410_v11 = vpop.f32.mrb[11].mxu0  ;;  %v744_v12 = vsel %vm580_vm7, %v739_v8, -inf }
 0x38e   : > { %745 = vmax.xlane.f32.xlu0 %v744_v12 }
 0x3a6   : > { %v629_v13 = vpop.xlane.xlu1 %628 }
 0x3a7   : > { %v630_v14 = vsub.f32 %v622_v1, %v629_v13 }
 0x3a9   : > { %v631_v15 = vmul.f32 1.442695, %v630_v14 }
 0x3ab   : > { %1511 = vpow2.f32 %v631_v15 }
 0x3b5   : > { %v1512_v17 = vpop.eup %1511 }
 0x3b6   : > { %v633_v18 = vsel %vm580_vm7, %v1512_v17, 0.0 }
 0x3b7   : > { %634 = vadd.xlane.f32.xlu0 %v633_v18 }
 0x3cd   : > { %642 = vrot.lane.b32.xlu0 %v1682_v59, %s1554_s27 }
 0x41b   : > { %v746_v19 = vpop.xlane.xlu0 %745 }
 0x41c   : > { %v747_v20 = vsub.f32 %v739_v8, %v746_v19 }
 0x41e   : > { %v748_v21 = vmul.f32 1.442695, %v747_v20 }
 0x420   : > { %1513 = vpow2.f32 %v748_v21 }
 0x42a   : > { %v1514_v22 = vpop.eup %1513 }
 0x42b   : > { %v750_v23 = vsel %vm580_vm7, %v1514_v22, 0.0 }
 0x42c   : > { %751 = vadd.xlane.f32.xlu1 %v750_v23 }
 0x43d   : > { %756 = vrot.lane.b32.xlu1 %v1682_v59, %s1555_s15 }
 0x441   : > { %900 = vrot.lane.b32.xlu1 %v1682_v59, %s1556_s16 }
 0x444   : > { %v635_v24 = vpop.xlane.xlu0 %634 }
 0x445   : > { %1515 = vrcp.f32 %v635_v24  ;;  %898 = vrot.lane.b32.xlu1 %v1678_v53, %s1556_s16 }
 0x448   : > { %v643_v25 = vpop.permute.xlu0 %642 }
 0x449   : > { %v649_v26 = vsel %vm647_vm8, %v643_v25, 0 }
 0x44a   : > { %1400 = vmatpush3.bf16.msra.mxu1 %v649_v26 }
 0x44b   : > { %1411 = vmatprep.subr.bf16.mxu1 %v1551_v16 }
 0x44f   : > { %v1516_v27 = vpop.eup %1515 }
 0x450   : > { %v637_v28 = vmul.f32 %v1516_v27, %v1512_v17 }
 0x452   : > { %v638_v29 = vpack.c.bf16 %v637_v28, %v637_v28 }
 0x454   : > { %1402 = vmatmul.mubr.msk.bf16.vlgmr.msra.gmra.mrb[4].mxu1 %vm580_vm7, %v638_v29 }
 0x455   : > { %1413 = vmatprep.mubr.msk.bf16.mxu1 %vm1552_vm1, %v1551_v16 }
 0x4b9   : > { %v752_v32 = vpop.xlane.xlu1 %751 }
 0x4ba   : > { %1517 = vrcp.f32 %v752_v32 }
 0x4bd   : > { %v757_v33 = vpop.permute.xlu1 %756 }
 0x4be   : > { %v762_v34 = vsel %vm647_vm8, %v757_v33, 0 }
 0x4bf   : > { %1412 = vmatpush3.bf16.msra.mxu1 %v762_v34 }
 0x4c0   : > { %1423 = vmatprep.subr.bf16.mxu1 %v1551_v16 }
 0x4c1   : > { %v901_v45 = vpop.permute.xlu1 %900 }
 0x4c2   : > { %v906_v50 = vsel %vm580_vm7, %v901_v45, 0 }
 0x4c4   : > { %v1518_v35 = vpop.eup %1517 }
 0x4c5   : > { %v754_v37 = vmul.f32 %v1518_v35, %v1514_v22  ;;  %v899_v52 = vpop.permute.xlu1 %898  ;;  %v1009_v22 = vld [vmem:[%s1802_s7 + $0x8] sm:$0xf] }
 0x4c6   : > { %v1014_v23 = vsel %vm647_vm8, %v1009_v22, 0 }
 0x4c7   : > { %v755_v38 = vpack.c.bf16 %v754_v37, %v754_v37 }
 0x4c9   : > { %1414 = vmatmul.mubr.msk.bf16.vlgmr.msra.gmra.mrb[8].mxu1 %vm580_vm7, %v755_v38 }
 0x4ca   : > { %1424 = vmatpush3.bf16.msra.mxu1 %v856_v39  ;;  %1425 = vmatprep.mubr.msk.bf16.mxu1 %vm1552_vm1, %v1551_v16 }
 0x4cb   : > { %1435 = vmatprep.subr.bf16.mxu1 %v1551_v16 }
 0x527   : > { %v685_v40 = vpop.f32.mrb[4].mxu1 }
 0x528   : > { %v691_v41 = vpack.c.bf16 %v685_v40, %v685_v40  ;;  %v1403_v42 = vpop.f32.mrb[5].mxu1 }
 0x529   : > { %v688_v43 = vpop.f32.mrb[6].mxu1 }
 0x52a   : > { %v1404_v44 = vpop.f32.mrb[7].mxu1  ;;  %1426 = vmatmul.mubr.msk.bf16.vlgmr.msra.gmra.mrb[12].mxu1 %vm580_vm7, %v691_v41 }
 0x52b   : > { %1437 = vmatprep.mubr.msk.bf16.mxu1 %vm1552_vm1, %v1551_v16 }
 0x59c   : > { %v798_v46 = vpop.f32.mrb[8].mxu1 }
 0x59d   : > { %v804_v47 = vpack.c.bf16 %v798_v46, %v798_v46  ;;  %v1415_v48 = vpop.f32.mrb[9].mxu1 }
 0x59e   : > { %v801_v49 = vpop.f32.mrb[10].mxu1 }
 0x59f   : > { %v1416_v51 = vpop.f32.mrb[11].mxu1  ;;  %1420 = vmatmul.mubr.msk.bf16.vlgmr.msra.gmra.mrb[12].mxu0 %vm580_vm7, %v804_v47 }
 0x5a0   : > { %1430 = vmatpush3.bf16.xpose.msra.mxu0 %v906_v50  ;;  %1431 = vmatprep.mubr.msk.bf16.mxu0 %vm1552_vm1, %v1551_v16 }
 0x5a1   : > { %1441 = vmatprep.subr.bf16.mxu0 %v1551_v16 }
 0x5a7   : > { %1432 = vmatmul.mubr.msk.bf16.vlgmr.msra.gmra.mrb[16].mxu0 %vm580_vm7, %v899_v52 }
 0x5a8   : > { %1443 = vmatprep.mubr.msk.bf16.mxu0 %vm1552_vm1, %v1551_v16  ;;  %1442 = vmatpush3.bf16.msra.mxu0 %v1014_v23 }
 0x5a9   : > { %1453 = vmatprep.subr.bf16.mxu0 %v1551_v16 }
 0x5fd   : > { %v892_v54 = vpop.f32.mrb[12].mxu1 }
 0x5fe   : > { %v1427_v55 = vpop.f32.mrb[13].mxu1 }
 0x5ff   : > { %v895_v56 = vpop.f32.mrb[14].mxu1 }
 0x600   : > { %v1428_v57 = vpop.f32.mrb[15].mxu1 }
 0x672   : > { %v846_v58 = vpop.f32.mrb[12].mxu0 }
 0x673   : > { %v1742_v60 = vadd.f32 %v892_v54, %v846_v58  ;;  %v1421_v61 = vpop.f32.mrb[13].mxu0 }
 0x674   : > { %v849_v62 = vpop.f32.mrb[14].mxu0 }
 0x675   : > { %v1422_v0 = vpop.f32.mrb[15].mxu0 }
 0x67a   : > { %v942_v1 = vpop.f32.mrb[16].mxu0 }
 0x67b   : > { %v943_v3 = vadd.f32 %v1699_v63, %v942_v1  ;;  %v1433_v4 = vpop.f32.mrb[17].mxu0 }
 0x67c   : > { %v945_v5 = vpop.f32.mrb[18].mxu0 }
 0x67d   : > { %v1434_v6 = vpop.f32.mrb[19].mxu0  ;;  %v948_v7 = vsel %vm580_vm7, %v943_v3, -inf }
 0x67e   : > { %949 = vmax.xlane.f32.xlu0 %v948_v7 }
 0x694   : > { %960 = vrot.lane.b32.xlu0 %v1682_v59, %s1557_s21 }
 0x698   : > { %1057 = vrot.lane.b32.xlu0 %v1678_v53, %s1558_s22 }
 0x70b   : > { %v950_v8 = vpop.xlane.xlu0 %949 }
 0x70c   : > { %v951_v9 = vsub.f32 %v943_v3, %v950_v8 }
 0x70e   : > { %v952_v10 = vmul.f32 1.442695, %v951_v9 }
 0x70f   : > { %v961_v11 = vpop.permute.xlu0 %960 }
 0x710   : > { %1519 = vpow2.f32 %v952_v10  ;;  %v966_v12 = vsel %vm647_vm8, %v961_v11, 0 }
 0x711   : > { %1436 = vmatpush3.bf16.msra.mxu1 %v966_v12 }
 0x712   : > { %1447 = vmatprep.subr.bf16.mxu1 %v1551_v16 }
 0x713   : > { %v1058_v21 = vpop.permute.xlu0 %1057 }
 0x71a   : > { %v1520_v13 = vpop.eup %1519 }
 0x71b   : > { %v954_v14 = vsel %vm580_vm7, %v1520_v13, 0.0 }
 0x71c   : > { %955 = vadd.xlane.f32.xlu1 %v954_v14 }
 0x72d   : > { %1059 = vrot.lane.b32.xlu1 %v1682_v59, %s1558_s22 }
 0x7a9   : > { %v956_v15 = vpop.xlane.xlu1 %955 }
 0x7aa   : > { %1521 = vrcp.f32 %v956_v15 }
 0x7ad   : > { %v1060_v18 = vpop.permute.xlu1 %1059 }
 0x7ae   : > { %v1065_v20 = vsel %vm580_vm7, %v1060_v18, 0 }
 0x7b4   : > { %v1522_v17 = vpop.eup %1521 }
 0x7b5   : > { %v958_v53 = vmul.f32 %v1522_v17, %v1520_v13 }
 0x7b7   : > { %v959_v19 = vpack.c.bf16 %v958_v53, %v958_v53 }
 0x7b9   : > { %1438 = vmatmul.mubr.msk.bf16.vlgmr.msra.gmra.mrb[16].mxu1 %vm580_vm7, %v959_v19 }
 0x7ba   : > { %1448 = vmatpush3.bf16.xpose.msra.mxu1 %v1065_v20  ;;  %1449 = vmatprep.mubr.msk.bf16.mxu1 %vm1552_vm1, %v1551_v16 }
 0x7bb   : > { %1459 = vmatprep.subr.bf16.mxu1 %v1551_v16 }
 0x7c1   : > { %1450 = vmatmul.mubr.msk.bf16.vlgmr.msra.gmra.mrb[20].mxu1 %vm580_vm7, %v1058_v21 }
 0x7c2   : > { %1461 = vmatprep.mubr.msk.bf16.mxu1 %vm1552_vm1, %v1551_v16 }
 0x88c   : > { %v1002_v24 = vpop.f32.mrb[16].mxu1 }
 0x88d   : > { %v1008_v25 = vpack.c.bf16 %v1002_v24, %v1002_v24  ;;  %v1439_v26 = vpop.f32.mrb[17].mxu1 }
 0x88e   : > { %v1005_v27 = vpop.f32.mrb[18].mxu1 }
 0x88f   : > { %v1440_v28 = vpop.f32.mrb[19].mxu1  ;;  %1444 = vmatmul.mubr.msk.bf16.vlgmr.msra.gmra.mrb[20].mxu0 %vm580_vm7, %v1008_v25 }
 0x890   : > { %1455 = vmatprep.mubr.msk.bf16.mxu0 %vm1552_vm1, %v1551_v16  ;;  %v1168_v16 = vld [vmem:[%s1802_s7 + $0xc] sm:$0xf] }
 0x894   : > { %v1101_v29 = vpop.f32.mrb[20].mxu1 }
 0x895   : > { %v1102_v30 = vadd.f32 %v1699_v63, %v1101_v29  ;;  %v1451_v31 = vpop.f32.mrb[21].mxu1  ;;  %v1173_v63 = vsel %vm647_vm8, %v1168_v16, 0 }
 0x896   : > { %v1104_v32 = vpop.f32.mrb[22].mxu1  ;;  %1460 = vmatpush3.bf16.msra.mxu1 %v1173_v63 }
 0x897   : > { %v1452_v33 = vpop.f32.mrb[23].mxu1  ;;  %v1107_v34 = vsel %vm580_vm7, %v1102_v30, -inf }
 0x898   : > { %1108 = vmax.xlane.f32.xlu1 %v1107_v34 }
 0x925   : > { %v1109_v35 = vpop.xlane.xlu1 %1108 }
 0x926   : > { %v1110_v36 = vsub.f32 %v1102_v30, %v1109_v35 }
 0x928   : > { %v1111_v37 = vmul.f32 1.442695, %v1110_v36 }
 0x92a   : > { %1523 = vpow2.f32 %v1111_v37 }
 0x934   : > { %v1524_v38 = vpop.eup %1523 }
 0x935   : > { %v1113_v39 = vsel %vm580_vm7, %v1524_v38, 0.0 }
 0x936   : > { %1114 = vadd.xlane.f32.xlu0 %v1113_v39 }
 0x94c   : > { %1119 = vrot.lane.b32.xlu0 %v1682_v59, %s1559_s25 }
 0x962   : > { %v1050_v40 = vpop.f32.mrb[20].mxu0 }
 0x963   : > { %v1056_v41 = vadd.f32 %v1050_v40, %v1742_v60  ;;  %v1445_v42 = vpop.f32.mrb[21].mxu0 }
 0x964   : > { %v1053_v43 = vpop.f32.mrb[22].mxu0 }
 0x965   : > { %v1446_v44 = vpop.f32.mrb[23].mxu0 }
 0x9c3   : > { %v1115_v45 = vpop.xlane.xlu0 %1114 }
 0x9c4   : > { %1525 = vrcp.f32 %v1115_v45 }
 0x9c7   : > { %v1120_v46 = vpop.permute.xlu0 %1119 }
 0x9c8   : > { %v1125_v47 = vsel %vm647_vm8, %v1120_v46, 0 }
 0x9c9   : > { %1454 = vmatpush3.bf16.msra.mxu0 %v1125_v47 }
 0x9ce   : > { %v1526_v59 = vpop.eup %1525 }
 0x9cf   : > { %v1117_v48 = vmul.f32 %v1526_v59, %v1524_v38 }
 0x9d1   : > { %v1118_v49 = vpack.c.bf16 %v1117_v48, %v1117_v48 }
 0x9d3   : > { %1456 = vmatmul.mubr.msk.bf16.vlgmr.msra.gmra.mrb[24].mxu0 %vm580_vm7, %v1118_v49 }
 0xaa6   : > { %v1161_v50 = vpop.f32.mrb[24].mxu0 }
 0xaa7   : > { %v1167_v51 = vpack.c.bf16 %v1161_v50, %v1161_v50  ;;  %v1457_v52 = vpop.f32.mrb[25].mxu0 }
 0xaa8   : > { %v1164_v54 = vpop.f32.mrb[26].mxu0 }
 0xaa9   : > { %v1458_v55 = vpop.f32.mrb[27].mxu0  ;;  %1462 = vmatmul.mubr.msk.bf16.vlgmr.msra.gmra.mrb[24].mxu1 %vm580_vm7, %v1167_v51 }
 0xb7c   : > { %v1209_v56 = vpop.f32.mrb[24].mxu1 }
 0xb7d   : > { %v1215_v57 = vadd.f32 %v1209_v56, %v1056_v41  ;;  %v1463_v58 = vpop.f32.mrb[25].mxu1 }
 0xb7e   : > { %v1212_v60 = vpop.f32.mrb[26].mxu1 }
 0xb7f   : > { %v1216_v61 = vadd.f32 %v1215_v57, %v1637_v2  ;;  %v1464_v62 = vpop.f32.mrb[27].mxu1 }
 0xb81   : > { %1217 = vst.msk [vmem:[%s362_s13] sm:$0xff] %vm371_vm0, %v1216_v61 }
 0xb82 PF: > { %s18_s29 = sadd.s32 1, %s1549_s29   ;;  %s1804_s27 = smov %s1545_s28 }
 0xb83   : > { %p15_p5 = scmp.ge.s32.totalorder %s18_s29, 4   ;;  %s1805_s28 = smov %s1807_s30 }
 0xb85   :  { %17 = sbr.rel (!%p15_p5) target bundleno = 2 (0x2), region = 92 }

// kernel: encoder_forward.5
= control target key start
LH: loop header
LB: loop body
LE: loop exit
PB: predicated region body
PF: predicated region fallthrough
CT: control target
= control target key end

     0   :  { %vm31_vm0 = vcmask 261120   ;;  %v310_v14 = vmov 0.0   ;;  %vm311_vm1 = vmmov 0   ;;  %vm201_vm6 = vcmask 523264   ;;  %s411_s0 = inlined_call_operand.vmem [shape: f32[16,32], index: 0, kind: input, shape index: {}]   ;;  %s412_s3 = inlined_call_operand.vmem [shape: bf16[32,64], index: 3, kind: input, shape index: {}]   ;;  %s413_s5 = inlined_call_operand.vmem [shape: bf16[64,32], index: 5, kind: input, shape index: {}]   ;;  %s414_s1 = inlined_call_operand.vmem [shape: f32[1,32], index: 1, kind: input, shape index: {}]   ;;  %s415_s2 = inlined_call_operand.vmem [shape: f32[1,32], index: 2, kind: input, shape index: {}]   ;;  %s416_s4 = inlined_call_operand.vmem [shape: f32[1,64], index: 4, kind: input, shape index: {}]   ;;  %s417_s6 = inlined_call_operand.vmem [shape: f32[1,32], index: 6, kind: input, shape index: {}]   ;;  %s418_s7 = inlined_call_operand.vmem [shape: f32[16,32], index: 7, kind: output, shape index: {}]  }
   0x1   :  { %v355_v0 = vld [vmem:[%s411_s0] sm:$0xff]  ;;  %v360_v1 = vld [vmem:[%s411_s0 + $0x8] sm:$0xff]  ;;  %274 = vmatprep.subr.bf16.mxu0 %v310_v14  ;;  %278 = vmatprep.mubr.msk.bf16.mxu0 %vm311_vm1, %v310_v14  ;;  %v300_v46 = vld [vmem:[%s413_s5 + $0x10] sm:$0xff]  }
   0x2   :  { %v32_v2 = vsel %vm31_vm0, %v355_v0, 0.0  ;;  %v35_v3 = vsel %vm31_vm0, %v360_v1, 0.0  ;;  %v296_v15 = vld [vmem:[%s412_s3] sm:$0xff]   ;;  %282 = vmatprep.subr.bf16.mxu1 %v310_v14  ;;  %290 = vmatprep.mubr.msk.bf16.mxu1 %vm311_vm1, %v310_v14  ;;  %v297_v16 = vld [vmem:[%s412_s3 + $0x8] sm:$0xff]   ;;  %v301_v47 = vld [vmem:[%s413_s5 + $0x18] sm:$0xff]  }
   0x3   :  { %33 = vadd.xlane.f32.xlu0 %v32_v2  ;;  %275 = vmatpush3.bf16.msra.mxu0 %v296_v15  ;;  %v298_v17 = vld [vmem:[%s413_s5] sm:$0xff]   ;;  %v299_v18 = vld [vmem:[%s413_s5 + $0x8] sm:$0xff]  }
   0x4   :  { %276 = vmatprep.subr.bf16.mxu0 %v310_v14  ;;  %283 = vmatpush3.bf16.msra.mxu1 %v298_v17  ;;  %v254_v37 = vld [vmem:[%s414_s1] ss:$0 sm:$0xff] }
   0x5   :  { %284 = vmatprep.subr.bf16.mxu1 %v310_v14  ;;  %v255_v41 = vld [vmem:[%s415_s2] ss:$0 sm:$0xff] }
   0x6   :  { %v256_v48 = vld [vmem:[%s416_s4] ss:$0 sm:$0xff] }
   0x7   :  { %36 = vadd.xlane.f32.xlu0 %v35_v3  ;;  %277 = vmatpush3.bf16.msra.mxu0 %v297_v16  ;;  %v260_v58 = vld [vmem:[%s417_s6] ss:$0 sm:$0xff] }
   0x8   :  { %285 = vmatpush3.bf16.msra.mxu1 %v299_v18 }
   0x9   :  { %286 = vmatprep.subr.bf16.mxu1 %v310_v14 }
   0xc   :  { %287 = vmatpush3.bf16.msra.mxu1 %v300_v46 }
   0xd   :  { %288 = vmatprep.subr.bf16.mxu1 %v310_v14 }
  0x10   :  { %289 = vmatpush3.bf16.msra.mxu1 %v301_v47 }
  0x90   :  { %v34_v4 = vpop.xlane.xlu0 %33 }
  0x91   :  { %v39_v5 = vmul.f32 0.03125, %v34_v4 }
  0x93   :  { %v41_v6 = vsub.f32 %v355_v0, %v39_v5 }
  0x94   :  { %v37_v7 = vpop.xlane.xlu0 %36 }
  0x95   :  { %v40_v8 = vmul.f32 0.03125, %v37_v7  ;;  %v43_v9 = vmul.f32 %v41_v6, %v41_v6 }
  0x97   :  { %v42_v10 = vsub.f32 %v360_v1, %v40_v8  ;;  %v45_v11 = vsel %vm31_vm0, %v43_v9, 0.0 }
  0x98   :  { %46 = vadd.xlane.f32.xlu1 %v45_v11 }
  0x99   :  { %v44_v12 = vmul.f32 %v42_v10, %v42_v10 }
  0x9b   :  { %v48_v13 = vsel %vm31_vm0, %v44_v12, 0.0 }
  0x9c   :  { %49 = vadd.xlane.f32.xlu1 %v48_v13 }
 0x125   :  { %v47_v19 = vpop.xlane.xlu1 %46 }
 0x126   :  { %v51_v20 = vmul.f32 0.032258064, %v47_v19 }
 0x128   :  { %302 = vrsqrt.f32 %v51_v20  ;;  %vm55_vm2 = vcmp.eq.f32.partialorder %v51_v20, inf  ;;  %v58_v25 = vand.u32 2147483648, %v51_v20  ;;  %vm57_vm3 = vcmp.eq.f32.partialorder %v51_v20, 0.0 }
 0x129   :  { %v50_v21 = vpop.xlane.xlu1 %49 }
 0x12a   :  { %v52_v22 = vmul.f32 0.032258064, %v50_v21 }
 0x12c   :  { %304 = vrsqrt.f32 %v52_v22  ;;  %vm62_vm4 = vcmp.eq.f32.partialorder %v52_v22, inf  ;;  %v65_v31 = vand.u32 2147483648, %v52_v22  ;;  %vm64_vm5 = vcmp.eq.f32.partialorder %v52_v22, 0.0 }
 0x132   :  { %v303_v23 = vpop.eup %302 }
 0x133   :  { %v54_v24 = vmul.f32 %v303_v23, %v51_v20 }
 0x135   :  { %v56_v26 = vsel %vm55_vm2, %v51_v20, %v54_v24 }
 0x136   :  { %v305_v27 = vpop.eup %304  ;;  %v59_v28 = vsel %vm57_vm3, %v58_v25, %v56_v26 }
 0x137   :  { %v67_v29 = vadd.f32 1e-06, %v59_v28  ;;  %v61_v30 = vmul.f32 %v305_v27, %v52_v22 }
 0x139   :  { %306 = vrcp.f32 %v67_v29  ;;  %v63_v32 = vsel %vm62_vm4, %v52_v22, %v61_v30 }
 0x13a   :  { %v66_v33 = vsel %vm64_vm5, %v65_v31, %v63_v32 }
 0x13b   :  { %v68_v34 = vadd.f32 1e-06, %v66_v33 }
 0x13d   :  { %308 = vrcp.f32 %v68_v34 }
 0x143   :  { %v307_v35 = vpop.eup %306 }
 0x144   :  { %v73_v36 = vmul.f32 %v307_v35, %v41_v6 }
 0x146   :  { %v81_v40 = vmul.f32 %v254_v37, %v73_v36 }
 0x147   :  { %v309_v38 = vpop.eup %308 }
 0x148   :  { %v74_v39 = vmul.f32 %v309_v38, %v42_v10  ;;  %v89_v43 = vadd.f32 %v255_v41, %v81_v40 }
 0x14a   :  { %v82_v42 = vmul.f32 %v254_v37, %v74_v39 }
 0x14c   :  { %v90_v44 = vadd.f32 %v255_v41, %v82_v42 }
 0x14e   :  { %v91_v45 = vpack.c.bf16 %v90_v44, %v89_v43 }
 0x150   :  { %279 = vmatmul.mubr.msk.bf16.vlgmr.msra.gmra.mrb[0].mxu0 %vm31_vm0, %v91_v45 }
 0x223   :  { %v152_v49 = vpop.f32.mrb[0].mxu0 }
 0x224   :  { %v153_v50 = vadd.f32 %v256_v48, %v152_v49  ;;  %v280_v51 = vpop.f32.mrb[1].mxu0 }
 0x225   :  { %v155_v52 = vpop.f32.mrb[2].mxu0 }
 0x226   :  { %v156_v53 = vadd.f32 %v256_v48, %v155_v52  ;;  %v281_v54 = vpop.f32.mrb[3].mxu0  ;;  %v159_v55 = vmax.f32 %v153_v50, 0.0 }
 0x228   :  { %v160_v56 = vmax.f32 %v156_v53, 0.0 }
 0x22a   :  { %v161_v57 = vpack.c.bf16 %v160_v56, %v159_v55 }
 0x22c   :  { %291 = vmatmul.mubr.msk.bf16.vlgmr.msra.gmra.mrb[0].mxu1 %vm201_vm6, %v161_v57 }
 0x2ff   :  { %v239_v59 = vpop.f32.mrb[0].mxu1 }
 0x300   :  { %v240_v60 = vadd.f32 %v260_v58, %v239_v59  ;;  %v292_v61 = vpop.f32.mrb[1].mxu1 }
 0x301   :  { %v242_v62 = vpop.f32.mrb[2].mxu1 }
 0x302   :  { %v246_v63 = vadd.f32 %v240_v60, %v355_v0  ;;  %v243_v2 = vadd.f32 %v260_v58, %v242_v62  ;;  %v293_v3 = vpop.f32.mrb[3].mxu1 }
 0x304   :  { %248 = vst.msk [vmem:[%s418_s7] sm:$0xff] %vm31_vm0, %v246_v63  ;;  %v247_v4 = vadd.f32 %v243_v2, %v360_v1 }
 0x306   :  { %249 = vst.msk [vmem:[%s418_s7 + $0x8] sm:$0xff] %vm31_vm0, %v247_v4 }

// kernel: encoder_forward.7
= control target key start
LH: loop header
LB: loop body
LE: loop exit
PB: predicated region body
PF: predicated region fallthrough
CT: control target
= control target key end

     0   :  { %vm38_vm0 = vcmask 261120   ;;  %s556_s0 = inlined_call_operand.vmem [shape: f32[16,32], index: 0, kind: input, shape index: {}]   ;;  %s557_s1 = inlined_call_operand.vmem [shape: f32[1,32], index: 1, kind: input, shape index: {}]   ;;  %s558_s2 = inlined_call_operand.vmem [shape: f32[1,32], index: 2, kind: input, shape index: {}]   ;;  %s559_s3 = inlined_call_operand.vmem [shape: bf16[32,64], index: 3, kind: input, shape index: {}]   ;;  %s560_s4 = inlined_call_operand.vmem [shape: f32[1,64], index: 4, kind: input, shape index: {}]   ;;  %s561_s5 = inlined_call_operand.vmem [shape: bf16[64,32], index: 5, kind: input, shape index: {}]   ;;  %s562_s6 = inlined_call_operand.vmem [shape: f32[1,32], index: 6, kind: input, shape index: {}]   ;;  %s563_s7 = inlined_call_operand.vmem [shape: f32[1,32], index: 7, kind: input, shape index: {}]   ;;  %s564_s8 = inlined_call_operand.vmem [shape: f32[1,32], index: 8, kind: input, shape index: {}]   ;;  %s565_s9 = inlined_call_operand.hbm [shape: f32[16,32], index: 9, kind: output, shape index: {}]  }
   0x1   :  { %v484_v0 = vld [vmem:[%s556_s0] sm:$0xff]  ;;  %v489_v1 = vld [vmem:[%s556_s0 + $0x8] sm:$0xff] }
   0x2   :  { %v39_v2 = vsel %vm38_vm0, %v484_v0, 0.0  ;;  %v42_v3 = vsel %vm38_vm0, %v489_v1, 0.0 }
   0x3   :  { %40 = vadd.xlane.f32.xlu0 %v39_v2 }
   0x4   :  { %14 = vsyncpa [#allocation3], 0  ;;  %v380_v14 = vld [vmem:[%s559_s3] sm:$0xff]   ;;  %v426_v15 = vmov 0.0   ;;  %vm427_vm1 = vmmov 0   ;;  %v381_v16 = vld [vmem:[%s559_s3 + $0x8] sm:$0xff]  }
   0x5   :  { %355 = vmatprep.subr.bf16.mxu0 %v426_v15  ;;  %359 = vmatprep.mubr.msk.bf16.mxu0 %vm427_vm1, %v426_v15  ;;  %v382_v17 = vld [vmem:[%s561_s5] sm:$0xff]   ;;  %v383_v18 = vld [vmem:[%s561_s5 + $0x8] sm:$0xff]   ;;  %v384_v46 = vld [vmem:[%s561_s5 + $0x10] sm:$0xff]   ;;  %vm208_vm6 = vcmask 523264   ;;  %s428_s30 = smov [#allocation2]  }
   0x6   :  { %356 = vmatpush3.bf16.msra.mxu0 %v380_v14  ;;  %363 = vmatprep.subr.bf16.mxu1 %v426_v15  ;;  %v333_v37 = vld [vmem:[%s557_s1] ss:$0 sm:$0xff]  ;;  %v385_v47 = vld [vmem:[%s561_s5 + $0x18] sm:$0xff]   ;;  %s322_s10 = sshll.u32 %s428_s30, 4  ;;  %s323_s10 = int_to_ptr.vmem [resolvable:$true] %s322_s10 }
   0x7   :  { %43 = vadd.xlane.f32.xlu0 %v42_v3  ;;  %357 = vmatprep.subr.bf16.mxu0 %v426_v15  ;;  %v334_v41 = vld [vmem:[%s558_s2] ss:$0 sm:$0xff]  ;;  %s402_s11 = scalar_lea.vmem %s323_s10, 256  ;;  %p407_p1 = scmp.lt.s32.totalorder %s323_s10, %s323_s10 }
   0x8   :  { %371 = vmatprep.mubr.msk.bf16.mxu1 %vm427_vm1, %v426_v15  ;;  %364 = vmatpush3.bf16.msra.mxu1 %v382_v17  ;;  %v335_v48 = vld [vmem:[%s560_s4] ss:$0 sm:$0xff]  ;;  %p403_p0 = scmp.ne.s32.totalorder %s323_s10, %s402_s11  ;;  %p408_p2 = scmp.lt.s32.totalorder %s402_s11, %s402_s11 }
   0x9   :  { %365 = vmatprep.subr.bf16.mxu1 %v426_v15  ;;  %v339_v58 = vld [vmem:[%s562_s6] ss:$0 sm:$0xff] }
   0xa   :  { %358 = vmatpush3.bf16.msra.mxu0 %v381_v16  ;;  %p409_p3 = por %p408_p2, %p407_p1 }
   0xc   :  { %366 = vmatpush3.bf16.msra.mxu1 %v383_v18  ;;  %p410_p4 = pnand %p409_p3, %p403_p0 }
   0xd   :  { %367 = vmatprep.subr.bf16.mxu1 %v426_v15 }
  0x10   :  { %368 = vmatpush3.bf16.msra.mxu1 %v384_v46 }
  0x11   :  { %369 = vmatprep.subr.bf16.mxu1 %v426_v15 }
  0x14   :  { %370 = vmatpush3.bf16.msra.mxu1 %v385_v47 }
  0x90   :  { %v41_v4 = vpop.xlane.xlu0 %40 }
  0x91   :  { %v46_v5 = vmul.f32 0.03125, %v41_v4 }
  0x93   :  { %v48_v6 = vsub.f32 %v484_v0, %v46_v5 }
  0x94   :  { %v44_v7 = vpop.xlane.xlu0 %43 }
  0x95   :  { %v47_v8 = vmul.f32 0.03125, %v44_v7  ;;  %v50_v9 = vmul.f32 %v48_v6, %v48_v6 }
  0x97   :  { %v49_v10 = vsub.f32 %v489_v1, %v47_v8  ;;  %v52_v11 = vsel %vm38_vm0, %v50_v9, 0.0 }
  0x98   :  { %53 = vadd.xlane.f32.xlu1 %v52_v11 }
  0x99   :  { %v51_v12 = vmul.f32 %v49_v10, %v49_v10 }
  0x9b   :  { %v55_v13 = vsel %vm38_vm0, %v51_v12, 0.0 }
  0x9c   :  { %56 = vadd.xlane.f32.xlu1 %v55_v13 }
 0x125   :  { %v54_v19 = vpop.xlane.xlu1 %53 }
 0x126   :  { %v58_v20 = vmul.f32 0.032258064, %v54_v19 }
 0x128   :  { %386 = vrsqrt.f32 %v58_v20  ;;  %vm62_vm2 = vcmp.eq.f32.partialorder %v58_v20, inf  ;;  %v65_v25 = vand.u32 2147483648, %v58_v20  ;;  %vm64_vm3 = vcmp.eq.f32.partialorder %v58_v20, 0.0 }
 0x129   :  { %v57_v21 = vpop.xlane.xlu1 %56 }
 0x12a   :  { %v59_v22 = vmul.f32 0.032258064, %v57_v21 }
 0x12c   :  { %388 = vrsqrt.f32 %v59_v22  ;;  %vm69_vm4 = vcmp.eq.f32.partialorder %v59_v22, inf  ;;  %v72_v31 = vand.u32 2147483648, %v59_v22  ;;  %vm71_vm5 = vcmp.eq.f32.partialorder %v59_v22, 0.0 }
 0x132   :  { %v387_v23 = vpop.eup %386 }
 0x133   :  { %v61_v24 = vmul.f32 %v387_v23, %v58_v20 }
 0x135   :  { %v63_v26 = vsel %vm62_vm2, %v58_v20, %v61_v24 }
 0x136   :  { %v389_v27 = vpop.eup %388  ;;  %v66_v28 = vsel %vm64_vm3, %v65_v25, %v63_v26 }
 0x137   :  { %v74_v29 = vadd.f32 1e-06, %v66_v28  ;;  %v68_v30 = vmul.f32 %v389_v27, %v59_v22 }
 0x139   :  { %390 = vrcp.f32 %v74_v29  ;;  %v70_v32 = vsel %vm69_vm4, %v59_v22, %v68_v30 }
 0x13a   :  { %v73_v33 = vsel %vm71_vm5, %v72_v31, %v70_v32  ;;  %v345_v32 = vld [vmem:[%s563_s7] ss:$0 sm:$0xff] }
 0x13b   :  { %v75_v34 = vadd.f32 1e-06, %v73_v33 }
 0x13d   :  { %392 = vrcp.f32 %v75_v34  ;;  %v346_v34 = vld [vmem:[%s564_s8] ss:$0 sm:$0xff] }
 0x143   :  { %v391_v35 = vpop.eup %390 }
 0x144   :  { %v80_v36 = vmul.f32 %v391_v35, %v48_v6 }
 0x146   :  { %v88_v40 = vmul.f32 %v333_v37, %v80_v36 }
 0x147   :  { %v393_v38 = vpop.eup %392 }
 0x148   :  { %v81_v39 = vmul.f32 %v393_v38, %v49_v10  ;;  %v96_v43 = vadd.f32 %v334_v41, %v88_v40 }
 0x14a   :  { %v89_v42 = vmul.f32 %v333_v37, %v81_v39 }
 0x14c   :  { %v97_v44 = vadd.f32 %v334_v41, %v89_v42 }
 0x14e   :  { %v98_v45 = vpack.c.bf16 %v97_v44, %v96_v43 }
 0x150   :  { %360 = vmatmul.mubr.msk.bf16.vlgmr.msra.gmra.mrb[0].mxu0 %vm38_vm0, %v98_v45 }
 0x223   :  { %v159_v49 = vpop.f32.mrb[0].mxu0 }
 0x224   :  { %v160_v50 = vadd.f32 %v335_v48, %v159_v49  ;;  %v361_v51 = vpop.f32.mrb[1].mxu0 }
 0x225   :  { %v162_v52 = vpop.f32.mrb[2].mxu0 }
 0x226   :  { %v163_v53 = vadd.f32 %v335_v48, %v162_v52  ;;  %v362_v54 = vpop.f32.mrb[3].mxu0  ;;  %v166_v55 = vmax.f32 %v160_v50, 0.0 }
 0x228   :  { %v167_v56 = vmax.f32 %v163_v53, 0.0 }
 0x22a   :  { %v168_v57 = vpack.c.bf16 %v167_v56, %v166_v55 }
 0x22c   :  { %372 = vmatmul.mubr.msk.bf16.vlgmr.msra.gmra.mrb[0].mxu1 %vm208_vm6, %v168_v57 }
 0x2ff   :  { %v246_v59 = vpop.f32.mrb[0].mxu1 }
 0x300   :  { %v247_v60 = vadd.f32 %v339_v58, %v246_v59  ;;  %v373_v61 = vpop.f32.mrb[1].mxu1 }
 0x301   :  { %v249_v62 = vpop.f32.mrb[2].mxu1 }
 0x302   :  { %v250_v63 = vadd.f32 %v339_v58, %v249_v62  ;;  %v374_v2 = vpop.f32.mrb[3].mxu1  ;;  %v253_v3 = vadd.f32 %v247_v60, %v484_v0 }
 0x304   :  { %v257_v4 = vsel %vm38_vm0, %v253_v3, 0.0  ;;  %v254_v5 = vadd.f32 %v250_v63, %v489_v1 }
 0x305   :  { %258 = vadd.xlane.f32.xlu0 %v257_v4 }
 0x306   :  { %v260_v6 = vsel %vm38_vm0, %v254_v5, 0.0 }
 0x307   :  { %261 = vadd.xlane.f32.xlu1 %v260_v6 }
 0x392   :  { %v259_v7 = vpop.xlane.xlu0 %258 }
 0x393   :  { %v263_v8 = vmul.f32 0.03125, %v259_v7 }
 0x394   :  { %v262_v9 = vpop.xlane.xlu1 %261 }
 0x395   :  { %v265_v10 = vsub.f32 %v253_v3, %v263_v8  ;;  %v264_v11 = vmul.f32 0.03125, %v262_v9 }
 0x397   :  { %v266_v12 = vsub.f32 %v254_v5, %v264_v11  ;;  %v267_v13 = vmul.f32 %v265_v10, %v265_v10 }
 0x399   :  { %v269_v14 = vsel %vm38_vm0, %v267_v13, 0.0  ;;  %v268_v15 = vmul.f32 %v266_v12, %v266_v12 }
 0x39a   :  { %270 = vadd.xlane.f32.xlu0 %v269_v14 }
 0x39b   :  { %v272_v0 = vsel %vm38_vm0, %v268_v15, 0.0 }
 0x39c   :  { %273 = vadd.xlane.f32.xlu1 %v272_v0 }
 0x427   :  { %v271_v16 = vpop.xlane.xlu0 %270 }
 0x428   :  { %v275_v1 = vmul.f32 0.032258064, %v271_v16 }
 0x429   :  { %v274_v17 = vpop.xlane.xlu1 %273 }
 0x42a   :  { %394 = vrsqrt.f32 %v275_v1  ;;  %v276_v18 = vmul.f32 0.032258064, %v274_v17  ;;  %vm279_vm7 = vcmp.eq.f32.partialorder %v275_v1, inf  ;;  %v282_v21 = vand.u32 2147483648, %v275_v1 }
 0x42b   :  { %vm281_vm8 = vcmp.eq.f32.partialorder %v275_v1, 0.0 }
 0x42c   :  { %396 = vrsqrt.f32 %v276_v18  ;;  %vm286_vm9 = vcmp.eq.f32.partialorder %v276_v18, inf  ;;  %v289_v27 = vand.u32 2147483648, %v276_v18  ;;  %vm288_vm10 = vcmp.eq.f32.partialorder %v276_v18, 0.0 }
 0x434   :  { %v395_v19 = vpop.eup %394 }
 0x435   :  { %v278_v20 = vmul.f32 %v395_v19, %v275_v1 }
 0x436   :  { %v397_v22 = vpop.eup %396 }
 0x437   :  { %v280_v23 = vsel %vm279_vm7, %v275_v1, %v278_v20  ;;  %v285_v25 = vmul.f32 %v397_v22, %v276_v18 }
 0x438   :  { %v283_v24 = vsel %vm281_vm8, %v282_v21, %v280_v23 }
 0x439   :  { %v291_v26 = vadd.f32 1e-06, %v283_v24  ;;  %v287_v28 = vsel %vm286_vm9, %v276_v18, %v285_v25 }
 0x43a   :  { %v290_v29 = vsel %vm288_vm10, %v289_v27, %v287_v28 }
 0x43b   :  { %398 = vrcp.f32 %v291_v26  ;;  %v292_v30 = vadd.f32 1e-06, %v290_v29 }
 0x43d   :  { %400 = vrcp.f32 %v292_v30 }
 0x445   :  { %v399_v31 = vpop.eup %398 }
 0x446   :  { %v297_v33 = vmul.f32 %v399_v31, %v265_v10 }
 0x447   :  { %v401_v35 = vpop.eup %400 }
 0x448   :  { %v305_v36 = vmul.f32 %v345_v32, %v297_v33  ;;  %v298_v37 = vmul.f32 %v401_v35, %v266_v12 }
 0x44a   :  { %v313_v38 = vadd.f32 %v346_v34, %v305_v36  ;;  %v306_v39 = vmul.f32 %v345_v32, %v298_v37 }
 0x44c   :  { %315 = vst.msk [vmem:[#allocation2] sm:$0xff] %vm38_vm0, %v313_v38  ;;  %v314_v40 = vadd.f32 %v346_v34, %v306_v39 }
 0x44e   :  { %316 = vst.msk [vmem:[#allocation2 + $0x8] sm:$0xff] %vm38_vm0, %v314_v40 }
 0x44f   :  { %413 = shalt.err (!%p410_p4)
}
 0x450   :  { %s414_s12 = scalar_lea.hbm %s565_s9, 256 }
 0x451   :  { %p415_p5 = scmp.ne.s32.totalorder %s565_s9, %s414_s12  ;;  %p418_p6 = scmp.lt.u32.totalorder %s414_s12, %s565_s9 }
 0x453   :  { %p420_p7 = pnand %p418_p6, %p415_p5 }
 0x455   :  { %423 = shalt.err (!%p420_p7)
}
 0x456   :  { %s429_s16 = smov 128   ;;  %s430_s17 = smov 8  }
 0x457   :  { %328 = dma.vmem_to_hbm [thread:$0]  %s323_s10, 256, %s565_s9, [#allocation3], %s429_s16, %s429_s16, %s430_s17  }
 0x458   :  { %424 = dma.done.wait [#allocation3], 256  }
 0x459   :  { %425 = vsyncadd [#allocation3], 4294967040 }
 0x45a   :  { %332 = vsyncpa [#allocation3], 1 }

// kernel: encoder_forward.4
= control target key start
LH: loop header
LB: loop body
LE: loop exit
PB: predicated region body
PF: predicated region fallthrough
CT: control target
= control target key end

     0   :  { %s1605_s27 = smov 0   ;;  %s1607_s28 = smov 0   ;;  %s1795_s0 = inlined_call_operand.vmem [shape: f32[2,8,32], index: 0, kind: input, shape index: {}, may-alias: {0,1}]   ;;  %s1796_s1 = inlined_call_operand.vmem [shape: f32[2,8,32], index: 1, kind: input, shape index: {}, may-alias: {0,1}]   ;;  %s1797_s2 = inlined_call_operand.vmem [shape: f32[2,1,8], index: 2, kind: input, shape index: {}]   ;;  %s1798_s3 = inlined_call_operand.vmem [shape: f32[1,32], index: 3, kind: input, shape index: {}]   ;;  %s1799_s4 = inlined_call_operand.vmem [shape: f32[1,32], index: 4, kind: input, shape index: {}]   ;;  %s1800_s5 = inlined_call_operand.vmem [shape: bf16[32,32], index: 5, kind: input, shape index: {}]   ;;  %s1801_s6 = inlined_call_operand.vmem [shape: bf16[32,64], index: 6, kind: input, shape index: {}]   ;;  %s1802_s7 = inlined_call_operand.vmem [shape: bf16[32,32], index: 7, kind: input, shape index: {}]   ;;  %s1803_s8 = inlined_call_operand.vmem [shape: f32[2,8,32], index: 8, kind: output, shape index: {}]  }
   0x1   :  { %s1609_s29 = smov 0  }
   0x2 LB: > { %s30_s30 = sadd.s32 1, %s1545_s28  ;;  %p1317_p0 = scmp.ge.s32.totalorder %s1549_s29, 1  ;;  %s1549_s29 = sphi %s1609_s29, %s18_s29   ;;  %s1545_s28 = sphi %s1607_s28, %s1805_s28   ;;  %s1541_s27 = sphi %s1605_s27, %s1804_s27  }
   0x3   : > { %p32_p1 = scmp.ge.s32.totalorder %s30_s30, 2  ;;  %p297_p2 = scmp.lt.s32.totalorder %s1549_s29, 3 }
   0x5   : > { %s1807_s30 = smov (%p32_p1, %s30_s30), 0  ;;  %p298_p3 = pnand %p1317_p0, %p297_p2 }
   0x6   : > { %p342_p4 = scmp.lt.s32.totalorder (!%p298_p3), %s1541_s27, 1  ;;  %vm371_vm0 = vcmask (!%p298_p3), 261120   ;;  %v1498_v14 = vld [vmem:[%s1801_s6] sm:$0xff] (!%p298_p3)   ;;  %v1551_v16 = vmov (!%p298_p3), 0.0   ;;  %v1499_v17 = vld [vmem:[%s1801_s6 + $0x8] sm:$0xff] (!%p298_p3)   ;;  %vm1552_vm1 = vmmov (!%p298_p3), 0  }
   0x7   : > { %301 = sbr.rel (%p298_p3) target bundleno = 2946 (0xb82), region = 52  ;;  %v1500_v15 = vld [vmem:[%s1800_s5] sm:$0xff] (!%p298_p3)   ;;  %1377 = vmatprep.subr.bf16.mxu0 (!%p298_p3), %v1551_v16  ;;  %1385 = vmatprep.subr.bf16.mxu1 (!%p298_p3), %v1551_v16  ;;  %v1501_v18 = vld [vmem:[%s1800_s5 + $0x8] sm:$0xff] (!%p298_p3)   ;;  %vm469_vm6 = vcmask (!%p298_p3), 519168   ;;  %s1553_s11 = smov (!%p298_p3), 120   ;;  %vm580_vm7 = vcmask (!%p298_p3), 64512  }
   0x8   : > { %1378 = vmatpush3.bf16.msra.mxu0 (!%p298_p3), %v1498_v14  ;;  %1386 = vmatpush3.bf16.msra.mxu1 (!%p298_p3), %v1500_v15  ;;  %v1321_v36 = vld [vmem:[%s1798_s3] ss:$0 sm:$0xff] (!%p298_p3)  ;;  %s1556_s16 = smov (!%p298_p3), 112   ;;  %vm647_vm8 = vcmask (!%p298_p3), 1043456   ;;  %s1557_s21 = smov (!%p298_p3), 80  }
   0x9   : > { %1379 = vmatprep.subr.bf16.mxu0 (!%p298_p3), %v1551_v16  ;;  %1381 = vmatprep.mubr.msk.bf16.mxu0 (!%p298_p3), %vm1552_vm1, %v1551_v16  ;;  %v1322_v38 = vld [vmem:[%s1799_s4] ss:$0 sm:$0xff] (!%p298_p3)  ;;  %s1558_s22 = smov (!%p298_p3), 104   ;;  %s1559_s25 = smov (!%p298_p3), 72  }
   0xa   : > { %1387 = vmatprep.subr.bf16.mxu1 (!%p298_p3), %v1551_v16  ;;  %1389 = vmatprep.mubr.msk.bf16.mxu1 (!%p298_p3), %vm1552_vm1, %v1551_v16 }
   0xc   : > { %1380 = vmatpush3.bf16.msra.mxu0 (!%p298_p3), %v1499_v17  ;;  %1388 = vmatpush3.bf16.msra.mxu1 (!%p298_p3), %v1501_v18 }
   0xd   : > { %1393 = vmatprep.subr.bf16.mxu0 (!%p298_p3), %v1551_v16  ;;  %1399 = vmatprep.subr.bf16.mxu1 (!%p298_p3), %v1551_v16 }
   0xe   : > { %s1809_s27 = smov (!%p342_p4, %s1541_s27), 1 }
   0xf   : > { %s1626_s9 = sshll.u32 %s1809_s27, 3  ;;  %s355_s14 = scalar_lea.vmem %s1797_s2, %s1809_s27 }
  0x10   : > { %s345_s12 = scalar_lea.vmem %s1795_s0, %s1626_s9  ;;  %s352_s15 = scalar_lea.vmem %s1796_s1, %s1626_s9  ;;  %v1699_v63 = vld [vmem:[%s355_s14] ss:$0 sm:$0xff] }
  0x11   : > { %v368_v0 = vld [vmem:[%s345_s12] sm:$0xff]  ;;  %s1554_s27 = smov 96   ;;  %s362_s13 = scalar_lea.vmem %s1803_s8, %s1626_s9 }
  0x12   : > { %v372_v1 = vsel %vm371_vm0, %v368_v0, 0.0  ;;  %v1637_v2 = vld [vmem:[%s352_s15] sm:$0xff]  ;;  %s1555_s15 = smov 88  }
  0x13   : > { %373 = vadd.xlane.f32.xlu0 %v372_v1  ;;  %v475_v3 = vsel %vm371_vm0, %v1637_v2, 0.0 }
  0x17   : > { %476 = vadd.xlane.f32.xlu0 %v475_v3 }
  0xa0   : > { %v374_v4 = vpop.xlane.xlu0 %373 }
  0xa1   : > { %v376_v5 = vmul.f32 0.03125, %v374_v4 }
  0xa3   : > { %v377_v6 = vsub.f32 %v368_v0, %v376_v5 }
  0xa4   : > { %v477_v7 = vpop.xlane.xlu0 %476 }
  0xa5   : > { %v479_v8 = vmul.f32 0.03125, %v477_v7  ;;  %v378_v9 = vmul.f32 %v377_v6, %v377_v6 }
  0xa7   : > { %v480_v10 = vsub.f32 %v1637_v2, %v479_v8  ;;  %v379_v11 = vsel %vm371_vm0, %v378_v9, 0.0 }
  0xa8   : > { %380 = vadd.xlane.f32.xlu1 %v379_v11 }
  0xa9   : > { %v481_v12 = vmul.f32 %v480_v10, %v480_v10 }
  0xab   : > { %v482_v13 = vsel %vm371_vm0, %v481_v12, 0.0 }
  0xac   : > { %483 = vadd.xlane.f32.xlu1 %v482_v13 }
 0x135   : > { %v381_v19 = vpop.xlane.xlu1 %380 }
 0x136   : > { %v382_v20 = vmul.f32 0.032258064, %v381_v19 }
 0x138   : > { %1503 = vrsqrt.f32 %v382_v20  ;;  %vm385_vm2 = vcmp.eq.f32.partialorder %v382_v20, inf  ;;  %v388_v25 = vand.u32 2147483648, %v382_v20  ;;  %vm387_vm3 = vcmp.eq.f32.partialorder %v382_v20, 0.0 }
 0x139   : > { %v484_v21 = vpop.xlane.xlu1 %483 }
 0x13a   : > { %v485_v22 = vmul.f32 0.032258064, %v484_v21 }
 0x13c   : > { %1505 = vrsqrt.f32 %v485_v22  ;;  %vm488_vm4 = vcmp.eq.f32.partialorder %v485_v22, inf  ;;  %v491_v29 = vand.u32 2147483648, %v485_v22  ;;  %vm490_vm5 = vcmp.eq.f32.partialorder %v485_v22, 0.0 }
 0x142   : > { %v1504_v23 = vpop.eup %1503 }
 0x143   : > { %v384_v24 = vmul.f32 %v1504_v23, %v382_v20 }
 0x145   : > { %v386_v26 = vsel %vm385_vm2, %v382_v20, %v384_v24 }
 0x146   : > { %v1506_v27 = vpop.eup %1505  ;;  %v389_v28 = vsel %vm387_vm3, %v388_v25, %v386_v26 }
 0x147   : > { %v390_v30 = vadd.f32 1e-06, %v389_v28  ;;  %v487_v31 = vmul.f32 %v1506_v27, %v485_v22 }
 0x149   : > { %1507 = vrcp.f32 %v390_v30  ;;  %v489_v32 = vsel %vm488_vm4, %v485_v22, %v487_v31  ;;  %v805_v30 = vld [vmem:[%s1802_s7 + $0x4] sm:$0xf] }
 0x14a   : > { %v492_v33 = vsel %vm490_vm5, %v491_v29, %v489_v32  ;;  %v810_v31 = vsel %vm647_vm8, %v805_v30, 0 }
 0x14b   : > { %v493_v34 = vadd.f32 1e-06, %v492_v33 }
 0x14d   : > { %1509 = vrcp.f32 %v493_v34 }
 0x153   : > { %v1508_v35 = vpop.eup %1507 }
 0x154   : > { %v393_v37 = vmul.f32 %v1508_v35, %v377_v6 }
 0x156   : > { %v400_v39 = vmul.f32 %v1321_v36, %v393_v37 }
 0x157   : > { %v1510_v40 = vpop.eup %1509 }
 0x158   : > { %v407_v41 = vadd.f32 %v1322_v38, %v400_v39  ;;  %v496_v42 = vmul.f32 %v1510_v40, %v480_v10 }
 0x15a   : > { %v408_v43 = vpack.c.bf16 %v407_v41, %v407_v41  ;;  %v503_v44 = vmul.f32 %v1321_v36, %v496_v42  ;;  %v692_v36 = vld [vmem:[%s1802_s7] sm:$0xf] }
 0x15b   : > { %v856_v39 = vsel %vm647_vm8, %v692_v36, 0 }
 0x15c   : > { %1382 = vmatmul.mubr.msk.bf16.vlgmr.msra.gmra.mrb[0].mxu0 %vm371_vm0, %v408_v43  ;;  %v510_v45 = vadd.f32 %v1322_v38, %v503_v44 }
 0x15d   : > { %1395 = vmatprep.mubr.msk.bf16.mxu0 %vm1552_vm1, %v1551_v16 }
 0x15e   : > { %v511_v46 = vpack.c.bf16 %v510_v45, %v510_v45 }
 0x160   : > { %1390 = vmatmul.mubr.msk.bf16.vlgmr.msra.gmra.mrb[0].mxu1 %vm371_vm0, %v511_v46 }
 0x161   : > { %1401 = vmatprep.mubr.msk.bf16.mxu1 %vm1552_vm1, %v1551_v16 }
 0x22f   : > { %v462_v47 = vpop.f32.mrb[0].mxu0 }
 0x230   : > { %v468_v48 = vpack.c.bf16 %v462_v47, %v462_v47  ;;  %v1383_v49 = vpop.f32.mrb[1].mxu0 }
 0x231   : > { %v465_v50 = vpop.f32.mrb[2].mxu0 }
 0x232   : > { %470 = vst.msk [vmem:[#allocation2] sm:$0xf] %vm469_vm6, %v468_v48  ;;  %v1384_v51 = vpop.f32.mrb[3].mxu0 }
 0x233   : > { %v565_v52 = vpop.f32.mrb[0].mxu1 }
 0x234   : > { %v1678_v53 = vpack.c.bf16 %v565_v52, %v565_v52  ;;  %v1391_v54 = vpop.f32.mrb[1].mxu1 }
 0x235   : > { %v568_v55 = vpop.f32.mrb[2].mxu1 }
 0x236   : > { %694 = vrot.lane.b32.xlu1 %v1678_v53, %s1553_s11  ;;  %v1392_v56 = vpop.f32.mrb[3].mxu1 }
 0x239   : > { %v573_v57 = vld [vmem:[#allocation2] sm:$0xf] }
 0x23a   : > { %v585_v58 = vsel %vm580_vm7, %v573_v57, 0  ;;  %v1682_v59 = vcombine.low %v573_v57, %v573_v57 }
 0x23b   : > { %1394 = vmatpush3.bf16.xpose.msra.mxu0 %v585_v58 }
 0x23c   : > { %696 = vrot.lane.b32.xlu0 %v1682_v59, %s1553_s11  ;;  %1405 = vmatprep.subr.bf16.mxu0 %v1551_v16 }
 0x242   : > { %1396 = vmatmul.mubr.msk.bf16.vlgmr.msra.gmra.mrb[4].mxu0 %vm580_vm7, %v1678_v53 }
 0x243   : > { %1407 = vmatprep.mubr.msk.bf16.mxu0 %vm1552_vm1, %v1551_v16 }
 0x2a8   : > { %v695_v62 = vpop.permute.xlu1 %694 }
 0x2ae   : > { %v697_v60 = vpop.permute.xlu0 %696 }
 0x2af   : > { %v702_v61 = vsel %vm580_vm7, %v697_v60, 0 }
 0x2b0   : > { %1406 = vmatpush3.bf16.xpose.msra.mxu0 %v702_v61 }
 0x2b1   : > { %1417 = vmatprep.subr.bf16.mxu0 %v1551_v16 }
 0x2b7   : > { %1408 = vmatmul.mubr.msk.bf16.vlgmr.msra.gmra.mrb[8].mxu0 %vm580_vm7, %v695_v62 }
 0x2b8   : > { %1419 = vmatprep.mubr.msk.bf16.mxu0 %vm1552_vm1, %v1551_v16  ;;  %1418 = vmatpush3.bf16.msra.mxu0 %v810_v31 }
 0x2b9   : > { %1429 = vmatprep.subr.bf16.mxu0 %v1551_v16 }
 0x315   : > { %v621_v0 = vpop.f32.mrb[4].mxu0 }
 0x316   : > { %v622_v1 = vadd.f32 %v1699_v63, %v621_v0  ;;  %v1397_v3 = vpop.f32.mrb[5].mxu0 }
 0x317   : > { %v624_v4 = vpop.f32.mrb[6].mxu0 }
 0x318   : > { %v1398_v5 = vpop.f32.mrb[7].mxu0  ;;  %v627_v6 = vsel %vm580_vm7, %v622_v1, -inf }
 0x319   : > { %628 = vmax.xlane.f32.xlu1 %v627_v6 }
 0x38a   : > { %v738_v7 = vpop.f32.mrb[8].mxu0 }
 0x38b   : > { %v739_v8 = vadd.f32 %v1699_v63, %v738_v7  ;;  %v1409_v9 = vpop.f32.mrb[9].mxu0 }
 0x38c   : > { %v741_v10 = vpop.f32.mrb[10].mxu0 }
 0x38d   : > { %v1410_v11 = vpop.f32.mrb[11].mxu0  ;;  %v744_v12 = vsel %vm580_vm7, %v739_v8, -inf }
 0x38e   : > { %745 = vmax.xlane.f32.xlu0 %v744_v12 }
 0x3a6   : > { %v629_v13 = vpop.xlane.xlu1 %628 }
 0x3a7   : > { %v630_v14 = vsub.f32 %v622_v1, %v629_v13 }
 0x3a9   : > { %v631_v15 = vmul.f32 1.442695, %v630_v14 }
 0x3ab   : > { %1511 = vpow2.f32 %v631_v15 }
 0x3b5   : > { %v1512_v17 = vpop.eup %1511 }
 0x3b6   : > { %v633_v18 = vsel %vm580_vm7, %v1512_v17, 0.0 }
 0x3b7   : > { %634 = vadd.xlane.f32.xlu0 %v633_v18 }
 0x3cd   : > { %642 = vrot.lane.b32.xlu0 %v1682_v59, %s1554_s27 }
 0x41b   : > { %v746_v19 = vpop.xlane.xlu0 %745 }
 0x41c   : > { %v747_v20 = vsub.f32 %v739_v8, %v746_v19 }
 0x41e   : > { %v748_v21 = vmul.f32 1.442695, %v747_v20 }
 0x420   : > { %1513 = vpow2.f32 %v748_v21 }
 0x42a   : > { %v1514_v22 = vpop.eup %1513 }
 0x42b   : > { %v750_v23 = vsel %vm580_vm7, %v1514_v22, 0.0 }
 0x42c   : > { %751 = vadd.xlane.f32.xlu1 %v750_v23 }
 0x43d   : > { %756 = vrot.lane.b32.xlu1 %v1682_v59, %s1555_s15 }
 0x441   : > { %900 = vrot.lane.b32.xlu1 %v1682_v59, %s1556_s16 }
 0x444   : > { %v635_v24 = vpop.xlane.xlu0 %634 }
 0x445   : > { %1515 = vrcp.f32 %v635_v24  ;;  %898 = vrot.lane.b32.xlu1 %v1678_v53, %s1556_s16 }
 0x448   : > { %v643_v25 = vpop.permute.xlu0 %642 }
 0x449   : > { %v649_v26 = vsel %vm647_vm8, %v643_v25, 0 }
 0x44a   : > { %1400 = vmatpush3.bf16.msra.mxu1 %v649_v26 }
 0x44b   : > { %1411 = vmatprep.subr.bf16.mxu1 %v1551_v16 }
 0x44f   : > { %v1516_v27 = vpop.eup %1515 }
 0x450   : > { %v637_v28 = vmul.f32 %v1516_v27, %v1512_v17 }
 0x452   : > { %v638_v29 = vpack.c.bf16 %v637_v28, %v637_v28 }
 0x454   : > { %1402 = vmatmul.mubr.msk.bf16.vlgmr.msra.gmra.mrb[4].mxu1 %vm580_vm7, %v638_v29 }
 0x455   : > { %1413 = vmatprep.mubr.msk.bf16.mxu1 %vm1552_vm1, %v1551_v16 }
 0x4b9   : > { %v752_v32 = vpop.xlane.xlu1 %751 }
 0x4ba   : > { %1517 = vrcp.f32 %v752_v32 }
 0x4bd   : > { %v757_v33 = vpop.permute.xlu1 %756 }
 0x4be   : > { %v762_v34 = vsel %vm647_vm8, %v757_v33, 0 }
 0x4bf   : > { %1412 = vmatpush3.bf16.msra.mxu1 %v762_v34 }
 0x4c0   : > { %1423 = vmatprep.subr.bf16.mxu1 %v1551_v16 }
 0x4c1   : > { %v901_v45 = vpop.permute.xlu1 %900 }
 0x4c2   : > { %v906_v50 = vsel %vm580_vm7, %v901_v45, 0 }
 0x4c4   : > { %v1518_v35 = vpop.eup %1517 }
 0x4c5   : > { %v754_v37 = vmul.f32 %v1518_v35, %v1514_v22  ;;  %v899_v52 = vpop.permute.xlu1 %898  ;;  %v1009_v22 = vld [vmem:[%s1802_s7 + $0x8] sm:$0xf] }
 0x4c6   : > { %v1014_v23 = vsel %vm647_vm8, %v1009_v22, 0 }
 0x4c7   : > { %v755_v38 = vpack.c.bf16 %v754_v37, %v754_v37 }
 0x4c9   : > { %1414 = vmatmul.mubr.msk.bf16.vlgmr.msra.gmra.mrb[8].mxu1 %vm580_vm7, %v755_v38 }
 0x4ca   : > { %1424 = vmatpush3.bf16.msra.mxu1 %v856_v39  ;;  %1425 = vmatprep.mubr.msk.bf16.mxu1 %vm1552_vm1, %v1551_v16 }
 0x4cb   : > { %1435 = vmatprep.subr.bf16.mxu1 %v1551_v16 }
 0x527   : > { %v685_v40 = vpop.f32.mrb[4].mxu1 }
 0x528   : > { %v691_v41 = vpack.c.bf16 %v685_v40, %v685_v40  ;;  %v1403_v42 = vpop.f32.mrb[5].mxu1 }
 0x529   : > { %v688_v43 = vpop.f32.mrb[6].mxu1 }
 0x52a   : > { %v1404_v44 = vpop.f32.mrb[7].mxu1  ;;  %1426 = vmatmul.mubr.msk.bf16.vlgmr.msra.gmra.mrb[12].mxu1 %vm580_vm7, %v691_v41 }
 0x52b   : > { %1437 = vmatprep.mubr.msk.bf16.mxu1 %vm1552_vm1, %v1551_v16 }
 0x59c   : > { %v798_v46 = vpop.f32.mrb[8].mxu1 }
 0x59d   : > { %v804_v47 = vpack.c.bf16 %v798_v46, %v798_v46  ;;  %v1415_v48 = vpop.f32.mrb[9].mxu1 }
 0x59e   : > { %v801_v49 = vpop.f32.mrb[10].mxu1 }
 0x59f   : > { %v1416_v51 = vpop.f32.mrb[11].mxu1  ;;  %1420 = vmatmul.mubr.msk.bf16.vlgmr.msra.gmra.mrb[12].mxu0 %vm580_vm7, %v804_v47 }
 0x5a0   : > { %1430 = vmatpush3.bf16.xpose.msra.mxu0 %v906_v50  ;;  %1431 = vmatprep.mubr.msk.bf16.mxu0 %vm1552_vm1, %v1551_v16 }
 0x5a1   : > { %1441 = vmatprep.subr.bf16.mxu0 %v1551_v16 }
 0x5a7   : > { %1432 = vmatmul.mubr.msk.bf16.vlgmr.msra.gmra.mrb[16].mxu0 %vm580_vm7, %v899_v52 }
 0x5a8   : > { %1443 = vmatprep.mubr.msk.bf16.mxu0 %vm1552_vm1, %v1551_v16  ;;  %1442 = vmatpush3.bf16.msra.mxu0 %v1014_v23 }
 0x5a9   : > { %1453 = vmatprep.subr.bf16.mxu0 %v1551_v16 }
 0x5fd   : > { %v892_v54 = vpop.f32.mrb[12].mxu1 }
 0x5fe   : > { %v1427_v55 = vpop.f32.mrb[13].mxu1 }
 0x5ff   : > { %v895_v56 = vpop.f32.mrb[14].mxu1 }
 0x600   : > { %v1428_v57 = vpop.f32.mrb[15].mxu1 }
 0x672   : > { %v846_v58 = vpop.f32.mrb[12].mxu0 }
 0x673   : > { %v1742_v60 = vadd.f32 %v892_v54, %v846_v58  ;;  %v1421_v61 = vpop.f32.mrb[13].mxu0 }
 0x674   : > { %v849_v62 = vpop.f32.mrb[14].mxu0 }
 0x675   : > { %v1422_v0 = vpop.f32.mrb[15].mxu0 }
 0x67a   : > { %v942_v1 = vpop.f32.mrb[16].mxu0 }
 0x67b   : > { %v943_v3 = vadd.f32 %v1699_v63, %v942_v1  ;;  %v1433_v4 = vpop.f32.mrb[17].mxu0 }
 0x67c   : > { %v945_v5 = vpop.f32.mrb[18].mxu0 }
 0x67d   : > { %v1434_v6 = vpop.f32.mrb[19].mxu0  ;;  %v948_v7 = vsel %vm580_vm7, %v943_v3, -inf }
 0x67e   : > { %949 = vmax.xlane.f32.xlu0 %v948_v7 }
 0x694   : > { %960 = vrot.lane.b32.xlu0 %v1682_v59, %s1557_s21 }
 0x698   : > { %1057 = vrot.lane.b32.xlu0 %v1678_v53, %s1558_s22 }
 0x70b   : > { %v950_v8 = vpop.xlane.xlu0 %949 }
 0x70c   : > { %v951_v9 = vsub.f32 %v943_v3, %v950_v8 }
 0x70e   : > { %v952_v10 = vmul.f32 1.442695, %v951_v9 }
 0x70f   : > { %v961_v11 = vpop.permute.xlu0 %960 }
 0x710   : > { %1519 = vpow2.f32 %v952_v10  ;;  %v966_v12 = vsel %vm647_vm8, %v961_v11, 0 }
 0x711   : > { %1436 = vmatpush3.bf16.msra.mxu1 %v966_v12 }
 0x712   : > { %1447 = vmatprep.subr.bf16.mxu1 %v1551_v16 }
 0x713   : > { %v1058_v21 = vpop.permute.xlu0 %1057 }
 0x71a   : > { %v1520_v13 = vpop.eup %1519 }
 0x71b   : > { %v954_v14 = vsel %vm580_vm7, %v1520_v13, 0.0 }
 0x71c   : > { %955 = vadd.xlane.f32.xlu1 %v954_v14 }
 0x72d   : > { %1059 = vrot.lane.b32.xlu1 %v1682_v59, %s1558_s22 }
 0x7a9   : > { %v956_v15 = vpop.xlane.xlu1 %955 }
 0x7aa   : > { %1521 = vrcp.f32 %v956_v15 }
 0x7ad   : > { %v1060_v18 = vpop.permute.xlu1 %1059 }
 0x7ae   : > { %v1065_v20 = vsel %vm580_vm7, %v1060_v18, 0 }
 0x7b4   : > { %v1522_v17 = vpop.eup %1521 }
 0x7b5   : > { %v958_v53 = vmul.f32 %v1522_v17, %v1520_v13 }
 0x7b7   : > { %v959_v19 = vpack.c.bf16 %v958_v53, %v958_v53 }
 0x7b9   : > { %1438 = vmatmul.mubr.msk.bf16.vlgmr.msra.gmra.mrb[16].mxu1 %vm580_vm7, %v959_v19 }
 0x7ba   : > { %1448 = vmatpush3.bf16.xpose.msra.mxu1 %v1065_v20  ;;  %1449 = vmatprep.mubr.msk.bf16.mxu1 %vm1552_vm1, %v1551_v16 }
 0x7bb   : > { %1459 = vmatprep.subr.bf16.mxu1 %v1551_v16 }
 0x7c1   : > { %1450 = vmatmul.mubr.msk.bf16.vlgmr.msra.gmra.mrb[20].mxu1 %vm580_vm7, %v1058_v21 }
 0x7c2   : > { %1461 = vmatprep.mubr.msk.bf16.mxu1 %vm1552_vm1, %v1551_v16 }
 0x88c   : > { %v1002_v24 = vpop.f32.mrb[16].mxu1 }
 0x88d   : > { %v1008_v25 = vpack.c.bf16 %v1002_v24, %v1002_v24  ;;  %v1439_v26 = vpop.f32.mrb[17].mxu1 }
 0x88e   : > { %v1005_v27 = vpop.f32.mrb[18].mxu1 }
 0x88f   : > { %v1440_v28 = vpop.f32.mrb[19].mxu1  ;;  %1444 = vmatmul.mubr.msk.bf16.vlgmr.msra.gmra.mrb[20].mxu0 %vm580_vm7, %v1008_v25 }
 0x890   : > { %1455 = vmatprep.mubr.msk.bf16.mxu0 %vm1552_vm1, %v1551_v16  ;;  %v1168_v16 = vld [vmem:[%s1802_s7 + $0xc] sm:$0xf] }
 0x894   : > { %v1101_v29 = vpop.f32.mrb[20].mxu1 }
 0x895   : > { %v1102_v30 = vadd.f32 %v1699_v63, %v1101_v29  ;;  %v1451_v31 = vpop.f32.mrb[21].mxu1  ;;  %v1173_v63 = vsel %vm647_vm8, %v1168_v16, 0 }
 0x896   : > { %v1104_v32 = vpop.f32.mrb[22].mxu1  ;;  %1460 = vmatpush3.bf16.msra.mxu1 %v1173_v63 }
 0x897   : > { %v1452_v33 = vpop.f32.mrb[23].mxu1  ;;  %v1107_v34 = vsel %vm580_vm7, %v1102_v30, -inf }
 0x898   : > { %1108 = vmax.xlane.f32.xlu1 %v1107_v34 }
 0x925   : > { %v1109_v35 = vpop.xlane.xlu1 %1108 }
 0x926   : > { %v1110_v36 = vsub.f32 %v1102_v30, %v1109_v35 }
 0x928   : > { %v1111_v37 = vmul.f32 1.442695, %v1110_v36 }
 0x92a   : > { %1523 = vpow2.f32 %v1111_v37 }
 0x934   : > { %v1524_v38 = vpop.eup %1523 }
 0x935   : > { %v1113_v39 = vsel %vm580_vm7, %v1524_v38, 0.0 }
 0x936   : > { %1114 = vadd.xlane.f32.xlu0 %v1113_v39 }
 0x94c   : > { %1119 = vrot.lane.b32.xlu0 %v1682_v59, %s1559_s25 }
 0x962   : > { %v1050_v40 = vpop.f32.mrb[20].mxu0 }
 0x963   : > { %v1056_v41 = vadd.f32 %v1050_v40, %v1742_v60  ;;  %v1445_v42 = vpop.f32.mrb[21].mxu0 }
 0x964   : > { %v1053_v43 = vpop.f32.mrb[22].mxu0 }
 0x965   : > { %v1446_v44 = vpop.f32.mrb[23].mxu0 }
 0x9c3   : > { %v1115_v45 = vpop.xlane.xlu0 %1114 }
 0x9c4   : > { %1525 = vrcp.f32 %v1115_v45 }
 0x9c7   : > { %v1120_v46 = vpop.permute.xlu0 %1119 }
 0x9c8   : > { %v1125_v47 = vsel %vm647_vm8, %v1120_v46, 0 }
 0x9c9   : > { %1454 = vmatpush3.bf16.msra.mxu0 %v1125_v47 }
 0x9ce   : > { %v1526_v59 = vpop.eup %1525 }
 0x9cf   : > { %v1117_v48 = vmul.f32 %v1526_v59, %v1524_v38 }
 0x9d1   : > { %v1118_v49 = vpack.c.bf16 %v1117_v48, %v1117_v48 }
 0x9d3   : > { %1456 = vmatmul.mubr.msk.bf16.vlgmr.msra.gmra.mrb[24].mxu0 %vm580_vm7, %v1118_v49 }
 0xaa6   : > { %v1161_v50 = vpop.f32.mrb[24].mxu0 }
 0xaa7   : > { %v1167_v51 = vpack.c.bf16 %v1161_v50, %v1161_v50  ;;  %v1457_v52 = vpop.f32.mrb[25].mxu0 }
 0xaa8   : > { %v1164_v54 = vpop.f32.mrb[26].mxu0 }
 0xaa9   : > { %v1458_v55 = vpop.f32.mrb[27].mxu0  ;;  %1462 = vmatmul.mubr.msk.bf16.vlgmr.msra.gmra.mrb[24].mxu1 %vm580_vm7, %v1167_v51 }
 0xb7c   : > { %v1209_v56 = vpop.f32.mrb[24].mxu1 }
 0xb7d   : > { %v1215_v57 = vadd.f32 %v1209_v56, %v1056_v41  ;;  %v1463_v58 = vpop.f32.mrb[25].mxu1 }
 0xb7e   : > { %v1212_v60 = vpop.f32.mrb[26].mxu1 }
 0xb7f   : > { %v1216_v61 = vadd.f32 %v1215_v57, %v1637_v2  ;;  %v1464_v62 = vpop.f32.mrb[27].mxu1 }
 0xb81   : > { %1217 = vst.msk [vmem:[%s362_s13] sm:$0xff] %vm371_vm0, %v1216_v61 }
 0xb82 PF: > { %s18_s29 = sadd.s32 1, %s1549_s29   ;;  %s1804_s27 = smov %s1545_s28 }
 0xb83   : > { %p15_p5 = scmp.ge.s32.totalorder %s18_s29, 4   ;;  %s1805_s28 = smov %s1807_s30 }
 0xb85   :  { %17 = sbr.rel (!%p15_p5) target bundleno = 2 (0x2), region = 92 }

</bundles_post_ra>
